<compile_context>
chip_gen: v7x
topology: tpu7x:2x2x1
jax: 0.10.0
libtpu: 0.0.40
codegen_flags: <defaults>
</compile_context>

<pallas_src>
import functools

import jax
import jax.numpy as jnp
from jax.experimental import pallas as pl
from jax.experimental.pallas import tpu as pltpu

KH = KW = 3
BN_EPS = 1e-5
LANES = 128


def _round_up(x, m):
    return (x + m - 1) // m * m


_VMEM_LIMIT_CACHE = None


def _vmem_limit_bytes():
    """Per-generation scoped-VMEM limit: ~3/4 of physical, capped at 96 MiB
    (=> ~96 MiB on v5e/v6e's 128 MiB, ~48 MiB on v7x's 64 MiB/TC)."""
    global _VMEM_LIMIT_CACHE
    if _VMEM_LIMIT_CACHE is None:
        phys = 64 * 1024 * 1024  # conservative fallback (v7x per-core VMEM)
        try:
            info = pltpu.get_tpu_info()
            phys = int(getattr(info, "vmem_capacity_bytes", phys))
        except Exception:
            pass
        _VMEM_LIMIT_CACHE = max(32 * 1024 * 1024,
                                min(phys * 3 // 4, 96 * 1024 * 1024))
    return _VMEM_LIMIT_CACHE


def _conv_vmem_bytes(th, W, cin, cout):
    """Everything actually resident for one conv grid step (bytes)."""
    xin = 2 * (th + 2) * W * cin * 2        # double-buffered mid+top+bot blocks (bf16)
    yout = 2 * th * W * cout * 2            # double-buffered conv output block (bf16)
    stats = 2 * 2 * cout * 4                # double-buffered stats block (f32)
    wgt = 2 * KH * KW * cin * cout * 2      # weight, double-buffered by default (bf16)
    xpad = (th + 2) * (W + 2) * cin * 2     # halo scratch (bf16)
    acc = th * W * cout * 4                 # f32 accumulator temporary
    patch = 2 * th * W * cin * 2            # live shifted-slice temporaries (bf16)
    act = th * W * cin * 4                  # f32 input-activation temporary
    return xin + yout + stats + wgt + xpad + acc + patch + act


def _pick_conv_row_tile(N, H, W, cin, cout, vmem_limit):
    """Largest divisor of H whose real working set fits the VMEM budget."""
    budget = int(vmem_limit * 0.85)
    best = 1
    for th in range(1, H + 1):
        if H % th == 0 and _conv_vmem_bytes(th, W, cin, cout) <= budget:
            best = th
    # Keep at least 2 grid steps so both v7x TensorCores get work.
    if N * (H // best) < 2 and best > 1:
        for th in range(best - 1, 0, -1):
            if H % th == 0:
                best = th
                break
    return best


def _pick_elemwise_row_tile(H, W, c, vmem_limit):
    """Coarse tile for the (single, final) element-wise BN+ReLU pass."""
    budget = int(vmem_limit * 0.8)
    per_row = W * c * 2 * (2 + 4)           # double-buffered bf16 in + f32 out
    best = 1
    for th in range(1, H + 1):
        if H % th == 0 and th * per_row <= budget:
            best = th
    return best


# ---------------------------------------------------------------------------
# Fused pass: (prev-layer BN+ReLU on inputs) -> 3x3 conv -> BN partial stats.
# ---------------------------------------------------------------------------
def _conv_stats_kernel(x_top_ref, x_mid_ref, x_bot_ref, w_ref, sc_ref, sh_ref,
                       y_ref, stats_ref, xpad_ref, *, apply_in_act):
    rt = pl.program_id(1)
    n_rt = pl.num_programs(1)
    _, TH, W, Cin = x_mid_ref.shape
    Cout = y_ref.shape[-1]

    def act(v):
        # Previous layer's folded BatchNorm + ReLU, in f32 (no bf16 VPU on v5e).
        if apply_in_act:
            v = (v.astype(jnp.float32) * sc_ref[...].reshape(1, 1, Cin)
                 + sh_ref[...].reshape(1, 1, Cin))
            v = jnp.maximum(v, 0.0)
        return v.astype(xpad_ref.dtype)

    mid = act(x_mid_ref[0])                          # (TH, W, Cin)  bf16
    top = act(x_top_ref[0])                          # (1,  W, Cin)
    bot = act(x_bot_ref[0])                          # (1,  W, Cin)

    # Row halo: neighbouring activation row for interior tiles, conv zero-pad
    # at the image borders.
    zrow = jnp.zeros_like(top)
    top = jnp.where(rt == 0, zrow, top)
    bot = jnp.where(rt == n_rt - 1, zrow, bot)

    # Assemble the zero-padded (TH+2, W+2, Cin) tile directly in VMEM scratch
    # (every element is overwritten each step -> no cross-step dependence).
    zcol = jnp.zeros((TH + 2, 1, Cin), xpad_ref.dtype)
    xpad_ref[:, 0:1, :] = zcol
    xpad_ref[:, W + 1:W + 2, :] = zcol
    xpad_ref[0:1, 1:W + 1, :] = top
    xpad_ref[1:TH + 1, 1:W + 1, :] = mid
    xpad_ref[TH + 1:TH + 2, 1:W + 1, :] = bot

    # 3x3 conv as 9 accumulating MXU matmuls over shifted views (no im2col;
    # K=Cin>=128 keeps the MXU fed, f32 accumulation, MRB-friendly on v7x).
    acc = None
    for k in range(KH * KW):
        kh, kw = divmod(k, KW)
        patch = xpad_ref[kh:kh + TH, kw:kw + W, :].reshape(TH * W, Cin)
        d = jnp.dot(patch, w_ref[k], preferred_element_type=jnp.float32)
        acc = d if acc is None else acc + d

    # Raw conv output stored bf16 (read back by the next layer's fused pass).
    y_ref[0] = acc.reshape(TH, W, Cout).astype(y_ref.dtype)

    # Per-channel partials for the global (N,H,W) BatchNorm statistics.
    s = jnp.sum(acc, axis=0, keepdims=True)          # (1, Cout)
    sq = jnp.sum(acc * acc, axis=0, keepdims=True)   # (1, Cout)
    stats_ref[0, 0] = jnp.concatenate([s, sq], axis=0)


def conv_stats_pass(x, w_k, in_scale, in_shift, *, apply_in_act,
                    row_tile=None, vmem_limit):
    """One fused (prev BN+ReLU) -> conv -> stats pass over an NHWC bf16 input."""
    N, H, W, Cin = x.shape
    Cout = w_k.shape[-1]
    TH = row_tile if row_tile is not None else _pick_conv_row_tile(
        N, H, W, Cin, Cout, vmem_limit)
    assert H % TH == 0, f"row tile {TH} must divide H={H}"
    n_rt = H // TH

    mid_map = lambda n, r: (n, r, 0, 0)
    top_map = lambda n, r: (n, jnp.maximum(r * TH - 1, 0), 0, 0)   # block=1 -> row idx
    bot_map = lambda n, r: (n, jnp.minimum(r * TH + TH, H - 1), 0, 0)

    kernel = functools.partial(_conv_stats_kernel, apply_in_act=apply_in_act)
    y, stats = pl.pallas_call(
        kernel,
        out_shape=(
            jax.ShapeDtypeStruct((N, H, W, Cout), jnp.bfloat16),
            jax.ShapeDtypeStruct((N, n_rt, 2, Cout), jnp.float32),
        ),
        grid=(N, n_rt),
        in_specs=[
            pl.BlockSpec((1, 1, W, Cin), top_map),
            pl.BlockSpec((1, TH, W, Cin), mid_map),
            pl.BlockSpec((1, 1, W, Cin), bot_map),
            pl.BlockSpec((KH * KW, Cin, Cout), lambda n, r: (0, 0, 0)),
            pl.BlockSpec((1, Cin), lambda n, r: (0, 0)),
            pl.BlockSpec((1, Cin), lambda n, r: (0, 0)),
        ],
        out_specs=(
            pl.BlockSpec((1, TH, W, Cout), lambda n, r: (n, r, 0, 0)),
            pl.BlockSpec((1, 1, 2, Cout), lambda n, r: (n, r, 0, 0)),
        ),
        scratch_shapes=[pltpu.VMEM((TH + 2, W + 2, Cin), jnp.bfloat16)],
        compiler_params=pltpu.CompilerParams(
            dimension_semantics=("parallel", "parallel"),
            vmem_limit_bytes=vmem_limit),
    )(x, x, x, w_k, in_scale, in_shift)
    return y, stats


# ---------------------------------------------------------------------------
# Final layer only: folded BatchNorm (per-channel scale/shift) + ReLU.
# ---------------------------------------------------------------------------
def _bn_relu_kernel(y_ref, scale_ref, shift_ref, o_ref):
    C = y_ref.shape[-1]
    y = y_ref[...].astype(jnp.float32)
    scale = scale_ref[...].reshape(1, 1, 1, C)
    shift = shift_ref[...].reshape(1, 1, 1, C)
    o_ref[...] = jnp.maximum(y * scale + shift, 0.0).astype(o_ref.dtype)


def bn_relu_pass(y, scale, shift, *, out_dtype, vmem_limit):
    N, H, W, C = y.shape
    TH = _pick_elemwise_row_tile(H, W, C, vmem_limit)   # coarse: usually whole image
    n_rt = H // TH
    return pl.pallas_call(
        _bn_relu_kernel,
        out_shape=jax.ShapeDtypeStruct((N, H, W, C), out_dtype),
        grid=(N, n_rt),
        in_specs=[
            pl.BlockSpec((1, TH, W, C), lambda n, r: (n, r, 0, 0)),
            pl.BlockSpec((1, C), lambda n, r: (0, 0)),
            pl.BlockSpec((1, C), lambda n, r: (0, 0)),
        ],
        out_specs=pl.BlockSpec((1, TH, W, C), lambda n, r: (n, r, 0, 0)),
        compiler_params=pltpu.CompilerParams(
            dimension_semantics=("parallel", "parallel"),
            vmem_limit_bytes=vmem_limit),
    )(y, scale, shift)


# ---------------------------------------------------------------------------
# Parameter construction / packing.
# ---------------------------------------------------------------------------
def init_vgg_encoder_block_params(key, layer_data):
    """Deterministic parameters mirroring VGGEncoderBlock.__init__ shapes."""
    layer_count, in_channels, out_channels, _ = layer_data
    params = []
    cin = in_channels
    for _ in range(layer_count):
        key, kw_, kb_, kg_, kbe_ = jax.random.split(key, 5)
        w = 0.1 * jax.random.normal(kw_, (out_channels, cin, KH, KW), jnp.float32)
        b = 0.1 * jax.random.normal(kb_, (out_channels,), jnp.float32)
        gamma = 1.0 + 0.1 * jax.random.normal(kg_, (out_channels,), jnp.float32)
        beta = 0.1 * jax.random.normal(kbe_, (out_channels,), jnp.float32)
        params.append({"w": w, "b": b, "gamma": gamma, "beta": beta})
        cin = out_channels
    return params


def prepare_vgg_params(params):
    """Hoisted (one-time) repack: OIHW -> (9, Cin_p, Cout_p) bf16, padded
    gamma/beta.  The conv bias is cancelled exactly by training-mode BN mean
    subtraction and is intentionally dropped."""
    packed = []
    for p in params:
        w = p["w"]                                 # (Cout, Cin, 3, 3) OIHW
        cout, cin = w.shape[0], w.shape[1]
        cin_p = _round_up(cin, LANES)
        cout_p = _round_up(cout, LANES)
        w_hwio = jnp.transpose(w, (2, 3, 1, 0))    # -> (3, 3, Cin, Cout)
        w_hwio = jnp.pad(w_hwio, ((0, 0), (0, 0),
                                  (0, cin_p - cin), (0, cout_p - cout)))
        w_k = w_hwio.reshape(KH * KW, cin_p, cout_p).astype(jnp.bfloat16)
        gamma = jnp.pad(p["gamma"], (0, cout_p - cout)).astype(jnp.float32)
        beta = jnp.pad(p["beta"], (0, cout_p - cout)).astype(jnp.float32)
        packed.append({"w": w_k, "gamma": gamma, "beta": beta})
    return packed


# ---------------------------------------------------------------------------
# Forward pass.
# ---------------------------------------------------------------------------
def vgg_encoder_block_forward(x_nchw, packed_params, *, out_channels,
                              row_tile=None):
    """Forward pass of VGGEncoderBlock; NCHW in/out like PyTorch."""
    vmem_limit = _vmem_limit_bytes()

    x = jnp.transpose(x_nchw, (0, 2, 3, 1))                    # NCHW -> NHWC
    cin = x.shape[-1]
    cin_p = _round_up(cin, LANES)
    # Channel-pad once; padded channels stay exactly zero through every layer
    # (their conv weights / gamma / beta are zero-padded too).
    x = jnp.pad(x, ((0, 0), (0, 0), (0, 0), (0, cin_p - cin))).astype(jnp.bfloat16)

    N, H, W, _ = x.shape
    count = N * H * W
    scale = jnp.ones((1, cin_p), jnp.float32)    # unused for layer 0
    shift = jnp.zeros((1, cin_p), jnp.float32)

    y = x
    for li, p in enumerate(packed_params):
        w_k = p["w"]                              # (9, Cin_p, Cout_p) bf16
        cout_p = w_k.shape[-1]
        y, stats = conv_stats_pass(
            y, w_k, scale, shift, apply_in_act=(li > 0),
            row_tile=row_tile, vmem_limit=vmem_limit)

        # Tiny JAX epilogue: global batch stats -> folded per-channel
        # scale/shift consumed by the next layer's fused kernel.
        ssum = jnp.sum(stats[:, :, 0, :], axis=(0, 1))
        ssq = jnp.sum(stats[:, :, 1, :], axis=(0, 1))
        mean = ssum / count
        var = jnp.maximum(ssq / count - mean * mean, 0.0)       # clamp: f32 cancellation
        inv = jax.lax.rsqrt(var + BN_EPS) * p["gamma"]
        scale = inv.reshape(1, cout_p).astype(jnp.float32)
        shift = (p["beta"] - mean * inv).reshape(1, cout_p).astype(jnp.float32)

    # Only the final layer needs a standalone BN+ReLU pass (coarse grid).
    out = bn_relu_pass(y, scale, shift, out_dtype=jnp.float32,
                       vmem_limit=vmem_limit)
    out = out[..., :out_channels]
    return jnp.transpose(out, (0, 3, 1, 2))                     # NHWC -> NCHW


def _reference_forward(x_nchw, params):
    """Pure-JAX f32 reference (Conv2d + bias -> train-mode BN -> ReLU)."""
    x = x_nchw.astype(jnp.float32)
    for p in params:
        y = jax.lax.conv_general_dilated(
            x, p["w"], window_strides=(1, 1), padding=((1, 1), (1, 1)),
            dimension_numbers=("NCHW", "OIHW", "NCHW"))
        y = y + p["b"].reshape(1, -1, 1, 1)
        mean = jnp.mean(y, axis=(0, 2, 3), keepdims=True)
        var = jnp.mean((y - mean) ** 2, axis=(0, 2, 3), keepdims=True)
        y = (y - mean) * jax.lax.rsqrt(var + BN_EPS)
        y = y * p["gamma"].reshape(1, -1, 1, 1) + p["beta"].reshape(1, -1, 1, 1)
        x = jnp.maximum(y, 0.0)
    return x


if __name__ == "__main__":
    # layer_data = (layer_count, in_channels, out_channels, _)
    layer_data = (2, 4, 8, None)

    key = jax.random.PRNGKey(0)
    key, kx = jax.random.split(key)
    x = jax.random.normal(kx, (2, 4, 16, 16), dtype=jnp.float32)  # NCHW
    params = init_vgg_encoder_block_params(key, layer_data)
    packed = prepare_vgg_params(params)          # one-time repack, outside jit

    # row_tile=8 -> 2 row tiles per image, exercising the halo/grid path.
    fwd = jax.jit(functools.partial(vgg_encoder_block_forward,
                                    out_channels=layer_data[2], row_tile=8))
    out = jax.block_until_ready(fwd(x, packed))

    assert out.shape == (2, layer_data[2], 16, 16), out.shape
    assert bool(jnp.all(out >= 0.0))             # ReLU output is non-negative

    ref = _reference_forward(x, params)
    rel_err = float(jnp.max(jnp.abs(out - ref) / (1.0 + jnp.abs(ref))))
    assert rel_err < 0.1, f"mismatch vs reference: {rel_err}"

    print("KERNEL_OK")
</pallas_src>

<mosaic_0001>
module attributes {stable_mosaic.version = 11 : i64} {
  func.func @_conv_stats_kernel(%arg0: i32, %arg1: i32, %arg2: memref<1x1x16x128xbf16, #tpu.memory_space<vmem>>, %arg3: memref<1x8x16x128xbf16, #tpu.memory_space<vmem>>, %arg4: memref<1x1x16x128xbf16, #tpu.memory_space<vmem>>, %arg5: memref<9x128x128xbf16, #tpu.memory_space<vmem>>, %arg6: memref<1x128xf32, #tpu.memory_space<vmem>>, %arg7: memref<1x128xf32, #tpu.memory_space<vmem>>, %arg8: memref<1x8x16x128xbf16, #tpu.memory_space<vmem>>, %arg9: memref<1x1x2x128xf32, #tpu.memory_space<vmem>>, %arg10: memref<10x18x128xbf16, #tpu.memory_space<vmem>>) attributes {dimension_semantics = [#tpu.dimension_semantics<parallel>, #tpu.dimension_semantics<parallel>], iteration_bounds = array<i64: 2, 2>, scalar_prefetch = 0 : i64, scratch_operands = 1 : i64, tpu.core_type = #tpu.core_type<tc>, window_params = [{transform_indices = @transform_0, window_bounds = array<i64: 1, 1, 16, 128>}, {transform_indices = @transform_1, window_bounds = array<i64: 1, 8, 16, 128>}, {transform_indices = @transform_2, window_bounds = array<i64: 1, 1, 16, 128>}, {pipeline_mode = #tpu.pipeline_mode<synchronous>, transform_indices = @transform_3, window_bounds = array<i64: 9, 128, 128>}, {pipeline_mode = #tpu.pipeline_mode<synchronous>, transform_indices = @transform_4, window_bounds = array<i64: 1, 128>}, {pipeline_mode = #tpu.pipeline_mode<synchronous>, transform_indices = @transform_5, window_bounds = array<i64: 1, 128>}, {transform_indices = @transform_6, window_bounds = array<i64: 1, 8, 16, 128>}, {transform_indices = @transform_7, window_bounds = array<i64: 1, 1, 2, 128>}]} {
    %c0 = arith.constant 0 : index
    %c0_0 = arith.constant 0 : index
    %c0_1 = arith.constant 0 : index
    %c0_2 = arith.constant 0 : index
    %0 = vector.load %arg3[%c0, %c0_0, %c0_1, %c0_2] : memref<1x8x16x128xbf16, #tpu.memory_space<vmem>>, vector<1x8x16x128xbf16>
    %1 = vector.shape_cast %0 : vector<1x8x16x128xbf16> to vector<8x16x128xbf16>
    %c0_3 = arith.constant 0 : index
    %c0_4 = arith.constant 0 : index
    %c0_5 = arith.constant 0 : index
    %c0_6 = arith.constant 0 : index
    %2 = vector.load %arg2[%c0_3, %c0_4, %c0_5, %c0_6] : memref<1x1x16x128xbf16, #tpu.memory_space<vmem>>, vector<1x1x16x128xbf16>
    %3 = vector.shape_cast %2 : vector<1x1x16x128xbf16> to vector<1x16x128xbf16>
    %c0_7 = arith.constant 0 : index
    %c0_8 = arith.constant 0 : index
    %c0_9 = arith.constant 0 : index
    %c0_10 = arith.constant 0 : index
    %4 = vector.load %arg4[%c0_7, %c0_8, %c0_9, %c0_10] : memref<1x1x16x128xbf16, #tpu.memory_space<vmem>>, vector<1x1x16x128xbf16>
    %5 = vector.shape_cast %4 : vector<1x1x16x128xbf16> to vector<1x16x128xbf16>
    %cst = arith.constant 0.000000e+00 : bf16
    %6 = vector.broadcast %cst : bf16 to vector<1x16x128xbf16>
    %c0_i32 = arith.constant 0 : i32
    %7 = arith.cmpi eq, %arg1, %c0_i32 : i32
    %8 = arith.select %7, %6, %3 : vector<1x16x128xbf16>
    %c1_i32 = arith.constant 1 : i32
    %9 = arith.cmpi eq, %arg1, %c1_i32 : i32
    %10 = arith.select %9, %6, %5 : vector<1x16x128xbf16>
    %cst_11 = arith.constant 0.000000e+00 : bf16
    %11 = vector.broadcast %cst_11 : bf16 to vector<10x1x128xbf16>
    %c0_12 = arith.constant 0 : index
    %c0_13 = arith.constant 0 : index
    %c0_14 = arith.constant 0 : index
    %12 = vector.load %arg10[%c0_12, %c0_13, %c0_14] : memref<10x18x128xbf16, #tpu.memory_space<vmem>>, vector<10x1x128xbf16>
    tpu.vector_store %arg10[%c0_12, %c0_13, %c0_14], %11 {strides = array<i32>} : memref<10x18x128xbf16, #tpu.memory_space<vmem>>, vector<10x1x128xbf16>,
    %c0_15 = arith.constant 0 : index
    %c17 = arith.constant 17 : index
    %c0_16 = arith.constant 0 : index
    %13 = vector.load %arg10[%c0_15, %c17, %c0_16] : memref<10x18x128xbf16, #tpu.memory_space<vmem>>, vector<10x1x128xbf16>
    tpu.vector_store %arg10[%c0_15, %c17, %c0_16], %11 {strides = array<i32>} : memref<10x18x128xbf16, #tpu.memory_space<vmem>>, vector<10x1x128xbf16>,
    %c0_17 = arith.constant 0 : index
    %c1 = arith.constant 1 : index
    %c0_18 = arith.constant 0 : index
    %14 = vector.load %arg10[%c0_17, %c1, %c0_18] : memref<10x18x128xbf16, #tpu.memory_space<vmem>>, vector<1x16x128xbf16>
    tpu.vector_store %arg10[%c0_17, %c1, %c0_18], %8 {strides = array<i32>} : memref<10x18x128xbf16, #tpu.memory_space<vmem>>, vector<1x16x128xbf16>,
    %c1_19 = arith.constant 1 : index
    %c1_20 = arith.constant 1 : index
    %c0_21 = arith.constant 0 : index
    %15 = vector.load %arg10[%c1_19, %c1_20, %c0_21] : memref<10x18x128xbf16, #tpu.memory_space<vmem>>, vector<8x16x128xbf16>
    tpu.vector_store %arg10[%c1_19, %c1_20, %c0_21], %1 {strides = array<i32>} : memref<10x18x128xbf16, #tpu.memory_space<vmem>>, vector<8x16x128xbf16>,
    %c9 = arith.constant 9 : index
    %c1_22 = arith.constant 1 : index
    %c0_23 = arith.constant 0 : index
    %16 = vector.load %arg10[%c9, %c1_22, %c0_23] : memref<10x18x128xbf16, #tpu.memory_space<vmem>>, vector<1x16x128xbf16>
    tpu.vector_store %arg10[%c9, %c1_22, %c0_23], %10 {strides = array<i32>} : memref<10x18x128xbf16, #tpu.memory_space<vmem>>, vector<1x16x128xbf16>,
    %c0_24 = arith.constant 0 : index
    %c0_25 = arith.constant 0 : index
    %c0_26 = arith.constant 0 : index
    %17 = vector.load %arg10[%c0_24, %c0_25, %c0_26] : memref<10x18x128xbf16, #tpu.memory_space<vmem>>, vector<8x16x128xbf16>
    %18 = vector.shape_cast %17 : vector<8x16x128xbf16> to vector<128x128xbf16>
    %c0_27 = arith.constant 0 : index
    %c0_28 = arith.constant 0 : index
    %c0_29 = arith.constant 0 : index
    %19 = vector.load %arg5[%c0_27, %c0_28, %c0_29] : memref<9x128x128xbf16, #tpu.memory_space<vmem>>, vector<1x128x128xbf16>
    %20 = vector.shape_cast %19 : vector<1x128x128xbf16> to vector<128x128xbf16>
    %cst_30 = arith.constant dense<0.000000e+00> : vector<128x128xf32>
    %21 = tpu.matmul %18, %20, %cst_30 {dimension_numbers = #tpu.dot_dimension_numbers<[1], [0], [0], [1], [0, 0, 1, 1], [], []>} : vector<128x128xbf16>, vector<128x128xbf16>, vector<128x128xf32> -> vector<128x128xf32>
    %c0_31 = arith.constant 0 : index
    %c1_32 = arith.constant 1 : index
    %c0_33 = arith.constant 0 : index
    %22 = vector.load %arg10[%c0_31, %c1_32, %c0_33] : memref<10x18x128xbf16, #tpu.memory_space<vmem>>, vector<8x16x128xbf16>
    %23 = vector.shape_cast %22 : vector<8x16x128xbf16> to vector<128x128xbf16>
    %c1_34 = arith.constant 1 : index
    %c0_35 = arith.constant 0 : index
    %c0_36 = arith.constant 0 : index
    %24 = vector.load %arg5[%c1_34, %c0_35, %c0_36] : memref<9x128x128xbf16, #tpu.memory_space<vmem>>, vector<1x128x128xbf16>
    %25 = vector.shape_cast %24 : vector<1x128x128xbf16> to vector<128x128xbf16>
    %cst_37 = arith.constant dense<0.000000e+00> : vector<128x128xf32>
    %26 = tpu.matmul %23, %25, %cst_37 {dimension_numbers = #tpu.dot_dimension_numbers<[1], [0], [0], [1], [0, 0, 1, 1], [], []>} : vector<128x128xbf16>, vector<128x128xbf16>, vector<128x128xf32> -> vector<128x128xf32>
    %27 = arith.addf %21, %26 : vector<128x128xf32>
    %c0_38 = arith.constant 0 : index
    %c2 = arith.constant 2 : index
    %c0_39 = arith.constant 0 : index
    %28 = vector.load %arg10[%c0_38, %c2, %c0_39] : memref<10x18x128xbf16, #tpu.memory_space<vmem>>, vector<8x16x128xbf16>
    %29 = vector.shape_cast %28 : vector<8x16x128xbf16> to vector<128x128xbf16>
    %c2_40 = arith.constant 2 : index
    %c0_41 = arith.constant 0 : index
    %c0_42 = arith.constant 0 : index
    %30 = vector.load %arg5[%c2_40, %c0_41, %c0_42] : memref<9x128x128xbf16, #tpu.memory_space<vmem>>, vector<1x128x128xbf16>
    %31 = vector.shape_cast %30 : vector<1x128x128xbf16> to vector<128x128xbf16>
    %cst_43 = arith.constant dense<0.000000e+00> : vector<128x128xf32>
    %32 = tpu.matmul %29, %31, %cst_43 {dimension_numbers = #tpu.dot_dimension_numbers<[1], [0], [0], [1], [0, 0, 1, 1], [], []>} : vector<128x128xbf16>, vector<128x128xbf16>, vector<128x128xf32> -> vector<128x128xf32>
    %33 = arith.addf %27, %32 : vector<128x128xf32>
    %c1_44 = arith.constant 1 : index
    %c0_45 = arith.constant 0 : index
    %c0_46 = arith.constant 0 : index
    %34 = vector.load %arg10[%c1_44, %c0_45, %c0_46] : memref<10x18x128xbf16, #tpu.memory_space<vmem>>, vector<8x16x128xbf16>
    %35 = vector.shape_cast %34 : vector<8x16x128xbf16> to vector<128x128xbf16>
    %c3 = arith.constant 3 : index
    %c0_47 = arith.constant 0 : index
    %c0_48 = arith.constant 0 : index
    %36 = vector.load %arg5[%c3, %c0_47, %c0_48] : memref<9x128x128xbf16, #tpu.memory_space<vmem>>, vector<1x128x128xbf16>
    %37 = vector.shape_cast %36 : vector<1x128x128xbf16> to vector<128x128xbf16>
    %cst_49 = arith.constant dense<0.000000e+00> : vector<128x128xf32>
    %38 = tpu.matmul %35, %37, %cst_49 {dimension_numbers = #tpu.dot_dimension_numbers<[1], [0], [0], [1], [0, 0, 1, 1], [], []>} : vector<128x128xbf16>, vector<128x128xbf16>, vector<128x128xf32> -> vector<128x128xf32>
    %39 = arith.addf %33, %38 : vector<128x128xf32>
    %c1_50 = arith.constant 1 : index
    %c1_51 = arith.constant 1 : index
    %c0_52 = arith.constant 0 : index
    %40 = vector.load %arg10[%c1_50, %c1_51, %c0_52] : memref<10x18x128xbf16, #tpu.memory_space<vmem>>, vector<8x16x128xbf16>
    %41 = vector.shape_cast %40 : vector<8x16x128xbf16> to vector<128x128xbf16>
    %c4 = arith.constant 4 : index
    %c0_53 = arith.constant 0 : index
    %c0_54 = arith.constant 0 : index
    %42 = vector.load %arg5[%c4, %c0_53, %c0_54] : memref<9x128x128xbf16, #tpu.memory_space<vmem>>, vector<1x128x128xbf16>
    %43 = vector.shape_cast %42 : vector<1x128x128xbf16> to vector<128x128xbf16>
    %cst_55 = arith.constant dense<0.000000e+00> : vector<128x128xf32>
    %44 = tpu.matmul %41, %43, %cst_55 {dimension_numbers = #tpu.dot_dimension_numbers<[1], [0], [0], [1], [0, 0, 1, 1], [], []>} : vector<128x128xbf16>, vector<128x128xbf16>, vector<128x128xf32> -> vector<128x128xf32>
    %45 = arith.addf %39, %44 : vector<128x128xf32>
    %c1_56 = arith.constant 1 : index
    %c2_57 = arith.constant 2 : index
    %c0_58 = arith.constant 0 : index
    %46 = vector.load %arg10[%c1_56, %c2_57, %c0_58] : memref<10x18x128xbf16, #tpu.memory_space<vmem>>, vector<8x16x128xbf16>
    %47 = vector.shape_cast %46 : vector<8x16x128xbf16> to vector<128x128xbf16>
    %c5 = arith.constant 5 : index
    %c0_59 = arith.constant 0 : index
    %c0_60 = arith.constant 0 : index
    %48 = vector.load %arg5[%c5, %c0_59, %c0_60] : memref<9x128x128xbf16, #tpu.memory_space<vmem>>, vector<1x128x128xbf16>
    %49 = vector.shape_cast %48 : vector<1x128x128xbf16> to vector<128x128xbf16>
    %cst_61 = arith.constant dense<0.000000e+00> : vector<128x128xf32>
    %50 = tpu.matmul %47, %49, %cst_61 {dimension_numbers = #tpu.dot_dimension_numbers<[1], [0], [0], [1], [0, 0, 1, 1], [], []>} : vector<128x128xbf16>, vector<128x128xbf16>, vector<128x128xf32> -> vector<128x128xf32>
    %51 = arith.addf %45, %50 : vector<128x128xf32>
    %c2_62 = arith.constant 2 : index
    %c0_63 = arith.constant 0 : index
    %c0_64 = arith.constant 0 : index
    %52 = vector.load %arg10[%c2_62, %c0_63, %c0_64] : memref<10x18x128xbf16, #tpu.memory_space<vmem>>, vector<8x16x128xbf16>
    %53 = vector.shape_cast %52 : vector<8x16x128xbf16> to vector<128x128xbf16>
    %c6 = arith.constant 6 : index
    %c0_65 = arith.constant 0 : index
    %c0_66 = arith.constant 0 : index
    %54 = vector.load %arg5[%c6, %c0_65, %c0_66] : memref<9x128x128xbf16, #tpu.memory_space<vmem>>, vector<1x128x128xbf16>
    %55 = vector.shape_cast %54 : vector<1x128x128xbf16> to vector<128x128xbf16>
    %cst_67 = arith.constant dense<0.000000e+00> : vector<128x128xf32>
    %56 = tpu.matmul %53, %55, %cst_67 {dimension_numbers = #tpu.dot_dimension_numbers<[1], [0], [0], [1], [0, 0, 1, 1], [], []>} : vector<128x128xbf16>, vector<128x128xbf16>, vector<128x128xf32> -> vector<128x128xf32>
    %57 = arith.addf %51, %56 : vector<128x128xf32>
    %c2_68 = arith.constant 2 : index
    %c1_69 = arith.constant 1 : index
    %c0_70 = arith.constant 0 : index
    %58 = vector.load %arg10[%c2_68, %c1_69, %c0_70] : memref<10x18x128xbf16, #tpu.memory_space<vmem>>, vector<8x16x128xbf16>
    %59 = vector.shape_cast %58 : vector<8x16x128xbf16> to vector<128x128xbf16>
    %c7 = arith.constant 7 : index
    %c0_71 = arith.constant 0 : index
    %c0_72 = arith.constant 0 : index
    %60 = vector.load %arg5[%c7, %c0_71, %c0_72] : memref<9x128x128xbf16, #tpu.memory_space<vmem>>, vector<1x128x128xbf16>
    %61 = vector.shape_cast %60 : vector<1x128x128xbf16> to vector<128x128xbf16>
    %cst_73 = arith.constant dense<0.000000e+00> : vector<128x128xf32>
    %62 = tpu.matmul %59, %61, %cst_73 {dimension_numbers = #tpu.dot_dimension_numbers<[1], [0], [0], [1], [0, 0, 1, 1], [], []>} : vector<128x128xbf16>, vector<128x128xbf16>, vector<128x128xf32> -> vector<128x128xf32>
    %63 = arith.addf %57, %62 : vector<128x128xf32>
    %c2_74 = arith.constant 2 : index
    %c2_75 = arith.constant 2 : index
    %c0_76 = arith.constant 0 : index
    %64 = vector.load %arg10[%c2_74, %c2_75, %c0_76] : memref<10x18x128xbf16, #tpu.memory_space<vmem>>, vector<8x16x128xbf16>
    %65 = vector.shape_cast %64 : vector<8x16x128xbf16> to vector<128x128xbf16>
    %c8 = arith.constant 8 : index
    %c0_77 = arith.constant 0 : index
    %c0_78 = arith.constant 0 : index
    %66 = vector.load %arg5[%c8, %c0_77, %c0_78] : memref<9x128x128xbf16, #tpu.memory_space<vmem>>, vector<1x128x128xbf16>
    %67 = vector.shape_cast %66 : vector<1x128x128xbf16> to vector<128x128xbf16>
    %cst_79 = arith.constant dense<0.000000e+00> : vector<128x128xf32>
    %68 = tpu.matmul %65, %67, %cst_79 {dimension_numbers = #tpu.dot_dimension_numbers<[1], [0], [0], [1], [0, 0, 1, 1], [], []>} : vector<128x128xbf16>, vector<128x128xbf16>, vector<128x128xf32> -> vector<128x128xf32>
    %69 = arith.addf %63, %68 : vector<128x128xf32>
    %70 = vector.shape_cast %69 : vector<128x128xf32> to vector<8x16x128xf32>
    %71 = arith.truncf %70 : vector<8x16x128xf32> to vector<8x16x128xbf16>
    %c0_80 = arith.constant 0 : index
    %c0_81 = arith.constant 0 : index
    %c0_82 = arith.constant 0 : index
    %c0_83 = arith.constant 0 : index
    %72 = vector.load %arg8[%c0_80, %c0_81, %c0_82, %c0_83] : memref<1x8x16x128xbf16, #tpu.memory_space<vmem>>, vector<1x8x16x128xbf16>
    %73 = vector.shape_cast %72 : vector<1x8x16x128xbf16> to vector<8x16x128xbf16>
    %74 = vector.shape_cast %71 : vector<8x16x128xbf16> to vector<1x8x16x128xbf16>
    tpu.vector_store %arg8[%c0_80, %c0_81, %c0_82, %c0_83], %74 {strides = array<i32>} : memref<1x8x16x128xbf16, #tpu.memory_space<vmem>>, vector<1x8x16x128xbf16>,
    %cst_84 = arith.constant dense<0.000000e+00> : vector<128xf32>
    %75 = vector.multi_reduction <add>, %69, %cst_84 [0] : vector<128x128xf32> to vector<128xf32>
    %76 = vector.shape_cast %75 : vector<128xf32> to vector<1x128xf32>
    %77 = arith.mulf %69, %69 : vector<128x128xf32>
    %cst_85 = arith.constant dense<0.000000e+00> : vector<128xf32>
    %78 = vector.multi_reduction <add>, %77, %cst_85 [0] : vector<128x128xf32> to vector<128xf32>
    %79 = vector.shape_cast %78 : vector<128xf32> to vector<1x128xf32>
    %80 = tpu.concatenate %76, %79 in 0 : vector<1x128xf32>, vector<1x128xf32> -> vector<2x128xf32>
    %c0_86 = arith.constant 0 : index
    %c0_87 = arith.constant 0 : index
    %c0_88 = arith.constant 0 : index
    %c0_89 = arith.constant 0 : index
    %81 = vector.load %arg9[%c0_86, %c0_87, %c0_88, %c0_89] : memref<1x1x2x128xf32, #tpu.memory_space<vmem>>, vector<1x1x2x128xf32>
    %82 = vector.shape_cast %81 : vector<1x1x2x128xf32> to vector<2x128xf32>
    %83 = vector.shape_cast %80 : vector<2x128xf32> to vector<1x1x2x128xf32>
    tpu.vector_store %arg9[%c0_86, %c0_87, %c0_88, %c0_89], %83 {strides = array<i32>} : memref<1x1x2x128xf32, #tpu.memory_space<vmem>>, vector<1x1x2x128xf32>,
    return
  }
  func.func @transform_0(%arg0: i32, %arg1: i32) -> (i32, i32, i32, i32) {
    %c8_i32 = arith.constant 8 : i32
    %0 = arith.muli %arg1, %c8_i32 : i32
    %c1_i32 = arith.constant 1 : i32
    %1 = arith.subi %0, %c1_i32 : i32
    %c0_i32 = arith.constant 0 : i32
    %2 = arith.maxsi %1, %c0_i32 : i32
    %c0_i32_0 = arith.constant 0 : i32
    %c0_i32_1 = arith.constant 0 : i32
    %c0_i32_2 = arith.constant 0 : i32
    return %arg0, %2, %c0_i32_0, %c0_i32_1 : i32, i32, i32, i32
  }
  func.func @transform_1(%arg0: i32, %arg1: i32) -> (i32, i32, i32, i32) {
    %c0_i32 = arith.constant 0 : i32
    %c0_i32_0 = arith.constant 0 : i32
    %c0_i32_1 = arith.constant 0 : i32
    return %arg0, %arg1, %c0_i32, %c0_i32_0 : i32, i32, i32, i32
  }
  func.func @transform_2(%arg0: i32, %arg1: i32) -> (i32, i32, i32, i32) {
    %c8_i32 = arith.constant 8 : i32
    %0 = arith.muli %arg1, %c8_i32 : i32
    %c8_i32_0 = arith.constant 8 : i32
    %1 = arith.addi %0, %c8_i32_0 : i32
    %c15_i32 = arith.constant 15 : i32
    %2 = arith.minsi %1, %c15_i32 : i32
    %c0_i32 = arith.constant 0 : i32
    %c0_i32_1 = arith.constant 0 : i32
    %c0_i32_2 = arith.constant 0 : i32
    return %arg0, %2, %c0_i32, %c0_i32_1 : i32, i32, i32, i32
  }
  func.func @transform_3(%arg0: i32, %arg1: i32) -> (i32, i32, i32) {
    %c0_i32 = arith.constant 0 : i32
    %c0_i32_0 = arith.constant 0 : i32
    %c0_i32_1 = arith.constant 0 : i32
    %c0_i32_2 = arith.constant 0 : i32
    return %c0_i32, %c0_i32_0, %c0_i32_1 : i32, i32, i32
  }
  func.func @transform_4(%arg0: i32, %arg1: i32) -> (i32, i32) {
    %c0_i32 = arith.constant 0 : i32
    %c0_i32_0 = arith.constant 0 : i32
    %c0_i32_1 = arith.constant 0 : i32
    return %c0_i32, %c0_i32_0 : i32, i32
  }
  func.func @transform_5(%arg0: i32, %arg1: i32) -> (i32, i32) {
    %c0_i32 = arith.constant 0 : i32
    %c0_i32_0 = arith.constant 0 : i32
    %c0_i32_1 = arith.constant 0 : i32
    return %c0_i32, %c0_i32_0 : i32, i32
  }
  func.func @transform_6(%arg0: i32, %arg1: i32) -> (i32, i32, i32, i32) {
    %c0_i32 = arith.constant 0 : i32
    %c0_i32_0 = arith.constant 0 : i32
    %c0_i32_1 = arith.constant 0 : i32
    return %arg0, %arg1, %c0_i32, %c0_i32_0 : i32, i32, i32, i32
  }
  func.func @transform_7(%arg0: i32, %arg1: i32) -> (i32, i32, i32, i32) {
    %c0_i32 = arith.constant 0 : i32
    %c0_i32_0 = arith.constant 0 : i32
    %c0_i32_1 = arith.constant 0 : i32
    return %arg0, %arg1, %c0_i32, %c0_i32_0 : i32, i32, i32, i32
  }
}

module attributes {stable_mosaic.version = 11 : i64} {
  func.func @_bn_relu_kernel(%arg0: i32, %arg1: i32, %arg2: memref<1x16x16x128xbf16, #tpu.memory_space<vmem>>, %arg3: memref<1x128xf32, #tpu.memory_space<vmem>>, %arg4: memref<1x128xf32, #tpu.memory_space<vmem>>, %arg5: memref<1x16x16x128xf32, #tpu.memory_space<vmem>>) attributes {dimension_semantics = [#tpu.dimension_semantics<parallel>, #tpu.dimension_semantics<parallel>], iteration_bounds = array<i64: 2, 1>, scalar_prefetch = 0 : i64, scratch_operands = 0 : i64, tpu.core_type = #tpu.core_type<tc>, window_params = [{transform_indices = @transform_0, window_bounds = array<i64: 1, 16, 16, 128>}, {pipeline_mode = #tpu.pipeline_mode<synchronous>, transform_indices = @transform_1, window_bounds = array<i64: 1, 128>}, {pipeline_mode = #tpu.pipeline_mode<synchronous>, transform_indices = @transform_2, window_bounds = array<i64: 1, 128>}, {transform_indices = @transform_3, window_bounds = array<i64: 1, 16, 16, 128>}]} {
    %c0 = arith.constant 0 : index
    %c0_0 = arith.constant 0 : index
    %c0_1 = arith.constant 0 : index
    %c0_2 = arith.constant 0 : index
    %0 = vector.load %arg2[%c0, %c0_0, %c0_1, %c0_2] : memref<1x16x16x128xbf16, #tpu.memory_space<vmem>>, vector<1x16x16x128xbf16>
    %1 = arith.extf %0 : vector<1x16x16x128xbf16> to vector<1x16x16x128xf32>
    %c0_3 = arith.constant 0 : index
    %c0_4 = arith.constant 0 : index
    %2 = vector.load %arg3[%c0_3, %c0_4] : memref<1x128xf32, #tpu.memory_space<vmem>>, vector<1x128xf32>
    %3 = vector.shape_cast %2 : vector<1x128xf32> to vector<1x1x1x128xf32>
    %c0_5 = arith.constant 0 : index
    %c0_6 = arith.constant 0 : index
    %4 = vector.load %arg4[%c0_5, %c0_6] : memref<1x128xf32, #tpu.memory_space<vmem>>, vector<1x128xf32>
    %5 = vector.shape_cast %4 : vector<1x128xf32> to vector<1x1x1x128xf32>
    %6 = vector.broadcast %3 : vector<1x1x1x128xf32> to vector<1x16x16x128xf32>
    %7 = arith.mulf %1, %6 : vector<1x16x16x128xf32>
    %8 = vector.broadcast %5 : vector<1x1x1x128xf32> to vector<1x16x16x128xf32>
    %9 = arith.addf %7, %8 : vector<1x16x16x128xf32>
    %cst = arith.constant 0.000000e+00 : f32
    %10 = vector.broadcast %cst : f32 to vector<1x16x16x128xf32>
    %11 = arith.maximumf %9, %10 : vector<1x16x16x128xf32>
    %c0_7 = arith.constant 0 : index
    %c0_8 = arith.constant 0 : index
    %c0_9 = arith.constant 0 : index
    %c0_10 = arith.constant 0 : index
    %12 = vector.load %arg5[%c0_7, %c0_8, %c0_9, %c0_10] : memref<1x16x16x128xf32, #tpu.memory_space<vmem>>, vector<1x16x16x128xf32>
    tpu.vector_store %arg5[%c0_7, %c0_8, %c0_9, %c0_10], %11 {strides = array<i32>} : memref<1x16x16x128xf32, #tpu.memory_space<vmem>>, vector<1x16x16x128xf32>,
    return
  }
  func.func @transform_0(%arg0: i32, %arg1: i32) -> (i32, i32, i32, i32) {
    %c0_i32 = arith.constant 0 : i32
    %c0_i32_0 = arith.constant 0 : i32
    %c0_i32_1 = arith.constant 0 : i32
    return %arg0, %arg1, %c0_i32, %c0_i32_0 : i32, i32, i32, i32
  }
  func.func @transform_1(%arg0: i32, %arg1: i32) -> (i32, i32) {
    %c0_i32 = arith.constant 0 : i32
    %c0_i32_0 = arith.constant 0 : i32
    %c0_i32_1 = arith.constant 0 : i32
    return %c0_i32, %c0_i32_0 : i32, i32
  }
  func.func @transform_2(%arg0: i32, %arg1: i32) -> (i32, i32) {
    %c0_i32 = arith.constant 0 : i32
    %c0_i32_0 = arith.constant 0 : i32
    %c0_i32_1 = arith.constant 0 : i32
    return %c0_i32, %c0_i32_0 : i32, i32
  }
  func.func @transform_3(%arg0: i32, %arg1: i32) -> (i32, i32, i32, i32) {
    %c0_i32 = arith.constant 0 : i32
    %c0_i32_0 = arith.constant 0 : i32
    %c0_i32_1 = arith.constant 0 : i32
    return %arg0, %arg1, %c0_i32, %c0_i32_0 : i32, i32, i32, i32
  }
}

module attributes {stable_mosaic.version = 11 : i64} {
  func.func @_conv_stats_kernel(%arg0: i32, %arg1: i32, %arg2: memref<1x1x16x128xbf16, #tpu.memory_space<vmem>>, %arg3: memref<1x8x16x128xbf16, #tpu.memory_space<vmem>>, %arg4: memref<1x1x16x128xbf16, #tpu.memory_space<vmem>>, %arg5: memref<9x128x128xbf16, #tpu.memory_space<vmem>>, %arg6: memref<1x128xf32, #tpu.memory_space<vmem>>, %arg7: memref<1x128xf32, #tpu.memory_space<vmem>>, %arg8: memref<1x8x16x128xbf16, #tpu.memory_space<vmem>>, %arg9: memref<1x1x2x128xf32, #tpu.memory_space<vmem>>, %arg10: memref<10x18x128xbf16, #tpu.memory_space<vmem>>) attributes {dimension_semantics = [#tpu.dimension_semantics<parallel>, #tpu.dimension_semantics<parallel>], iteration_bounds = array<i64: 2, 2>, scalar_prefetch = 0 : i64, scratch_operands = 1 : i64, tpu.core_type = #tpu.core_type<tc>, window_params = [{transform_indices = @transform_0, window_bounds = array<i64: 1, 1, 16, 128>}, {transform_indices = @transform_1, window_bounds = array<i64: 1, 8, 16, 128>}, {transform_indices = @transform_2, window_bounds = array<i64: 1, 1, 16, 128>}, {pipeline_mode = #tpu.pipeline_mode<synchronous>, transform_indices = @transform_3, window_bounds = array<i64: 9, 128, 128>}, {pipeline_mode = #tpu.pipeline_mode<synchronous>, transform_indices = @transform_4, window_bounds = array<i64: 1, 128>}, {pipeline_mode = #tpu.pipeline_mode<synchronous>, transform_indices = @transform_5, window_bounds = array<i64: 1, 128>}, {transform_indices = @transform_6, window_bounds = array<i64: 1, 8, 16, 128>}, {transform_indices = @transform_7, window_bounds = array<i64: 1, 1, 2, 128>}]} {
    %c0 = arith.constant 0 : index
    %c0_0 = arith.constant 0 : index
    %c0_1 = arith.constant 0 : index
    %c0_2 = arith.constant 0 : index
    %0 = vector.load %arg3[%c0, %c0_0, %c0_1, %c0_2] : memref<1x8x16x128xbf16, #tpu.memory_space<vmem>>, vector<1x8x16x128xbf16>
    %1 = vector.shape_cast %0 : vector<1x8x16x128xbf16> to vector<8x16x128xbf16>
    %2 = arith.extf %1 : vector<8x16x128xbf16> to vector<8x16x128xf32>
    %c0_3 = arith.constant 0 : index
    %c0_4 = arith.constant 0 : index
    %3 = vector.load %arg6[%c0_3, %c0_4] : memref<1x128xf32, #tpu.memory_space<vmem>>, vector<1x128xf32>
    %4 = vector.shape_cast %3 : vector<1x128xf32> to vector<1x1x128xf32>
    %5 = vector.broadcast %4 : vector<1x1x128xf32> to vector<8x16x128xf32>
    %6 = arith.mulf %2, %5 : vector<8x16x128xf32>
    %c0_5 = arith.constant 0 : index
    %c0_6 = arith.constant 0 : index
    %7 = vector.load %arg7[%c0_5, %c0_6] : memref<1x128xf32, #tpu.memory_space<vmem>>, vector<1x128xf32>
    %8 = vector.shape_cast %7 : vector<1x128xf32> to vector<1x1x128xf32>
    %9 = vector.broadcast %8 : vector<1x1x128xf32> to vector<8x16x128xf32>
    %10 = arith.addf %6, %9 : vector<8x16x128xf32>
    %cst = arith.constant 0.000000e+00 : f32
    %11 = vector.broadcast %cst : f32 to vector<8x16x128xf32>
    %12 = arith.maximumf %10, %11 : vector<8x16x128xf32>
    %13 = arith.truncf %12 : vector<8x16x128xf32> to vector<8x16x128xbf16>
    %c0_7 = arith.constant 0 : index
    %c0_8 = arith.constant 0 : index
    %c0_9 = arith.constant 0 : index
    %c0_10 = arith.constant 0 : index
    %14 = vector.load %arg2[%c0_7, %c0_8, %c0_9, %c0_10] : memref<1x1x16x128xbf16, #tpu.memory_space<vmem>>, vector<1x1x16x128xbf16>
    %15 = vector.shape_cast %14 : vector<1x1x16x128xbf16> to vector<1x16x128xbf16>
    %16 = arith.extf %15 : vector<1x16x128xbf16> to vector<1x16x128xf32>
    %c0_11 = arith.constant 0 : index
    %c0_12 = arith.constant 0 : index
    %17 = vector.load %arg6[%c0_11, %c0_12] : memref<1x128xf32, #tpu.memory_space<vmem>>, vector<1x128xf32>
    %18 = vector.shape_cast %17 : vector<1x128xf32> to vector<1x1x128xf32>
    %19 = vector.broadcast %18 : vector<1x1x128xf32> to vector<1x16x128xf32>
    %20 = arith.mulf %16, %19 : vector<1x16x128xf32>
    %c0_13 = arith.constant 0 : index
    %c0_14 = arith.constant 0 : index
    %21 = vector.load %arg7[%c0_13, %c0_14] : memref<1x128xf32, #tpu.memory_space<vmem>>, vector<1x128xf32>
    %22 = vector.shape_cast %21 : vector<1x128xf32> to vector<1x1x128xf32>
    %23 = vector.broadcast %22 : vector<1x1x128xf32> to vector<1x16x128xf32>
    %24 = arith.addf %20, %23 : vector<1x16x128xf32>
    %cst_15 = arith.constant 0.000000e+00 : f32
    %25 = vector.broadcast %cst_15 : f32 to vector<1x16x128xf32>
    %26 = arith.maximumf %24, %25 : vector<1x16x128xf32>
    %27 = arith.truncf %26 : vector<1x16x128xf32> to vector<1x16x128xbf16>
    %c0_16 = arith.constant 0 : index
    %c0_17 = arith.constant 0 : index
    %c0_18 = arith.constant 0 : index
    %c0_19 = arith.constant 0 : index
    %28 = vector.load %arg4[%c0_16, %c0_17, %c0_18, %c0_19] : memref<1x1x16x128xbf16, #tpu.memory_space<vmem>>, vector<1x1x16x128xbf16>
    %29 = vector.shape_cast %28 : vector<1x1x16x128xbf16> to vector<1x16x128xbf16>
    %30 = arith.extf %29 : vector<1x16x128xbf16> to vector<1x16x128xf32>
    %c0_20 = arith.constant 0 : index
    %c0_21 = arith.constant 0 : index
    %31 = vector.load %arg6[%c0_20, %c0_21] : memref<1x128xf32, #tpu.memory_space<vmem>>, vector<1x128xf32>
    %32 = vector.shape_cast %31 : vector<1x128xf32> to vector<1x1x128xf32>
    %33 = vector.broadcast %32 : vector<1x1x128xf32> to vector<1x16x128xf32>
    %34 = arith.mulf %30, %33 : vector<1x16x128xf32>
    %c0_22 = arith.constant 0 : index
    %c0_23 = arith.constant 0 : index
    %35 = vector.load %arg7[%c0_22, %c0_23] : memref<1x128xf32, #tpu.memory_space<vmem>>, vector<1x128xf32>
    %36 = vector.shape_cast %35 : vector<1x128xf32> to vector<1x1x128xf32>
    %37 = vector.broadcast %36 : vector<1x1x128xf32> to vector<1x16x128xf32>
    %38 = arith.addf %34, %37 : vector<1x16x128xf32>
    %cst_24 = arith.constant 0.000000e+00 : f32
    %39 = vector.broadcast %cst_24 : f32 to vector<1x16x128xf32>
    %40 = arith.maximumf %38, %39 : vector<1x16x128xf32>
    %41 = arith.truncf %40 : vector<1x16x128xf32> to vector<1x16x128xbf16>
    %cst_25 = arith.constant 0.000000e+00 : bf16
    %42 = vector.broadcast %cst_25 : bf16 to vector<1x16x128xbf16>
    %c0_i32 = arith.constant 0 : i32
    %43 = arith.cmpi eq, %arg1, %c0_i32 : i32
    %44 = arith.select %43, %42, %27 : vector<1x16x128xbf16>
    %c1_i32 = arith.constant 1 : i32
    %45 = arith.cmpi eq, %arg1, %c1_i32 : i32
    %46 = arith.select %45, %42, %41 : vector<1x16x128xbf16>
    %cst_26 = arith.constant 0.000000e+00 : bf16
    %47 = vector.broadcast %cst_26 : bf16 to vector<10x1x128xbf16>
    %c0_27 = arith.constant 0 : index
    %c0_28 = arith.constant 0 : index
    %c0_29 = arith.constant 0 : index
    %48 = vector.load %arg10[%c0_27, %c0_28, %c0_29] : memref<10x18x128xbf16, #tpu.memory_space<vmem>>, vector<10x1x128xbf16>
    tpu.vector_store %arg10[%c0_27, %c0_28, %c0_29], %47 {strides = array<i32>} : memref<10x18x128xbf16, #tpu.memory_space<vmem>>, vector<10x1x128xbf16>,
    %c0_30 = arith.constant 0 : index
    %c17 = arith.constant 17 : index
    %c0_31 = arith.constant 0 : index
    %49 = vector.load %arg10[%c0_30, %c17, %c0_31] : memref<10x18x128xbf16, #tpu.memory_space<vmem>>, vector<10x1x128xbf16>
    tpu.vector_store %arg10[%c0_30, %c17, %c0_31], %47 {strides = array<i32>} : memref<10x18x128xbf16, #tpu.memory_space<vmem>>, vector<10x1x128xbf16>,
    %c0_32 = arith.constant 0 : index
    %c1 = arith.constant 1 : index
    %c0_33 = arith.constant 0 : index
    %50 = vector.load %arg10[%c0_32, %c1, %c0_33] : memref<10x18x128xbf16, #tpu.memory_space<vmem>>, vector<1x16x128xbf16>
    tpu.vector_store %arg10[%c0_32, %c1, %c0_33], %44 {strides = array<i32>} : memref<10x18x128xbf16, #tpu.memory_space<vmem>>, vector<1x16x128xbf16>,
    %c1_34 = arith.constant 1 : index
    %c1_35 = arith.constant 1 : index
    %c0_36 = arith.constant 0 : index
    %51 = vector.load %arg10[%c1_34, %c1_35, %c0_36] : memref<10x18x128xbf16, #tpu.memory_space<vmem>>, vector<8x16x128xbf16>
    tpu.vector_store %arg10[%c1_34, %c1_35, %c0_36], %13 {strides = array<i32>} : memref<10x18x128xbf16, #tpu.memory_space<vmem>>, vector<8x16x128xbf16>,
    %c9 = arith.constant 9 : index
    %c1_37 = arith.constant 1 : index
    %c0_38 = arith.constant 0 : index
    %52 = vector.load %arg10[%c9, %c1_37, %c0_38] : memref<10x18x128xbf16, #tpu.memory_space<vmem>>, vector<1x16x128xbf16>
    tpu.vector_store %arg10[%c9, %c1_37, %c0_38], %46 {strides = array<i32>} : memref<10x18x128xbf16, #tpu.memory_space<vmem>>, vector<1x16x128xbf16>,
    %c0_39 = arith.constant 0 : index
    %c0_40 = arith.constant 0 : index
    %c0_41 = arith.constant 0 : index
    %53 = vector.load %arg10[%c0_39, %c0_40, %c0_41] : memref<10x18x128xbf16, #tpu.memory_space<vmem>>, vector<8x16x128xbf16>
    %54 = vector.shape_cast %53 : vector<8x16x128xbf16> to vector<128x128xbf16>
    %c0_42 = arith.constant 0 : index
    %c0_43 = arith.constant 0 : index
    %c0_44 = arith.constant 0 : index
    %55 = vector.load %arg5[%c0_42, %c0_43, %c0_44] : memref<9x128x128xbf16, #tpu.memory_space<vmem>>, vector<1x128x128xbf16>
    %56 = vector.shape_cast %55 : vector<1x128x128xbf16> to vector<128x128xbf16>
    %cst_45 = arith.constant dense<0.000000e+00> : vector<128x128xf32>
    %57 = tpu.matmul %54, %56, %cst_45 {dimension_numbers = #tpu.dot_dimension_numbers<[1], [0], [0], [1], [0, 0, 1, 1], [], []>} : vector<128x128xbf16>, vector<128x128xbf16>, vector<128x128xf32> -> vector<128x128xf32>
    %c0_46 = arith.constant 0 : index
    %c1_47 = arith.constant 1 : index
    %c0_48 = arith.constant 0 : index
    %58 = vector.load %arg10[%c0_46, %c1_47, %c0_48] : memref<10x18x128xbf16, #tpu.memory_space<vmem>>, vector<8x16x128xbf16>
    %59 = vector.shape_cast %58 : vector<8x16x128xbf16> to vector<128x128xbf16>
    %c1_49 = arith.constant 1 : index
    %c0_50 = arith.constant 0 : index
    %c0_51 = arith.constant 0 : index
    %60 = vector.load %arg5[%c1_49, %c0_50, %c0_51] : memref<9x128x128xbf16, #tpu.memory_space<vmem>>, vector<1x128x128xbf16>
    %61 = vector.shape_cast %60 : vector<1x128x128xbf16> to vector<128x128xbf16>
    %cst_52 = arith.constant dense<0.000000e+00> : vector<128x128xf32>
    %62 = tpu.matmul %59, %61, %cst_52 {dimension_numbers = #tpu.dot_dimension_numbers<[1], [0], [0], [1], [0, 0, 1, 1], [], []>} : vector<128x128xbf16>, vector<128x128xbf16>, vector<128x128xf32> -> vector<128x128xf32>
    %63 = arith.addf %57, %62 : vector<128x128xf32>
    %c0_53 = arith.constant 0 : index
    %c2 = arith.constant 2 : index
    %c0_54 = arith.constant 0 : index
    %64 = vector.load %arg10[%c0_53, %c2, %c0_54] : memref<10x18x128xbf16, #tpu.memory_space<vmem>>, vector<8x16x128xbf16>
    %65 = vector.shape_cast %64 : vector<8x16x128xbf16> to vector<128x128xbf16>
    %c2_55 = arith.constant 2 : index
    %c0_56 = arith.constant 0 : index
    %c0_57 = arith.constant 0 : index
    %66 = vector.load %arg5[%c2_55, %c0_56, %c0_57] : memref<9x128x128xbf16, #tpu.memory_space<vmem>>, vector<1x128x128xbf16>
    %67 = vector.shape_cast %66 : vector<1x128x128xbf16> to vector<128x128xbf16>
    %cst_58 = arith.constant dense<0.000000e+00> : vector<128x128xf32>
    %68 = tpu.matmul %65, %67, %cst_58 {dimension_numbers = #tpu.dot_dimension_numbers<[1], [0], [0], [1], [0, 0, 1, 1], [], []>} : vector<128x128xbf16>, vector<128x128xbf16>, vector<128x128xf32> -> vector<128x128xf32>
    %69 = arith.addf %63, %68 : vector<128x128xf32>
    %c1_59 = arith.constant 1 : index
    %c0_60 = arith.constant 0 : index
    %c0_61 = arith.constant 0 : index
    %70 = vector.load %arg10[%c1_59, %c0_60, %c0_61] : memref<10x18x128xbf16, #tpu.memory_space<vmem>>, vector<8x16x128xbf16>
    %71 = vector.shape_cast %70 : vector<8x16x128xbf16> to vector<128x128xbf16>
    %c3 = arith.constant 3 : index
    %c0_62 = arith.constant 0 : index
    %c0_63 = arith.constant 0 : index
    %72 = vector.load %arg5[%c3, %c0_62, %c0_63] : memref<9x128x128xbf16, #tpu.memory_space<vmem>>, vector<1x128x128xbf16>
    %73 = vector.shape_cast %72 : vector<1x128x128xbf16> to vector<128x128xbf16>
    %cst_64 = arith.constant dense<0.000000e+00> : vector<128x128xf32>
    %74 = tpu.matmul %71, %73, %cst_64 {dimension_numbers = #tpu.dot_dimension_numbers<[1], [0], [0], [1], [0, 0, 1, 1], [], []>} : vector<128x128xbf16>, vector<128x128xbf16>, vector<128x128xf32> -> vector<128x128xf32>
    %75 = arith.addf %69, %74 : vector<128x128xf32>
    %c1_65 = arith.constant 1 : index
    %c1_66 = arith.constant 1 : index
    %c0_67 = arith.constant 0 : index
    %76 = vector.load %arg10[%c1_65, %c1_66, %c0_67] : memref<10x18x128xbf16, #tpu.memory_space<vmem>>, vector<8x16x128xbf16>
    %77 = vector.shape_cast %76 : vector<8x16x128xbf16> to vector<128x128xbf16>
    %c4 = arith.constant 4 : index
    %c0_68 = arith.constant 0 : index
    %c0_69 = arith.constant 0 : index
    %78 = vector.load %arg5[%c4, %c0_68, %c0_69] : memref<9x128x128xbf16, #tpu.memory_space<vmem>>, vector<1x128x128xbf16>
    %79 = vector.shape_cast %78 : vector<1x128x128xbf16> to vector<128x128xbf16>
    %cst_70 = arith.constant dense<0.000000e+00> : vector<128x128xf32>
    %80 = tpu.matmul %77, %79, %cst_70 {dimension_numbers = #tpu.dot_dimension_numbers<[1], [0], [0], [1], [0, 0, 1, 1], [], []>} : vector<128x128xbf16>, vector<128x128xbf16>, vector<128x128xf32> -> vector<128x128xf32>
    %81 = arith.addf %75, %80 : vector<128x128xf32>
    %c1_71 = arith.constant 1 : index
    %c2_72 = arith.constant 2 : index
    %c0_73 = arith.constant 0 : index
    %82 = vector.load %arg10[%c1_71, %c2_72, %c0_73] : memref<10x18x128xbf16, #tpu.memory_space<vmem>>, vector<8x16x128xbf16>
    %83 = vector.shape_cast %82 : vector<8x16x128xbf16> to vector<128x128xbf16>
    %c5 = arith.constant 5 : index
    %c0_74 = arith.constant 0 : index
    %c0_75 = arith.constant 0 : index
    %84 = vector.load %arg5[%c5, %c0_74, %c0_75] : memref<9x128x128xbf16, #tpu.memory_space<vmem>>, vector<1x128x128xbf16>
    %85 = vector.shape_cast %84 : vector<1x128x128xbf16> to vector<128x128xbf16>
    %cst_76 = arith.constant dense<0.000000e+00> : vector<128x128xf32>
    %86 = tpu.matmul %83, %85, %cst_76 {dimension_numbers = #tpu.dot_dimension_numbers<[1], [0], [0], [1], [0, 0, 1, 1], [], []>} : vector<128x128xbf16>, vector<128x128xbf16>, vector<128x128xf32> -> vector<128x128xf32>
    %87 = arith.addf %81, %86 : vector<128x128xf32>
    %c2_77 = arith.constant 2 : index
    %c0_78 = arith.constant 0 : index
    %c0_79 = arith.constant 0 : index
    %88 = vector.load %arg10[%c2_77, %c0_78, %c0_79] : memref<10x18x128xbf16, #tpu.memory_space<vmem>>, vector<8x16x128xbf16>
    %89 = vector.shape_cast %88 : vector<8x16x128xbf16> to vector<128x128xbf16>
    %c6 = arith.constant 6 : index
    %c0_80 = arith.constant 0 : index
    %c0_81 = arith.constant 0 : index
    %90 = vector.load %arg5[%c6, %c0_80, %c0_81] : memref<9x128x128xbf16, #tpu.memory_space<vmem>>, vector<1x128x128xbf16>
    %91 = vector.shape_cast %90 : vector<1x128x128xbf16> to vector<128x128xbf16>
    %cst_82 = arith.constant dense<0.000000e+00> : vector<128x128xf32>
    %92 = tpu.matmul %89, %91, %cst_82 {dimension_numbers = #tpu.dot_dimension_numbers<[1], [0], [0], [1], [0, 0, 1, 1], [], []>} : vector<128x128xbf16>, vector<128x128xbf16>, vector<128x128xf32> -> vector<128x128xf32>
    %93 = arith.addf %87, %92 : vector<128x128xf32>
    %c2_83 = arith.constant 2 : index
    %c1_84 = arith.constant 1 : index
    %c0_85 = arith.constant 0 : index
    %94 = vector.load %arg10[%c2_83, %c1_84, %c0_85] : memref<10x18x128xbf16, #tpu.memory_space<vmem>>, vector<8x16x128xbf16>
    %95 = vector.shape_cast %94 : vector<8x16x128xbf16> to vector<128x128xbf16>
    %c7 = arith.constant 7 : index
    %c0_86 = arith.constant 0 : index
    %c0_87 = arith.constant 0 : index
    %96 = vector.load %arg5[%c7, %c0_86, %c0_87] : memref<9x128x128xbf16, #tpu.memory_space<vmem>>, vector<1x128x128xbf16>
    %97 = vector.shape_cast %96 : vector<1x128x128xbf16> to vector<128x128xbf16>
    %cst_88 = arith.constant dense<0.000000e+00> : vector<128x128xf32>
    %98 = tpu.matmul %95, %97, %cst_88 {dimension_numbers = #tpu.dot_dimension_numbers<[1], [0], [0], [1], [0, 0, 1, 1], [], []>} : vector<128x128xbf16>, vector<128x128xbf16>, vector<128x128xf32> -> vector<128x128xf32>
    %99 = arith.addf %93, %98 : vector<128x128xf32>
    %c2_89 = arith.constant 2 : index
    %c2_90 = arith.constant 2 : index
    %c0_91 = arith.constant 0 : index
    %100 = vector.load %arg10[%c2_89, %c2_90, %c0_91] : memref<10x18x128xbf16, #tpu.memory_space<vmem>>, vector<8x16x128xbf16>
    %101 = vector.shape_cast %100 : vector<8x16x128xbf16> to vector<128x128xbf16>
    %c8 = arith.constant 8 : index
    %c0_92 = arith.constant 0 : index
    %c0_93 = arith.constant 0 : index
    %102 = vector.load %arg5[%c8, %c0_92, %c0_93] : memref<9x128x128xbf16, #tpu.memory_space<vmem>>, vector<1x128x128xbf16>
    %103 = vector.shape_cast %102 : vector<1x128x128xbf16> to vector<128x128xbf16>
    %cst_94 = arith.constant dense<0.000000e+00> : vector<128x128xf32>
    %104 = tpu.matmul %101, %103, %cst_94 {dimension_numbers = #tpu.dot_dimension_numbers<[1], [0], [0], [1], [0, 0, 1, 1], [], []>} : vector<128x128xbf16>, vector<128x128xbf16>, vector<128x128xf32> -> vector<128x128xf32>
    %105 = arith.addf %99, %104 : vector<128x128xf32>
    %106 = vector.shape_cast %105 : vector<128x128xf32> to vector<8x16x128xf32>
    %107 = arith.truncf %106 : vector<8x16x128xf32> to vector<8x16x128xbf16>
    %c0_95 = arith.constant 0 : index
    %c0_96 = arith.constant 0 : index
    %c0_97 = arith.constant 0 : index
    %c0_98 = arith.constant 0 : index
    %108 = vector.load %arg8[%c0_95, %c0_96, %c0_97, %c0_98] : memref<1x8x16x128xbf16, #tpu.memory_space<vmem>>, vector<1x8x16x128xbf16>
    %109 = vector.shape_cast %108 : vector<1x8x16x128xbf16> to vector<8x16x128xbf16>
    %110 = vector.shape_cast %107 : vector<8x16x128xbf16> to vector<1x8x16x128xbf16>
    tpu.vector_store %arg8[%c0_95, %c0_96, %c0_97, %c0_98], %110 {strides = array<i32>} : memref<1x8x16x128xbf16, #tpu.memory_space<vmem>>, vector<1x8x16x128xbf16>,
    %cst_99 = arith.constant dense<0.000000e+00> : vector<128xf32>
    %111 = vector.multi_reduction <add>, %105, %cst_99 [0] : vector<128x128xf32> to vector<128xf32>
    %112 = vector.shape_cast %111 : vector<128xf32> to vector<1x128xf32>
    %113 = arith.mulf %105, %105 : vector<128x128xf32>
    %cst_100 = arith.constant dense<0.000000e+00> : vector<128xf32>
    %114 = vector.multi_reduction <add>, %113, %cst_100 [0] : vector<128x128xf32> to vector<128xf32>
    %115 = vector.shape_cast %114 : vector<128xf32> to vector<1x128xf32>
    %116 = tpu.concatenate %112, %115 in 0 : vector<1x128xf32>, vector<1x128xf32> -> vector<2x128xf32>
    %c0_101 = arith.constant 0 : index
    %c0_102 = arith.constant 0 : index
    %c0_103 = arith.constant 0 : index
    %c0_104 = arith.constant 0 : index
    %117 = vector.load %arg9[%c0_101, %c0_102, %c0_103, %c0_104] : memref<1x1x2x128xf32, #tpu.memory_space<vmem>>, vector<1x1x2x128xf32>
    %118 = vector.shape_cast %117 : vector<1x1x2x128xf32> to vector<2x128xf32>
    %119 = vector.shape_cast %116 : vector<2x128xf32> to vector<1x1x2x128xf32>
    tpu.vector_store %arg9[%c0_101, %c0_102, %c0_103, %c0_104], %119 {strides = array<i32>} : memref<1x1x2x128xf32, #tpu.memory_space<vmem>>, vector<1x1x2x128xf32>,
    return
  }
  func.func @transform_0(%arg0: i32, %arg1: i32) -> (i32, i32, i32, i32) {
    %c8_i32 = arith.constant 8 : i32
    %0 = arith.muli %arg1, %c8_i32 : i32
    %c1_i32 = arith.constant 1 : i32
    %1 = arith.subi %0, %c1_i32 : i32
    %c0_i32 = arith.constant 0 : i32
    %2 = arith.maxsi %1, %c0_i32 : i32
    %c0_i32_0 = arith.constant 0 : i32
    %c0_i32_1 = arith.constant 0 : i32
    %c0_i32_2 = arith.constant 0 : i32
    return %arg0, %2, %c0_i32_0, %c0_i32_1 : i32, i32, i32, i32
  }
  func.func @transform_1(%arg0: i32, %arg1: i32) -> (i32, i32, i32, i32) {
    %c0_i32 = arith.constant 0 : i32
    %c0_i32_0 = arith.constant 0 : i32
    %c0_i32_1 = arith.constant 0 : i32
    return %arg0, %arg1, %c0_i32, %c0_i32_0 : i32, i32, i32, i32
  }
  func.func @transform_2(%arg0: i32, %arg1: i32) -> (i32, i32, i32, i32) {
    %c8_i32 = arith.constant 8 : i32
    %0 = arith.muli %arg1, %c8_i32 : i32
    %c8_i32_0 = arith.constant 8 : i32
    %1 = arith.addi %0, %c8_i32_0 : i32
    %c15_i32 = arith.constant 15 : i32
    %2 = arith.minsi %1, %c15_i32 : i32
    %c0_i32 = arith.constant 0 : i32
    %c0_i32_1 = arith.constant 0 : i32
    %c0_i32_2 = arith.constant 0 : i32
    return %arg0, %2, %c0_i32, %c0_i32_1 : i32, i32, i32, i32
  }
  func.func @transform_3(%arg0: i32, %arg1: i32) -> (i32, i32, i32) {
    %c0_i32 = arith.constant 0 : i32
    %c0_i32_0 = arith.constant 0 : i32
    %c0_i32_1 = arith.constant 0 : i32
    %c0_i32_2 = arith.constant 0 : i32
    return %c0_i32, %c0_i32_0, %c0_i32_1 : i32, i32, i32
  }
  func.func @transform_4(%arg0: i32, %arg1: i32) -> (i32, i32) {
    %c0_i32 = arith.constant 0 : i32
    %c0_i32_0 = arith.constant 0 : i32
    %c0_i32_1 = arith.constant 0 : i32
    return %c0_i32, %c0_i32_0 : i32, i32
  }
  func.func @transform_5(%arg0: i32, %arg1: i32) -> (i32, i32) {
    %c0_i32 = arith.constant 0 : i32
    %c0_i32_0 = arith.constant 0 : i32
    %c0_i32_1 = arith.constant 0 : i32
    return %c0_i32, %c0_i32_0 : i32, i32
  }
  func.func @transform_6(%arg0: i32, %arg1: i32) -> (i32, i32, i32, i32) {
    %c0_i32 = arith.constant 0 : i32
    %c0_i32_0 = arith.constant 0 : i32
    %c0_i32_1 = arith.constant 0 : i32
    return %arg0, %arg1, %c0_i32, %c0_i32_0 : i32, i32, i32, i32
  }
  func.func @transform_7(%arg0: i32, %arg1: i32) -> (i32, i32, i32, i32) {
    %c0_i32 = arith.constant 0 : i32
    %c0_i32_0 = arith.constant 0 : i32
    %c0_i32_1 = arith.constant 0 : i32
    return %arg0, %arg1, %c0_i32, %c0_i32_0 : i32, i32, i32, i32
  }
}

</mosaic_0001>

<bundles_post_ra>
// kernel: vgg_encoder_block_forward.5
= control target key start
LH: loop header
LB: loop body
LE: loop exit
PB: predicated region body
PF: predicated region fallthrough
CT: control target
= control target key end

     0   :  { %s679_s12 = smov 0   ;;  %s681_s13 = smov 0   ;;  %s842_s0 = inlined_call_operand.vmem [shape: bf16[2,16,16,128], index: 0, kind: input, shape index: {}]   ;;  %s843_s1 = inlined_call_operand.vmem [shape: f32[1,128], index: 1, kind: input, shape index: {}]   ;;  %s844_s2 = inlined_call_operand.vmem [shape: f32[1,128], index: 2, kind: input, shape index: {}]   ;;  %s845_s3 = inlined_call_operand.vmem [shape: f32[2,16,16,128], index: 3, kind: output, shape index: {}]  }
   0x1   :  { %s683_s14 = smov 0  }
   0x2 LB: > { %s25_s15 = sadd.s32 1, %s653_s13  ;;  %p521_p0 = scmp.ge.s32.totalorder %s657_s14, 1  ;;  %s657_s14 = sphi %s683_s14, %s13_s14   ;;  %s653_s13 = sphi %s681_s13, %s847_s13   ;;  %s649_s12 = sphi %s679_s12, %s846_s12  }
   0x3   : > { %p27_p1 = scmp.ge.s32.totalorder %s25_s15, 2  ;;  %p159_p2 = scmp.lt.s32.totalorder %s657_s14, 3 }
   0x5   : > { %s849_s15 = smov (%p27_p1, %s25_s15), 0  ;;  %p160_p3 = pnand %p521_p0, %p159_p2 }
   0x6   : > { %p194_p4 = scmp.lt.s32.totalorder (!%p160_p3), %s649_s12, 1  ;;  %v708_v0 = vld [vmem:[%s843_s1] ss:$0 sm:$0xff] (!%p160_p3) }
   0x7   : > { %163 = sbr.rel (%p160_p3) target bundleno = 54 (0x36), region = 32  ;;  %v717_v9 = vld [vmem:[%s844_s2] ss:$0 sm:$0xff] (!%p160_p3) }
   0xe   : > { %s851_s12 = smov (!%p194_p4, %s649_s12), 1 }
   0xf   : > { %s530_s16 = sshll.u32 %s851_s12, 7  ;;  %s531_s24 = sshll.u32 %s851_s12, 8 }
  0x10   : > { %s703_s19 = scalar_lea.vmem %s842_s0, %s530_s16  ;;  %s735_s27 = scalar_lea.vmem %s845_s3, %s531_s24 }
  0x11   : > { %v533_v1 = vld [vmem:[%s703_s19] sm:$0xff]   ;;  %v596_v2 = vld [vmem:[%s703_s19 + $0x8] sm:$0xff]   ;;  %v597_v3 = vld [vmem:[%s703_s19 + $0x10] sm:$0xff]  }
  0x12   : > { %v534_v4 = vunpack.c.l.bf16 %v533_v1  ;;  %v535_v5 = vunpack.c.h.bf16 %v533_v1  ;;  %v538_v6 = vunpack.c.l.bf16 %v596_v2  ;;  %v539_v7 = vunpack.c.h.bf16 %v596_v2  ;;  %v598_v8 = vld [vmem:[%s703_s19 + $0x18] sm:$0xff]   ;;  %v599_v30 = vld [vmem:[%s703_s19 + $0x20] sm:$0xff]   ;;  %v600_v31 = vld [vmem:[%s703_s19 + $0x28] sm:$0xff]  }
  0x13   : > { %v542_v10 = vunpack.c.l.bf16 %v597_v3  ;;  %v543_v11 = vunpack.c.h.bf16 %v597_v3  ;;  %v546_v12 = vunpack.c.l.bf16 %v598_v8  ;;  %v547_v13 = vunpack.c.h.bf16 %v598_v8  ;;  %v601_v36 = vld [vmem:[%s703_s19 + $0x30] sm:$0xff]   ;;  %v602_v37 = vld [vmem:[%s703_s19 + $0x38] sm:$0xff]   ;;  %v603_v3 = vld [vmem:[%s703_s19 + $0x40] sm:$0xff]  }
  0x14   : > { %v287_v14 = vmul.f32 %v534_v4, %v708_v0  ;;  %v288_v15 = vmul.f32 %v535_v5, %v708_v0  ;;  %v289_v16 = vmul.f32 %v538_v6, %v708_v0  ;;  %v290_v17 = vmul.f32 %v539_v7, %v708_v0  ;;  %v604_v4 = vld [vmem:[%s703_s19 + $0x48] sm:$0xff]  }
  0x15   : > { %v291_v18 = vmul.f32 %v542_v10, %v708_v0  ;;  %v292_v19 = vmul.f32 %v543_v11, %v708_v0  ;;  %v293_v20 = vmul.f32 %v546_v12, %v708_v0  ;;  %v294_v21 = vmul.f32 %v547_v13, %v708_v0  ;;  %v605_v10 = vld [vmem:[%s703_s19 + $0x50] sm:$0xff]   ;;  %v606_v11 = vld [vmem:[%s703_s19 + $0x58] sm:$0xff]  }
  0x16   : > { %v325_v22 = vadd.f32 %v717_v9, %v287_v14  ;;  %v326_v23 = vadd.f32 %v717_v9, %v288_v15  ;;  %v327_v24 = vadd.f32 %v717_v9, %v289_v16  ;;  %v328_v25 = vadd.f32 %v717_v9, %v290_v17 }
  0x17   : > { %v329_v26 = vadd.f32 %v717_v9, %v291_v18  ;;  %v330_v27 = vadd.f32 %v717_v9, %v292_v19  ;;  %v331_v28 = vadd.f32 %v717_v9, %v293_v20  ;;  %v332_v29 = vadd.f32 %v717_v9, %v294_v21 }
  0x18   : > { %v357_v32 = vmax.f32 %v325_v22, 0.0  ;;  %v358_v33 = vmax.f32 %v326_v23, 0.0  ;;  %v359_v34 = vmax.f32 %v327_v24, 0.0  ;;  %v360_v35 = vmax.f32 %v328_v25, 0.0 }
  0x19   : > { %v361_v38 = vmax.f32 %v329_v26, 0.0  ;;  %v362_v39 = vmax.f32 %v330_v27, 0.0  ;;  %v363_v40 = vmax.f32 %v331_v28, 0.0  ;;  %v364_v41 = vmax.f32 %v332_v29, 0.0 }
  0x1a   : > { %389 = vst [vmem:[%s735_s27] sm:$0xff] %v357_v32  ;;  %390 = vst [vmem:[%s735_s27 + $0x8] sm:$0xff] %v358_v33  ;;  %v550_v42 = vunpack.c.l.bf16 %v599_v30  ;;  %v551_v43 = vunpack.c.h.bf16 %v599_v30  ;;  %v554_v44 = vunpack.c.l.bf16 %v600_v31  ;;  %v555_v45 = vunpack.c.h.bf16 %v600_v31 }
  0x1b   : > { %391 = vst [vmem:[%s735_s27 + $0x10] sm:$0xff] %v359_v34  ;;  %392 = vst [vmem:[%s735_s27 + $0x18] sm:$0xff] %v360_v35  ;;  %v558_v46 = vunpack.c.l.bf16 %v601_v36  ;;  %v559_v47 = vunpack.c.h.bf16 %v601_v36  ;;  %v562_v48 = vunpack.c.l.bf16 %v602_v37  ;;  %v563_v49 = vunpack.c.h.bf16 %v602_v37 }
  0x1c   : > { %393 = vst [vmem:[%s735_s27 + $0x20] sm:$0xff] %v361_v38  ;;  %394 = vst [vmem:[%s735_s27 + $0x28] sm:$0xff] %v362_v39  ;;  %v295_v50 = vmul.f32 %v550_v42, %v708_v0  ;;  %v296_v51 = vmul.f32 %v551_v43, %v708_v0  ;;  %v297_v52 = vmul.f32 %v554_v44, %v708_v0  ;;  %v566_v16 = vunpack.c.l.bf16 %v603_v3 }
  0x1d   : > { %395 = vst [vmem:[%s735_s27 + $0x30] sm:$0xff] %v363_v40  ;;  %396 = vst [vmem:[%s735_s27 + $0x38] sm:$0xff] %v364_v41  ;;  %v298_v53 = vmul.f32 %v555_v45, %v708_v0  ;;  %v299_v54 = vmul.f32 %v558_v46, %v708_v0  ;;  %v300_v55 = vmul.f32 %v559_v47, %v708_v0  ;;  %v567_v17 = vunpack.c.h.bf16 %v603_v3  ;;  %v607_v40 = vld [vmem:[%s703_s19 + $0x60] sm:$0xff]   ;;  %v608_v41 = vld [vmem:[%s703_s19 + $0x68] sm:$0xff]  }
  0x1e   : > { %v301_v56 = vmul.f32 %v562_v48, %v708_v0  ;;  %v302_v57 = vmul.f32 %v563_v49, %v708_v0  ;;  %v333_v58 = vadd.f32 %v717_v9, %v295_v50  ;;  %v334_v59 = vadd.f32 %v717_v9, %v296_v51  ;;  %v609_v46 = vld [vmem:[%s703_s19 + $0x70] sm:$0xff]   ;;  %v610_v47 = vld [vmem:[%s703_s19 + $0x78] sm:$0xff]  }
  0x1f   : > { %v335_v60 = vadd.f32 %v717_v9, %v297_v52  ;;  %v336_v61 = vadd.f32 %v717_v9, %v298_v53  ;;  %v337_v62 = vadd.f32 %v717_v9, %v299_v54  ;;  %v338_v63 = vadd.f32 %v717_v9, %v300_v55 }
  0x20   : > { %v339_v1 = vadd.f32 %v717_v9, %v301_v56  ;;  %v340_v2 = vadd.f32 %v717_v9, %v302_v57  ;;  %v365_v5 = vmax.f32 %v333_v58, 0.0  ;;  %v366_v6 = vmax.f32 %v334_v59, 0.0 }
  0x21   : > { %v367_v7 = vmax.f32 %v335_v60, 0.0  ;;  %v368_v8 = vmax.f32 %v336_v61, 0.0  ;;  %v369_v12 = vmax.f32 %v337_v62, 0.0  ;;  %v370_v13 = vmax.f32 %v338_v63, 0.0 }
  0x22   : > { %v371_v14 = vmax.f32 %v339_v1, 0.0  ;;  %v372_v15 = vmax.f32 %v340_v2, 0.0  ;;  %397 = vst [vmem:[%s735_s27 + $0x40] sm:$0xff] %v365_v5  ;;  %398 = vst [vmem:[%s735_s27 + $0x48] sm:$0xff] %v366_v6  ;;  %v570_v18 = vunpack.c.l.bf16 %v604_v4  ;;  %v571_v19 = vunpack.c.h.bf16 %v604_v4 }
  0x23   : > { %399 = vst [vmem:[%s735_s27 + $0x50] sm:$0xff] %v367_v7  ;;  %400 = vst [vmem:[%s735_s27 + $0x58] sm:$0xff] %v368_v8  ;;  %v574_v20 = vunpack.c.l.bf16 %v605_v10  ;;  %v575_v21 = vunpack.c.h.bf16 %v605_v10  ;;  %v578_v22 = vunpack.c.l.bf16 %v606_v11  ;;  %v579_v23 = vunpack.c.h.bf16 %v606_v11 }
  0x24   : > { %401 = vst [vmem:[%s735_s27 + $0x60] sm:$0xff] %v369_v12  ;;  %402 = vst [vmem:[%s735_s27 + $0x68] sm:$0xff] %v370_v13  ;;  %v303_v24 = vmul.f32 %v566_v16, %v708_v0  ;;  %v304_v25 = vmul.f32 %v567_v17, %v708_v0  ;;  %v305_v26 = vmul.f32 %v570_v18, %v708_v0  ;;  %v582_v52 = vunpack.c.l.bf16 %v607_v40 }
  0x25   : > { %403 = vst [vmem:[%s735_s27 + $0x70] sm:$0xff] %v371_v14  ;;  %404 = vst [vmem:[%s735_s27 + $0x78] sm:$0xff] %v372_v15  ;;  %v306_v27 = vmul.f32 %v571_v19, %v708_v0  ;;  %v307_v28 = vmul.f32 %v574_v20, %v708_v0  ;;  %v308_v29 = vmul.f32 %v575_v21, %v708_v0  ;;  %v583_v53 = vunpack.c.h.bf16 %v607_v40 }
  0x26   : > { %v309_v30 = vmul.f32 %v578_v22, %v708_v0  ;;  %v310_v31 = vmul.f32 %v579_v23, %v708_v0  ;;  %v341_v32 = vadd.f32 %v717_v9, %v303_v24  ;;  %v342_v33 = vadd.f32 %v717_v9, %v304_v25 }
  0x27   : > { %v343_v34 = vadd.f32 %v717_v9, %v305_v26  ;;  %v344_v35 = vadd.f32 %v717_v9, %v306_v27  ;;  %v345_v36 = vadd.f32 %v717_v9, %v307_v28  ;;  %v346_v37 = vadd.f32 %v717_v9, %v308_v29 }
  0x28   : > { %v347_v38 = vadd.f32 %v717_v9, %v309_v30  ;;  %v348_v39 = vadd.f32 %v717_v9, %v310_v31  ;;  %v373_v42 = vmax.f32 %v341_v32, 0.0  ;;  %v374_v43 = vmax.f32 %v342_v33, 0.0 }
  0x29   : > { %v375_v44 = vmax.f32 %v343_v34, 0.0  ;;  %v376_v45 = vmax.f32 %v344_v35, 0.0  ;;  %v377_v48 = vmax.f32 %v345_v36, 0.0  ;;  %v378_v49 = vmax.f32 %v346_v37, 0.0 }
  0x2a   : > { %v379_v50 = vmax.f32 %v347_v38, 0.0  ;;  %v380_v51 = vmax.f32 %v348_v39, 0.0  ;;  %405 = vst [vmem:[%s735_s27 + $0x80] sm:$0xff] %v373_v42  ;;  %406 = vst [vmem:[%s735_s27 + $0x88] sm:$0xff] %v374_v43  ;;  %v586_v54 = vunpack.c.l.bf16 %v608_v41  ;;  %v587_v55 = vunpack.c.h.bf16 %v608_v41 }
  0x2b   : > { %407 = vst [vmem:[%s735_s27 + $0x90] sm:$0xff] %v375_v44  ;;  %408 = vst [vmem:[%s735_s27 + $0x98] sm:$0xff] %v376_v45  ;;  %v590_v56 = vunpack.c.l.bf16 %v609_v46  ;;  %v591_v57 = vunpack.c.h.bf16 %v609_v46  ;;  %v594_v58 = vunpack.c.l.bf16 %v610_v47  ;;  %v595_v59 = vunpack.c.h.bf16 %v610_v47 }
  0x2c   : > { %409 = vst [vmem:[%s735_s27 + $0xa0] sm:$0xff] %v377_v48  ;;  %410 = vst [vmem:[%s735_s27 + $0xa8] sm:$0xff] %v378_v49  ;;  %v311_v60 = vmul.f32 %v582_v52, %v708_v0  ;;  %v312_v61 = vmul.f32 %v583_v53, %v708_v0  ;;  %v313_v62 = vmul.f32 %v586_v54, %v708_v0 }
  0x2d   : > { %411 = vst [vmem:[%s735_s27 + $0xb0] sm:$0xff] %v379_v50  ;;  %412 = vst [vmem:[%s735_s27 + $0xb8] sm:$0xff] %v380_v51  ;;  %v314_v63 = vmul.f32 %v587_v55, %v708_v0  ;;  %v315_v1 = vmul.f32 %v590_v56, %v708_v0  ;;  %v316_v2 = vmul.f32 %v591_v57, %v708_v0 }
  0x2e   : > { %v317_v3 = vmul.f32 %v594_v58, %v708_v0  ;;  %v318_v4 = vmul.f32 %v595_v59, %v708_v0  ;;  %v349_v5 = vadd.f32 %v717_v9, %v311_v60  ;;  %v350_v6 = vadd.f32 %v717_v9, %v312_v61 }
  0x2f   : > { %v351_v7 = vadd.f32 %v717_v9, %v313_v62  ;;  %v352_v8 = vadd.f32 %v717_v9, %v314_v63  ;;  %v353_v10 = vadd.f32 %v717_v9, %v315_v1  ;;  %v354_v11 = vadd.f32 %v717_v9, %v316_v2 }
  0x30   : > { %v355_v0 = vadd.f32 %v717_v9, %v317_v3  ;;  %v356_v12 = vadd.f32 %v717_v9, %v318_v4  ;;  %v381_v13 = vmax.f32 %v349_v5, 0.0  ;;  %v382_v14 = vmax.f32 %v350_v6, 0.0 }
  0x31   : > { %v383_v15 = vmax.f32 %v351_v7, 0.0  ;;  %v384_v16 = vmax.f32 %v352_v8, 0.0  ;;  %v385_v17 = vmax.f32 %v353_v10, 0.0  ;;  %v386_v18 = vmax.f32 %v354_v11, 0.0 }
  0x32   : > { %v387_v19 = vmax.f32 %v355_v0, 0.0  ;;  %v388_v20 = vmax.f32 %v356_v12, 0.0  ;;  %413 = vst [vmem:[%s735_s27 + $0xc0] sm:$0xff] %v381_v13  ;;  %414 = vst [vmem:[%s735_s27 + $0xc8] sm:$0xff] %v382_v14 }
  0x33   : > { %415 = vst [vmem:[%s735_s27 + $0xd0] sm:$0xff] %v383_v15  ;;  %416 = vst [vmem:[%s735_s27 + $0xd8] sm:$0xff] %v384_v16 }
  0x34   : > { %417 = vst [vmem:[%s735_s27 + $0xe0] sm:$0xff] %v385_v17  ;;  %418 = vst [vmem:[%s735_s27 + $0xe8] sm:$0xff] %v386_v18 }
  0x35   : > { %419 = vst [vmem:[%s735_s27 + $0xf0] sm:$0xff] %v387_v19  ;;  %420 = vst [vmem:[%s735_s27 + $0xf8] sm:$0xff] %v388_v20 }
  0x36 PF: > { %s13_s14 = sadd.s32 1, %s657_s14   ;;  %s846_s12 = smov %s653_s13 }
  0x37   : > { %p10_p5 = scmp.ge.s32.totalorder %s13_s14, 4   ;;  %s847_s13 = smov %s849_s15 }
  0x39   :  { %12 = sbr.rel (!%p10_p5) target bundleno = 2 (0x2), region = 62 }

// kernel: vgg_encoder_block_forward.3
= control target key start
LH: loop header
LB: loop body
LE: loop exit
PB: predicated region body
PF: predicated region fallthrough
CT: control target
= control target key end

     0   :  { %s5242_s24 = smov 0   ;;  %s5244_s25 = smov 0   ;;  %s6423_s0 = inlined_call_operand.vmem [shape: bf16[2,16,16,128], index: 0, kind: input, shape index: {}, may-alias: {0,1,2}]   ;;  %s6424_s1 = inlined_call_operand.vmem [shape: bf16[2,16,16,128], index: 1, kind: input, shape index: {}, may-alias: {0,1,2}]   ;;  %s6425_s2 = inlined_call_operand.vmem [shape: bf16[2,16,16,128], index: 2, kind: input, shape index: {}, may-alias: {0,1,2}]   ;;  %s6426_s3 = inlined_call_operand.vmem [shape: bf16[9,128,128], index: 3, kind: input, shape index: {}]   ;;  %s6427_s4 = inlined_call_operand.vmem [shape: f32[1,128], index: 4, kind: input, shape index: {}]   ;;  %s6428_s5 = inlined_call_operand.vmem [shape: f32[1,128], index: 5, kind: input, shape index: {}]   ;;  %s6429_s6 = inlined_call_operand.vmem [shape: bf16[2,16,16,128], index: 6, kind: output, shape index: {0}]   ;;  %s6430_s7 = inlined_call_operand.vmem [shape: f32[2,2,2,128], index: 7, kind: output, shape index: {1}]  }
   0x1   :  { %s5246_s26 = smov 0   ;;  %s5248_s27 = smov 0  }
   0x2   :  { %s5250_s28 = smov 0  }
   0x3 LB: > { %s27_s4 = sadd.s32 1, %s5192_s26  ;;  %s30_s5 = sadd.s32 1, %s5196_s27  ;;  %s5200_s28 = sphi %s5250_s28, %s18_s28   ;;  %s5196_s27 = sphi %s5248_s27, %s6469_s27   ;;  %s5192_s26 = sphi %s5246_s26, %s6468_s26   ;;  %s5188_s25 = sphi %s5244_s25, %s6467_s25   ;;  %s5184_s24 = sphi %s5242_s24, %s6466_s24  }
   0x4   : > { %p28_p0 = scmp.ge.s32.totalorder %s27_s4, 2  ;;  %p4029_p1 = scmp.ge.s32.totalorder %s5200_s28, 1 }
   0x5   : > { %p328_p2 = scmp.lt.s32.totalorder %s5200_s28, 5 }
   0x6   : > { %s6471_s4 = smov (%p28_p0, %s27_s4), 0  ;;  %s6473_s5 = smov (!%p28_p0, %s30_s5), %s5196_s27 }
   0x7   : > { %p329_p3 = pnand %p4029_p1, %p328_p2  ;;  %p32_p4 = scmp.ge.s32.totalorder %s6473_s5, 2 }
   0x9   : > { %s6475_s5 = smov (%p32_p4, %s6473_s5), 0  ;;  %332 = sbr.rel (%p329_p3) target bundleno = 513 (0x201), region = 44 }
  0x10   : > { %v5052_v0 = vld [vmem:[%s6426_s3 + $0x100] sm:$0xff]   ;;  %s5278_s8 = sshll.u32 %s5184_s24, 3  ;;  %v5053_v1 = vld [vmem:[%s6426_s3 + $0x108] sm:$0xff]   ;;  %p408_p5 = scmp.lt.s32.totalorder %s5188_s25, 1  ;;  %v5055_v3 = vld [vmem:[%s6426_s3 + $0x110] sm:$0xff]   ;;  %vm501_vm0 = vcmask 1040384  }
  0x11   : > { %4708 = vmatprep.subr.bf16.mxu0 %v5052_v0  ;;  %v5054_v2 = vld [vmem:[%s6426_s3 + $0x40] sm:$0xff]   ;;  %p424_p6 = scmp.lt.s32.totalorder %s5278_s8, 15  ;;  %v5056_v4 = vld [vmem:[%s6426_s3 + $0x48] sm:$0xff]   ;;  %v5058_v5 = vld [vmem:[%s6426_s3 + $0x50] sm:$0xff]   ;;  %s5313_s11 = sadd.s32 4294967295, %s5278_s8  ;;  %v6438_v13 = vmov 0 }
  0x12   : > { %4709 = vmatpush3.bf16.msra.mxu0 %v5052_v0  ;;  %s6477_s25 = smov (!%p408_p5, %s5188_s25), 1  ;;  %4580 = vmatprep.subr.bf16.mxu1 %v5054_v2  ;;  %v5057_v6 = vld [vmem:[%s6426_s3 + $0x118] sm:$0xff]   ;;  %p406_p7 = scmp.gt.s32.totalorder %s5313_s11, 0  ;;  %v5059_v8 = vld [vmem:[%s6426_s3 + $0x120] sm:$0xff]   ;;  %v5061_v9 = vld [vmem:[%s6426_s3 + $0x128] sm:$0xff]   ;;  %v6441_v17 = vmov 0 }
  0x13   : > { %4710 = vmatprep.subr.bf16.mxu0 %v5053_v1  ;;  %s425_s17 = scalar_select %p424_p6, %s5278_s8, 15  ;;  %4581 = vmatpush3.bf16.msra.mxu1 %v5054_v2  ;;  %v5060_v7 = vld [vmem:[%s6426_s3 + $0x58] sm:$0xff]   ;;  %v5062_v10 = vld [vmem:[%s6426_s3 + $0x60] sm:$0xff]   ;;  %vm502_vm1 = vsmask.f32 256  ;;  %v5064_v19 = vld [vmem:[%s6426_s3 + $0x68] sm:$0xff]  }
  0x14   : > { %s5297_s18 = sshll.u32 %s6477_s25, 5  ;;  %4582 = vmatprep.subr.bf16.mxu1 %v5056_v4  ;;  %p4032_p8 = scmp.lt.s32.totalorder %s5313_s11, 15  ;;  %vm5338_vm2 = vmand %vm501_vm0, %vm502_vm1  ;;  %v507_v14 = vld [vmem:[#allocation2 + $0xc] sm:$0x1]  ;;  %vm534_vm3 = vsmask.f32 7938 }
  0x15   : > { %s4041_s21 = sshll.u32 %s425_s17, 1  ;;  %v6439_v13 = vsel %vm5338_vm2, 4294967295, %v6438_v13  ;;  %v539_v15 = vld [vmem:[#allocation2 + $0x14] sm:$0x1]  ;;  %v508_v16 = vsel %vm5338_vm2, 0, %v507_v14  ;;  %vm5346_vm4 = vmand %vm501_vm0, %vm534_vm3  ;;  %vm588_vm6 = vcmask 1043456  }
  0x16   : > { %4711 = vmatpush3.bf16.msra.mxu0 %v5053_v1  ;;  %s5303_s22 = sadd.s32 %s4041_s21, %s5297_s18  ;;  %6440 = vst [vmem:[#allocation3_spill] sm:$0xff] %v6439_v13  ;;  %v6442_v17 = vsel %vm5346_vm4, 4294967295, %v6441_v17  ;;  %vm566_vm5 = vsmask.f32 4368  ;;  %509 = vst [vmem:[#allocation2 + $0xc] sm:$0x1] %v508_v16 }
  0x17   : > { %4712 = vmatprep.subr.bf16.mxu0 %v5055_v3  ;;  %4583 = vmatpush3.bf16.msra.mxu1 %v5056_v4  ;;  %s4043_s30 = sshll.u32 %s5303_s22, 2  ;;  %6443 = vst [vmem:[#allocation4_spill] sm:$0xff] %v6442_v17  ;;  %v540_v20 = vsel %vm5346_vm4, 0, %v539_v15  ;;  %v5063_v24 = vld [vmem:[%s6426_s3 + $0x130] sm:$0xff]   ;;  %vm5365_vm7 = vmor %vm502_vm1, %vm566_vm5  ;;  %v6444_v28 = vmov 0  ;;  %v5065_v31 = vld [vmem:[%s6426_s3 + $0x138] sm:$0xff]  }
  0x18   : > { %4584 = vmatprep.subr.bf16.mxu1 %v5058_v5  ;;  %s5324_s16 = scalar_lea.vmem %s6424_s1, %s4043_s30  ;;  %541 = vst [vmem:[#allocation2 + $0x14] sm:$0x1] %v540_v20  ;;  %v5066_v26 = vld [vmem:[%s6426_s3 + $0x70] sm:$0xff]   ;;  %v6445_v28 = vsel %vm5365_vm7, 4294967295, %v6444_v28  ;;  %v510_v35 = vld [vmem:[#allocation2 + $0x18] sm:$0x1]  ;;  %vm5378_vm8 = vmand %vm588_vm6, %vm534_vm3  ;;  %s6375_s17 = scalar_lea.vmem %s6429_s6, %s4043_s30 }
  0x19   : > { %s407_s23 = scalar_select %p406_p7, %s5313_s11, 0  ;;  %v469_v11 = vld [vmem:[%s5324_s16] sm:$0xf]  ;;  %v470_v12 = vld [vmem:[%s5324_s16 + $0x4] sm:$0xf]  ;;  %6446 = vst [vmem:[#allocation5_spill] sm:$0xff] %v6445_v28 }
  0x1a   : > { %4713 = vmatpush3.bf16.msra.mxu0 %v5055_v3  ;;  %v598_v18 = vshrl.u32 %v469_v11, 16  ;;  %v601_v21 = vshll.u32 %v469_v11, 16  ;;  %v606_v22 = vshrl.u32 %v470_v12, 16  ;;  %v609_v23 = vshll.u32 %v470_v12, 16  ;;  %v471_v30 = vld [vmem:[%s5324_s16 + $0x8] sm:$0xf] }
  0x1b   : > { %4714 = vmatprep.subr.bf16.mxu0 %v5057_v6  ;;  %4585 = vmatpush3.bf16.msra.mxu1 %v5058_v5  ;;  %s6479_s23 = smov (!%p4032_p8, %s407_s23), 15  ;;  %v472_v34 = vld [vmem:[%s5324_s16 + $0xc] sm:$0xf]  ;;  %v615_v36 = vshrl.u32 %v471_v30, 16  ;;  %p489_p9 = scmp.eq.s32.totalorder %s5184_s24, 0  ;;  %v6447_v37 = vmov 0 }
  0x1c   : > { %4586 = vmatprep.subr.bf16.mxu1 %v5060_v7  ;;  %v600_v25 = vrot.slane %v598_v18, 7  ;;  %v608_v27 = vrot.slane %v606_v22, 7  ;;  %s4037_s15 = sshll.u32 %s6479_s23, 1  ;;  %v6448_v37 = vsel %vm5378_vm8, 4294967295, %v6447_v37  ;;  %v511_v39 = vsel %vm5338_vm2, 0, %v510_v35  ;;  %v5398_v54 = vld [vmem:[%s6426_s3 + $0x140] sm:$0xff]  }
  0x1d   : > { %s414_s19 = sadd.s32 %s5297_s18, %s4037_s15  ;;  %6449 = vst [vmem:[#allocation6_spill] sm:$0xff] %v6448_v37  ;;  %v542_v40 = vld [vmem:[#allocation2 + $0x20] sm:$0x1]  ;;  %v623_v41 = vshrl.u32 %v472_v34, 16  ;;  %v626_v42 = vshll.u32 %v472_v34, 16  ;;  %v617_v45 = vrot.slane %v615_v36, 7 }
  0x1e   : > { %4715 = vmatpush3.bf16.msra.mxu0 %v5057_v6  ;;  %v604_v29 = vrot.slane %v600_v25, 4  ;;  %v603_v32 = vor.u32 %v601_v21, %v600_v25  ;;  %v611_v33 = vor.u32 %v609_v23, %v608_v27  ;;  %v613_v38 = vrot.slane %v608_v27, 4  ;;  %512 = vst [vmem:[#allocation2 + $0x18] sm:$0x1] %v511_v39  ;;  %s4039_s20 = sshll.u32 %s414_s19, 2  ;;  %v5068_v55 = vld [vmem:[%s6426_s3 + $0x78] sm:$0xff]  }
  0x1f   : > { %4716 = vmatprep.subr.bf16.mxu0 %v5059_v8  ;;  %4587 = vmatpush3.bf16.msra.mxu1 %v5060_v7  ;;  %v543_v44 = vsel %vm5346_vm4, 0, %v542_v40  ;;  %v618_v46 = vshll.u32 %v471_v30, 16  ;;  %v504_v47 = vld [vmem:[#allocation2] sm:$0x1]  ;;  %v758_v48 = vld [vmem:[#allocation2 + $0xc] sm:$0xf]  ;;  %s416_s29 = scalar_lea.vmem %s6423_s0, %s4039_s20 }
  0x20   : > { %4588 = vmatprep.subr.bf16.mxu1 %v5062_v10  ;;  %v612_v43 = vsel %vm5365_vm7, %v604_v29, %v611_v33  ;;  %544 = vst [vmem:[#allocation2 + $0x20] sm:$0x1] %v543_v44  ;;  %v625_v49 = vrot.slane %v623_v41, 7  ;;  %v505_v50 = vsel %vm5338_vm2, 0, %v504_v47  ;;  %v536_v51 = vld [vmem:[#allocation2 + $0x8] sm:$0x1]  ;;  %v759_v52 = vsel %vm5378_vm8, %v603_v32, %v758_v48 }
  0x21   : > { %761 = vst [vmem:[#allocation2 + $0x10] sm:$0xf] %v612_v43  ;;  %v762_v53 = vld [vmem:[#allocation2 + $0x14] sm:$0x1]  ;;  %v621_v56 = vrot.slane %v617_v45, 4  ;;  %v537_v57 = vsel %vm5346_vm4, 0, %v536_v51  ;;  %v620_v62 = vor.u32 %v618_v46, %v617_v45 }
  0x22   : > { %4717 = vmatpush3.bf16.msra.mxu0 %v5059_v8  ;;  %506 = vst [vmem:[#allocation2] sm:$0x1] %v505_v50  ;;  %760 = vst [vmem:[#allocation2 + $0xc] sm:$0xf] %v759_v52  ;;  %v763_v58 = vsel %vm5338_vm2, %v613_v38, %v762_v53  ;;  %v628_v59 = vor.u32 %v626_v42, %v625_v49  ;;  %v485_v60 = vld [vmem:[%s416_s29] sm:$0xf] }
  0x23   : > { %4718 = vmatprep.subr.bf16.mxu0 %v5061_v9  ;;  %4589 = vmatpush3.bf16.msra.mxu1 %v5062_v10  ;;  %v486_v61 = vld [vmem:[%s416_s29 + $0x4] sm:$0xf]  ;;  %s490_s14 = scalar_select %p489_p9, 1, 0  ;;  %538 = vst [vmem:[#allocation2 + $0x8] sm:$0x1] %v537_v57 }
  0x24   : > { %4590 = vmatprep.subr.bf16.mxu1 %v5064_v19  ;;  %764 = vst [vmem:[#allocation2 + $0x14] sm:$0x1] %v763_v58  ;;  %vm882_vm9 = vsmask.f32 3328  ;;  %v629_v63 = vsel %vm5365_vm7, %v621_v56, %v628_v59  ;;  %v630_v0 = vrot.slane %v625_v49, 4  ;;  %v5414_v2 = vld [vmem:[%s6426_s3] sm:$0xff]  }
  0x25   : > { %v491_v1 = vstv %s490_s14  ;;  %768 = vst [vmem:[#allocation2 + $0x1c] sm:$0xf] %v629_v63  ;;  %v513_v3 = vld [vmem:[#allocation2 + $0x24] sm:$0x1]  ;;  %v545_v4 = vld [vmem:[#allocation2 + $0x2c] sm:$0x1] }
  0x26   : > { %4719 = vmatpush3.bf16.msra.mxu0 %v5061_v9  ;;  %vm492_vm10 = vcmp.eq.s32.totalorder %v491_v1, 1  ;;  %v765_v5 = vld [vmem:[#allocation2 + $0x18] sm:$0xf]  ;;  %v514_v8 = vsel %vm5338_vm2, 0, %v513_v3  ;;  %v546_v9 = vsel %vm5346_vm4, 0, %v545_v4  ;;  %vm1488_vm13 = vcmask 1042432  }
  0x27   : > { %4720 = vmatprep.subr.bf16.mxu0 %v5063_v24  ;;  %4591 = vmatpush3.bf16.msra.mxu1 %v5064_v19  ;;  %v493_v6 = vsel %vm492_vm10, 0, %v485_v60  ;;  %v494_v7 = vsel %vm492_vm10, 0, %v486_v61  ;;  %v766_v11 = vsel %vm5378_vm8, %v620_v62, %v765_v5  ;;  %v769_v12 = vld [vmem:[#allocation2 + $0x20] sm:$0x1]  ;;  %515 = vst [vmem:[#allocation2 + $0x24] sm:$0x1] %v514_v8 }
  0x28   : > { %4592 = vmatprep.subr.bf16.mxu1 %v5066_v26  ;;  %v2000_v10 = vld [vmem:[#allocation2 + $0x10] sm:$0xf]  ;;  %v569_v14 = vshrl.u32 %v493_v6, 16  ;;  %v572_v15 = vshll.u32 %v493_v6, 16  ;;  %547 = vst [vmem:[#allocation2 + $0x2c] sm:$0x1] %v546_v9  ;;  %v770_v19 = vsel %vm5338_vm2, %v630_v0, %v769_v12 }
  0x29   : > { %v2033_v16 = vshll.u32 %v2000_v10, 16  ;;  %v2037_v18 = vshrl.u32 %v2000_v10, 16  ;;  %767 = vst [vmem:[#allocation2 + $0x18] sm:$0xf] %v766_v11  ;;  %v577_v20 = vshrl.u32 %v494_v7, 16  ;;  %vm1489_vm14 = vcmask 1046532  }
  0x2a   : > { %4721 = vmatpush3.bf16.msra.mxu0 %v5063_v24  ;;  %v5426_v21 = vld [vmem:[%s5324_s16 + $0x10] sm:$0xf]  ;;  %vm883_vm11 = vsmask.f32 7440  ;;  %v1999_v22 = vld [vmem:[#allocation2 + $0xc] sm:$0xf]  ;;  %vm5734_vm15 = vmor %vm1488_vm13, %vm1489_vm14 }
  0x2b   : > { %4722 = vmatprep.subr.bf16.mxu0 %v5065_v31  ;;  %4593 = vmatpush3.bf16.msra.mxu1 %v5066_v26  ;;  %771 = vst [vmem:[#allocation2 + $0x20] sm:$0x1] %v770_v19  ;;  %v571_v23 = vrot.slane %v569_v14, 7  ;;  %v580_v24 = vshll.u32 %v494_v7, 16  ;;  %v2001_v25 = vld [vmem:[#allocation2 + $0x14] sm:$0x1]  ;;  %vm5434_vm12 = vmor %vm882_vm9, %vm883_vm11 }
  0x2c   : > { %4594 = vmatprep.subr.bf16.mxu1 %v5068_v55  ;;  %v2024_v26 = vshrl.u32 %v1999_v22, 16  ;;  %v2027_v27 = vshll.u32 %v1999_v22, 16  ;;  %v2035_v29 = vrot.slane %v2033_v16, 5  ;;  %v2039_v30 = vrot.slane %v2037_v18, 4  ;;  %v590_v33 = vld [vmem:[#allocation2] sm:$0xf] }
  0x2d   : > { %v574_v32 = vor.u32 %v572_v15, %v571_v23  ;;  %v632_v34 = vshrl.u32 %v5426_v21, 16  ;;  %v5430_v39 = vld [vmem:[#allocation2 + $0x1c] sm:$0xf]  ;;  %v579_v40 = vrot.slane %v577_v20, 7  ;;  %v575_v45 = vrot.slane %v571_v23, 4  ;;  %s433_s10 = sadd.s32 8, %s5278_s8 }
  0x2e   : > { %4723 = vmatpush3.bf16.msra.mxu0 %v5065_v31  ;;  %v2043_v31 = vshll.u32 %v2001_v25, 16  ;;  %v2026_v35 = vrot.slane %v2024_v26, 4  ;;  %v2029_v36 = vrot.slane %v2027_v27, 5  ;;  %v2040_v38 = vor.u32 %v2039_v30, %v2035_v29  ;;  %v594_v50 = vld [vmem:[#allocation2 + $0x8] sm:$0x1]  ;;  %p5920_p10 = scmp.lt.s32.totalorder %s433_s10, 15 }
  0x2f   : > { %4740 = vmatprep.subr.bf16.mxu0 %v5398_v54  ;;  %4595 = vmatpush3.bf16.msra.mxu1 %v5068_v55  ;;  %v2057_v43 = vshll.u32 %v5430_v39, 16  ;;  %v2061_v44 = vshrl.u32 %v5430_v39, 16  ;;  %v582_v48 = vor.u32 %v580_v24, %v579_v40  ;;  %v584_v49 = vrot.slane %v579_v40, 4  ;;  %v844_v51 = vld [vmem:[#allocation2 + $0xc] sm:$0xf]  ;;  %p495_p11 = scmp.eq.s32.totalorder %s5184_s24, 1 }
  0x30   : > { %4612 = vmatprep.subr.bf16.mxu1 %v5414_v2  ;;  %v2045_v42 = vrot.slane %v2043_v31, 5  ;;  %v2030_v46 = vor.u32 %v2029_v36, %v2026_v35  ;;  %v2041_v47 = vrot.slane %v2040_v38, 4  ;;  %v2002_v52 = vld [vmem:[#allocation2 + $0x18] sm:$0xf]  ;;  %v591_v56 = vsel %vm5378_vm8, %v574_v32, %v590_v33  ;;  %v845_v57 = vld [vmem:[#allocation2 + $0x10] sm:$0xf] }
  0x31   : > { %v2059_v53 = vrot.slane %v2057_v43, 5  ;;  %v2063_v55 = vrot.slane %v2061_v44, 4  ;;  %v2048_v61 = vshrl.u32 %v2002_v52, 16  ;;  %v2051_v62 = vshll.u32 %v2002_v52, 16  ;;  %592 = vst [vmem:[#allocation2] sm:$0xf] %v591_v56 }
  0x32   : > { %v2031_v58 = vrot.slane %v2030_v46, 4  ;;  %v2046_v59 = vsel %vm5434_vm12, %v2041_v47, %v2045_v42  ;;  %v5444_v60 = vld [vmem:[#allocation2 + $0x20] sm:$0x1]  ;;  %v6431_v1 = vrot.slane %v5430_v39, 5  ;;  %v583_v3 = vsel %vm5365_vm7, %v575_v45, %v582_v48  ;;  %v875_v4 = vld [vmem:[#allocation2 + $0x14] sm:$0x1] }
  0x33   : > { %v2064_v63 = vor.u32 %v2063_v55, %v2059_v53  ;;  %v2067_v0 = vshll.u32 %v5444_v60, 16  ;;  %v2050_v6 = vrot.slane %v2048_v61, 4  ;;  %v2053_v7 = vrot.slane %v2051_v62, 5  ;;  %593 = vst [vmem:[#allocation2 + $0x4] sm:$0xf] %v583_v3  ;;  %v5069_v45 = vld [vmem:[%s6426_s3 + $0x148] sm:$0xff]  }
  0x34   : > { %v2036_v5 = vsel %vm5434_vm12, %v2031_v58, %v2035_v29  ;;  %v595_v8 = vsel %vm5338_vm2, %v584_v49, %v594_v50  ;;  %v910_v12 = vshrl.u32 %v844_v51, 16  ;;  %v913_v15 = vshll.u32 %v844_v51, 16  ;;  %v474_v19 = vld [vmem:[%s5324_s16 + $0x14] sm:$0xf]  ;;  %v772_v52 = vld [vmem:[#allocation2 + $0x24] sm:$0xf] }
  0x35   : > { %v4193_v9 = vcombine.low %v2036_v5, %v2046_v59  ;;  %v2065_v10 = vrot.slane %v2064_v63, 4  ;;  %v2069_v11 = vrot.slane %v2067_v0, 5  ;;  %596 = vst [vmem:[#allocation2 + $0x8] sm:$0x1] %v595_v8  ;;  %v2054_v14 = vor.u32 %v2053_v7, %v2050_v6  ;;  %v776_v59 = vld [vmem:[#allocation2 + $0x2c] sm:$0x1] }
  0x36   : > { %v919_v16 = vshll.u32 %v845_v57, 16  ;;  %v923_v18 = vshrl.u32 %v845_v57, 16  ;;  %v5459_v22 = vrot.slane %v6431_v1, 4  ;;  %v912_v23 = vrot.slane %v910_v12, 4  ;;  %v475_v61 = vld [vmem:[%s5324_s16 + $0x18] sm:$0xf] }
  0x37   : > { %4724 = vmatprep.mubr.bf16.mxu0 %v4193_v9  ;;  %v2070_v20 = vsel %vm5434_vm12, %v2065_v10, %v2069_v11  ;;  %v929_v24 = vshll.u32 %v875_v4, 16  ;;  %v2055_v25 = vrot.slane %v2054_v14, 4  ;;  %v915_v26 = vrot.slane %v913_v15, 5  ;;  %v548_v62 = vld [vmem:[#allocation2 + $0x38] sm:$0x1]  ;;  %v5071_v5 = vld [vmem:[%s6426_s3 + $0x150] sm:$0xff]  }
  0x38   : > { %v921_v27 = vrot.slane %v919_v16, 5  ;;  %v925_v29 = vrot.slane %v923_v18, 4  ;;  %v2469_v30 = vrot.slane %v5444_v60, 5  ;;  %v5462_v31 = vld [vmem:[#allocation2] sm:$0xf]  ;;  %v634_v32 = vrot.slane %v632_v34, 7 }
  0x39   : > { %v635_v33 = vshll.u32 %v5426_v21, 16  ;;  %v640_v35 = vshrl.u32 %v474_v19, 16  ;;  %v2060_v36 = vsel %vm5434_vm12, %v2055_v25, %v2059_v53  ;;  %v886_v38 = vshrl.u32 %v5462_v31, 16  ;;  %v516_v53 = vld [vmem:[#allocation2 + $0x30] sm:$0x1]  ;;  %s6481_s10 = smov (!%p5920_p10, %s433_s10), 15 }
  0x3a   : > { %v889_v40 = vshll.u32 %v5462_v31, 16  ;;  %v916_v42 = vor.u32 %v915_v26, %v912_v23  ;;  %v4194_v43 = vcombine.low %v2060_v36, %v2070_v20  ;;  %v5469_v44 = vld [vmem:[#allocation2 + $0x4] sm:$0xf]  ;;  %v926_v46 = vor.u32 %v925_v29, %v921_v27  ;;  %v476_v14 = vld [vmem:[%s5324_s16 + $0x1c] sm:$0xf]  ;;  %s6483_s10 = smov (!%p5920_p10, %s6481_s10), 15 }
  0x3b   : > { %v931_v34 = vrot.slane %v929_v24, 5  ;;  %v637_v21 = vor.u32 %v635_v33, %v634_v32  ;;  %v888_v48 = vrot.slane %v886_v38, 4  ;;  %v895_v50 = vshll.u32 %v5469_v44, 16  ;;  %v846_v23 = vld [vmem:[#allocation2 + $0x18] sm:$0xf]  ;;  %s4048_s12 = sshll.u32 %s6483_s10, 1 }
  0x3c   : > { %v874_v47 = vld [vmem:[#allocation2 + $0x8] sm:$0x1]  ;;  %v891_v49 = vrot.slane %v889_v40, 5  ;;  %v899_v51 = vshrl.u32 %v5469_v44, 16  ;;  %4725 = vmatmul.mubr.bf16.vlgmr.msra.gmra.mrb[0].mxu0 %v4194_v43  ;;  %v917_v56 = vrot.slane %v916_v42, 4  ;;  %v927_v57 = vrot.slane %v926_v46, 4  ;;  %s442_s13 = sadd.s32 %s4048_s12, %s5297_s18 }
  0x3d   : > { %v905_v55 = vshll.u32 %v874_v47, 16  ;;  %v638_v58 = vrot.slane %v634_v32, 4  ;;  %4741 = vmatpush3.bf16.msra.mxu0 %v5398_v54  ;;  %v897_v0 = vrot.slane %v895_v50, 5  ;;  %v642_v4 = vrot.slane %v640_v35, 7  ;;  %v876_v36 = vld [vmem:[#allocation2 + $0x20] sm:$0x1] }
  0x3e   : > { %v892_v63 = vor.u32 %v891_v49, %v888_v48  ;;  %v901_v3 = vrot.slane %v899_v51, 4  ;;  %4742 = vmatprep.subr.bf16.mxu0 %v5069_v45  ;;  %v922_v7 = vsel %vm5434_vm12, %v917_v56, %v921_v27  ;;  %v932_v8 = vsel %vm5434_vm12, %v927_v57, %v931_v34  ;;  %v847_v27 = vld [vmem:[#allocation2 + $0x1c] sm:$0xf]  ;;  %v551_v42 = vld [vmem:[#allocation2 + $0x44] sm:$0x1]  ;;  %v5072_v50 = vld [vmem:[%s6426_s3 + $0x8] sm:$0xff]  }
  0x3f   : > { %v907_v6 = vrot.slane %v905_v55, 5  ;;  %v643_v9 = vshll.u32 %v474_v19, 16  ;;  %v4074_v54 = vcombine.low %v922_v7, %v932_v8  ;;  %v647_v12 = vrot.slane %v642_v4, 4  ;;  %v5073_v38 = vld [vmem:[%s6426_s3 + $0x158] sm:$0xff]   ;;  %v5149_v13 = vld [vmem:[#allocation2 + $0x10] sm:$0xf] }
  0x40   : > { %v893_v10 = vrot.slane %v892_v63, 4  ;;  %v902_v11 = vor.u32 %v901_v3, %v897_v0  ;;  %v773_v16 = vsel %vm5378_vm8, %v637_v21, %v772_v52  ;;  %v517_v18 = vsel %vm5338_vm2, 0, %v516_v53  ;;  %v519_v40 = vld [vmem:[#allocation2 + $0x3c] sm:$0x1]  ;;  %s5960_s21 = scalar_select %p495_p11, 1, 0 }
  0x41   : > { %v645_v15 = vor.u32 %v643_v9, %v642_v4  ;;  %v549_v20 = vsel %vm5346_vm4, 0, %v548_v62  ;;  %4743 = vmatpush3.bf16.msra.mxu0 %v5069_v45  ;;  %774 = vst [vmem:[#allocation2 + $0x24] sm:$0xf] %v773_v16  ;;  %v777_v25 = vsel %vm5338_vm2, %v647_v12, %v776_v59  ;;  %518 = vst [vmem:[#allocation2 + $0x30] sm:$0x1] %v517_v18  ;;  %v649_v26 = vshrl.u32 %v475_v61, 16 }
  0x42   : > { %v898_v24 = vsel %vm5434_vm12, %v893_v10, %v897_v0  ;;  %v903_v19 = vrot.slane %v902_v11, 4  ;;  %550 = vst [vmem:[#allocation2 + $0x38] sm:$0x1] %v549_v20  ;;  %778 = vst [vmem:[#allocation2 + $0x2c] sm:$0x1] %v777_v25  ;;  %4744 = vmatprep.subr.bf16.mxu0 %v5071_v5  ;;  %v652_v32 = vshll.u32 %v475_v61, 16 }
  0x43   : > { %v646_v29 = vsel %vm5365_vm7, %v638_v58, %v645_v15  ;;  %v657_v33 = vshrl.u32 %v476_v14, 16  ;;  %v660_v35 = vshll.u32 %v476_v14, 16  ;;  %v651_v45 = vrot.slane %v649_v26, 7  ;;  %v5075_v61 = vld [vmem:[%s6426_s3 + $0x160] sm:$0xff]   ;;  %v5512_v0 = vld [vmem:[%s6426_s3 + $0x10] sm:$0xff]   ;;  %v5077_v10 = vld [vmem:[%s6426_s3 + $0x168] sm:$0xff]  }
  0x44   : > { %v908_v43 = vsel %vm5434_vm12, %v903_v19, %v907_v6  ;;  %775 = vst [vmem:[#allocation2 + $0x28] sm:$0xf] %v646_v29  ;;  %v934_v46 = vshrl.u32 %v846_v23, 16  ;;  %v937_v34 = vshll.u32 %v846_v23, 16  ;;  %v943_v48 = vshll.u32 %v847_v27, 16  ;;  %s4050_s10 = sshll.u32 %s442_s13, 2 }
  0x45   : > { %v4073_v21 = vcombine.low %v898_v24, %v908_v43  ;;  %v659_v47 = vrot.slane %v657_v33, 7  ;;  %v947_v49 = vshrl.u32 %v847_v27, 16  ;;  %v654_v51 = vor.u32 %v652_v32, %v651_v45  ;;  %4745 = vmatpush3.bf16.msra.mxu0 %v5071_v5  ;;  %v5076_v32 = vld [vmem:[%s6426_s3 + $0x18] sm:$0xff]   ;;  %v5079_v43 = vld [vmem:[%s6426_s3 + $0x170] sm:$0xff]   ;;  %s444_s15 = scalar_lea.vmem %s6425_s2, %s4050_s10  ;;  %p462_p12 = scmp.lt.s32.totalorder %s5184_s24, 1 }
  0x46   : > { %v655_v52 = vrot.slane %v651_v45, 4  ;;  %v936_v53 = vrot.slane %v934_v46, 4  ;;  %v939_v55 = vrot.slane %v937_v34, 5  ;;  %v945_v58 = vrot.slane %v943_v48, 5  ;;  %4746 = vmatprep.subr.bf16.mxu0 %v5073_v38  ;;  %s4055_s22 = sshll.u32 %s6477_s25, 1 }
  0x47   : > { %4596 = vmatprep.mubr.bf16.mxu1 %v4073_v21  ;;  %v662_v56 = vor.u32 %v660_v35, %v659_v47  ;;  %v664_v57 = vrot.slane %v659_v47, 4  ;;  %v949_v59 = vrot.slane %v947_v49, 4  ;;  %v953_v63 = vshll.u32 %v876_v36, 16  ;;  %s6485_s24 = smov (!%p462_p12, %s5184_s24), 1 }
  0x48   : > { %4597 = vmatmul.mubr.bf16.vlgmr.msra.gmra.mrb[0].mxu1 %v4074_v54  ;;  %v940_v62 = vor.u32 %v939_v55, %v936_v53  ;;  %v520_v3 = vsel %vm5338_vm2, 0, %v519_v40  ;;  %v552_v4 = vsel %vm5346_vm4, 0, %v551_v42  ;;  %v2005_v5 = vld [vmem:[#allocation2 + $0x24] sm:$0xf]  ;;  %v779_v7 = vld [vmem:[#allocation2 + $0x30] sm:$0xf]  ;;  %s465_s30 = sadd.s32 %s4055_s22, %s6485_s24 }
  0x49   : > { %4613 = vmatpush3.bf16.msra.mxu1 %v5414_v2  ;;  %v663_v6 = vsel %vm5365_vm7, %v655_v52, %v662_v56  ;;  %v783_v8 = vld [vmem:[#allocation2 + $0x38] sm:$0x1]  ;;  %v950_v9 = vor.u32 %v949_v59, %v945_v58  ;;  %521 = vst [vmem:[#allocation2 + $0x3c] sm:$0x1] %v520_v3  ;;  %553 = vst [vmem:[#allocation2 + $0x44] sm:$0x1] %v552_v4  ;;  %v780_v2 = vsel %vm5378_vm8, %v654_v51, %v779_v7 }
  0x4a   : > { %v5524_v11 = vld [vmem:[#allocation2 + $0x2c] sm:$0x1]  ;;  %v2072_v54 = vshrl.u32 %v2005_v5, 16  ;;  %v2075_v12 = vshll.u32 %v2005_v5, 16  ;;  %4614 = vmatprep.subr.bf16.mxu1 %v5072_v50  ;;  %782 = vst [vmem:[#allocation2 + $0x34] sm:$0xf] %v663_v6  ;;  %v784_v14 = vsel %vm5338_vm2, %v664_v57, %v783_v8  ;;  %4747 = vmatpush3.bf16.msra.mxu0 %v5073_v38 }
  0x4b   : > { %v5530_v15 = vld [vmem:[#allocation2 + $0x24] sm:$0xf]  ;;  %v5532_v16 = vld [vmem:[#allocation2 + $0x28] sm:$0xf]  ;;  %v2091_v18 = vshll.u32 %v5524_v11, 16  ;;  %v941_v20 = vrot.slane %v940_v62, 4  ;;  %4748 = vmatprep.subr.bf16.mxu0 %v5075_v61 }
  0x4c   : > { %781 = vst [vmem:[#allocation2 + $0x30] sm:$0xf] %v780_v2  ;;  %785 = vst [vmem:[#allocation2 + $0x38] sm:$0x1] %v784_v14  ;;  %v951_v23 = vrot.slane %v950_v9, 4  ;;  %v955_v24 = vrot.slane %v953_v63, 5 }
  0x4d   : > { %v2074_v19 = vrot.slane %v2072_v54, 4  ;;  %v2077_v25 = vrot.slane %v2075_v12, 5  ;;  %v2081_v26 = vshll.u32 %v5532_v16, 16  ;;  %v2085_v27 = vshrl.u32 %v5532_v16, 16  ;;  %v5537_v29 = vld [vmem:[#allocation2 + $0x28] sm:$0xf]  ;;  %4615 = vmatpush3.bf16.msra.mxu1 %v5072_v50 }
  0x4e   : > { %v2093_v33 = vrot.slane %v2091_v18, 5  ;;  %v946_v35 = vsel %vm5434_vm12, %v941_v20, %v945_v58  ;;  %v956_v36 = vsel %vm5434_vm12, %v951_v23, %v955_v24  ;;  %v877_v38 = vld [vmem:[#allocation2 + $0x2c] sm:$0x1]  ;;  %v958_v40 = vshrl.u32 %v5530_v15, 16  ;;  %v5548_v42 = vld [vmem:[%s5324_s16 + $0x20] sm:$0xf]  ;;  %4616 = vmatprep.subr.bf16.mxu1 %v5512_v0  ;;  %4749 = vmatpush3.bf16.msra.mxu0 %v5075_v61 }
  0x4f   : > { %v2078_v45 = vor.u32 %v2077_v25, %v2074_v19  ;;  %v2083_v46 = vrot.slane %v2081_v26, 5  ;;  %v2087_v34 = vrot.slane %v2085_v27, 4  ;;  %v4075_v21 = vcombine.low %v946_v35, %v956_v36  ;;  %4750 = vmatprep.subr.bf16.mxu0 %v5077_v10  ;;  %v5078_v56 = vld [vmem:[%s6426_s3 + $0x20] sm:$0xff]   ;;  %v5081_v54 = vld [vmem:[%s6426_s3 + $0x178] sm:$0xff]   ;;  %v522_v26 = vld [vmem:[#allocation2 + $0x48] sm:$0x1] }
  0x50   : > { %v960_v47 = vrot.slane %v958_v40, 4  ;;  %v961_v48 = vshll.u32 %v5530_v15, 16  ;;  %v967_v49 = vshll.u32 %v5537_v29, 16  ;;  %v971_v50 = vshrl.u32 %v5537_v29, 16  ;;  %v478_v20 = vld [vmem:[%s5324_s16 + $0x24] sm:$0xf] }
  0x51   : > { %v2079_v51 = vrot.slane %v2078_v45, 4  ;;  %v2088_v52 = vor.u32 %v2087_v34, %v2083_v46  ;;  %4600 = vmatprep.mubr.bf16.mxu1 %v4075_v21  ;;  %v977_v53 = vshll.u32 %v877_v38, 16  ;;  %v666_v55 = vshrl.u32 %v5548_v42, 16  ;;  %v5561_v57 = vld [vmem:[#allocation2 + $0x34] sm:$0xf]  ;;  %4617 = vmatpush3.bf16.msra.mxu1 %v5512_v0  ;;  %v5586_v27 = vld [vmem:[%s6426_s3 + $0x180] sm:$0xff]  }
  0x52   : > { %v963_v58 = vrot.slane %v961_v48, 5  ;;  %v969_v59 = vrot.slane %v967_v49, 5  ;;  %v973_v61 = vrot.slane %v971_v50, 4  ;;  %v669_v62 = vshll.u32 %v5548_v42, 16  ;;  %4618 = vmatprep.subr.bf16.mxu1 %v5076_v32  ;;  %4751 = vmatpush3.bf16.msra.mxu0 %v5077_v10  ;;  %v5581_v10 = vld [vmem:[%s6426_s3 + $0x28] sm:$0xff]   ;;  %s4056_s19 = sshll.u32 %s465_s30, 1 }
  0x53   : > { %v2084_v63 = vsel %vm5434_vm12, %v2079_v51, %v2083_v46  ;;  %v2089_v3 = vrot.slane %v2088_v52, 4  ;;  %v2008_v4 = vld [vmem:[#allocation2 + $0x30] sm:$0xf]  ;;  %v5567_v5 = vld [vmem:[#allocation2 + $0x38] sm:$0x1]  ;;  %v2105_v6 = vshll.u32 %v5561_v57, 16  ;;  %4752 = vmatprep.subr.bf16.mxu0 %v5079_v43  ;;  %s467_s23 = scalar_lea.vmem %s6430_s7, %s4056_s19 }
  0x54   : > { %v2096_v7 = vshrl.u32 %v2008_v4, 16  ;;  %v2099_v8 = vshll.u32 %v2008_v4, 16  ;;  %v2109_v9 = vshrl.u32 %v5561_v57, 16  ;;  %v2115_v0 = vshll.u32 %v5567_v5, 16  ;;  %v479_v34 = vld [vmem:[%s5324_s16 + $0x28] sm:$0xf] }
  0x55   : > { %v2094_v12 = vsel %vm5434_vm12, %v2089_v3, %v2093_v33  ;;  %v2107_v2 = vrot.slane %v2105_v6, 5  ;;  %v964_v14 = vor.u32 %v963_v58, %v960_v47  ;;  %v974_v18 = vor.u32 %v973_v61, %v969_v59  ;;  %4619 = vmatpush3.bf16.msra.mxu1 %v5076_v32  ;;  %v554_v21 = vld [vmem:[#allocation2 + $0x50] sm:$0x1]  ;;  %v786_v49 = vld [vmem:[#allocation2 + $0x3c] sm:$0xf] }
  0x56   : > { %v4195_v23 = vcombine.low %v2084_v63, %v2094_v12  ;;  %v2098_v24 = vrot.slane %v2096_v7, 4  ;;  %v2101_v19 = vrot.slane %v2099_v8, 5  ;;  %v2111_v25 = vrot.slane %v2109_v9, 4  ;;  %4620 = vmatprep.subr.bf16.mxu1 %v5078_v56  ;;  %4753 = vmatpush3.bf16.msra.mxu0 %v5079_v43  ;;  %v480_v50 = vld [vmem:[%s5324_s16 + $0x2c] sm:$0xf]  ;;  %v5082_v52 = vld [vmem:[%s6426_s3 + $0x30] sm:$0xff]  }
  0x57   : > { %v2117_v33 = vrot.slane %v2115_v0, 5  ;;  %v965_v35 = vrot.slane %v964_v14, 4  ;;  %v975_v36 = vrot.slane %v974_v18, 4  ;;  %v979_v38 = vrot.slane %v977_v53, 5  ;;  %4754 = vmatprep.subr.bf16.mxu0 %v5081_v54  ;;  %v5596_v51 = vld [vmem:[#allocation2 + $0x30] sm:$0xf] }
  0x58   : > { %4728 = vmatprep.mubr.bf16.mxu0 %v4195_v23  ;;  %v2102_v40 = vor.u32 %v2101_v19, %v2098_v24  ;;  %v2112_v42 = vor.u32 %v2111_v25, %v2107_v2  ;;  %v668_v45 = vrot.slane %v666_v55, 7  ;;  %v674_v46 = vshrl.u32 %v478_v20, 16  ;;  %v5610_v9 = vld [vmem:[#allocation2 + $0x34] sm:$0xf]  ;;  %v5616_v25 = vld [vmem:[%s5324_s16 + $0x30] sm:$0xf] }
  0x59   : > { %v970_v32 = vsel %vm5434_vm12, %v965_v35, %v969_v59  ;;  %v980_v47 = vsel %vm5434_vm12, %v975_v36, %v979_v38  ;;  %v677_v48 = vshll.u32 %v478_v20, 16  ;;  %v523_v43 = vsel %vm5338_vm2, 0, %v522_v26  ;;  %v790_v59 = vld [vmem:[#allocation2 + $0x44] sm:$0x1]  ;;  %4621 = vmatpush3.bf16.msra.mxu1 %v5078_v56  ;;  %v525_v18 = vld [vmem:[#allocation2 + $0x54] sm:$0x1] }
  0x5a   : > { %v2103_v53 = vrot.slane %v2102_v40, 4  ;;  %v2113_v55 = vrot.slane %v2112_v42, 4  ;;  %v4076_v58 = vcombine.low %v970_v32, %v980_v47  ;;  %v671_v61 = vor.u32 %v669_v62, %v668_v45  ;;  %524 = vst [vmem:[#allocation2 + $0x48] sm:$0x1] %v523_v43  ;;  %4622 = vmatprep.subr.bf16.mxu1 %v5581_v10  ;;  %4755 = vmatpush3.bf16.msra.mxu0 %v5081_v54  ;;  %v557_v26 = vld [vmem:[#allocation2 + $0x5c] sm:$0x1] }
  0x5b   : > { %v672_v63 = vrot.slane %v668_v45, 4  ;;  %v676_v3 = vrot.slane %v674_v46, 7  ;;  %v555_v4 = vsel %vm5346_vm4, 0, %v554_v21  ;;  %v683_v6 = vshrl.u32 %v479_v34, 16  ;;  %4772 = vmatprep.subr.bf16.mxu0 %v5586_v27  ;;  %v5084_v40 = vld [vmem:[%s6426_s3 + $0x38] sm:$0xff]  }
  0x5c   : > { %v2108_v7 = vsel %vm5434_vm12, %v2103_v53, %v2107_v2  ;;  %v2118_v8 = vsel %vm5434_vm12, %v2113_v55, %v2117_v33  ;;  %4601 = vmatmul.mubr.bf16.gmra.mrb[4].mxu1 %v4076_v58  ;;  %v787_v62 = vsel %vm5378_vm8, %v671_v61, %v786_v49  ;;  %556 = vst [vmem:[#allocation2 + $0x50] sm:$0x1] %v555_v4  ;;  %v686_v56 = vshll.u32 %v479_v34, 16  ;;  %v878_v2 = vld [vmem:[#allocation2 + $0x38] sm:$0x1] }
  0x5d   : > { %v4196_v0 = vcombine.low %v2108_v7, %v2118_v8  ;;  %v679_v12 = vor.u32 %v677_v48, %v676_v3  ;;  %v681_v54 = vrot.slane %v676_v3, 4  ;;  %788 = vst [vmem:[#allocation2 + $0x3c] sm:$0xf] %v787_v62  ;;  %v685_v14 = vrot.slane %v683_v6, 7  ;;  %4623 = vmatpush3.bf16.msra.mxu1 %v5581_v10  ;;  %v5635_v55 = vld [vmem:[%s5324_s16 + $0x34] sm:$0xf] }
  0x5e   : > { %v691_v20 = vshrl.u32 %v480_v50, 16  ;;  %v694_v23 = vshll.u32 %v480_v50, 16  ;;  %v982_v24 = vshrl.u32 %v5596_v51, 16  ;;  %v985_v19 = vshll.u32 %v5596_v51, 16  ;;  %4624 = vmatprep.subr.bf16.mxu1 %v5082_v52  ;;  %v5641_v3 = vld [vmem:[%s6426_s3 + $0x80] sm:$0xff]  }
  0x5f   : > { %4729 = vmatmul.mubr.bf16.gmra.mrb[4].mxu0 %v4196_v0  ;;  %v680_v33 = vsel %vm5365_vm7, %v672_v63, %v679_v12  ;;  %v791_v35 = vsel %vm5338_vm2, %v681_v54, %v790_v59  ;;  %v688_v36 = vor.u32 %v686_v56, %v685_v14  ;;  %v689_v38 = vrot.slane %v685_v14, 4 }
  0x60   : > { %789 = vst [vmem:[#allocation2 + $0x40] sm:$0xf] %v680_v33  ;;  %792 = vst [vmem:[#allocation2 + $0x44] sm:$0x1] %v791_v35  ;;  %v693_v42 = vrot.slane %v691_v20, 7  ;;  %v984_v45 = vrot.slane %v982_v24, 4 }
  0x61   : > { %v987_v10 = vrot.slane %v985_v19, 5  ;;  %v991_v46 = vshll.u32 %v5610_v9, 16  ;;  %v793_v34 = vld [vmem:[#allocation2 + $0x48] sm:$0xf]  ;;  %v995_v21 = vshrl.u32 %v5610_v9, 16  ;;  %v1001_v32 = vshll.u32 %v878_v2, 16  ;;  %4625 = vmatpush3.bf16.msra.mxu1 %v5082_v52 }
  0x62   : > { %v526_v47 = vsel %vm5338_vm2, 0, %v525_v18  ;;  %v558_v48 = vsel %vm5346_vm4, 0, %v557_v26  ;;  %v696_v49 = vor.u32 %v694_v23, %v693_v42  ;;  %v698_v50 = vrot.slane %v693_v42, 4  ;;  %4626 = vmatprep.subr.bf16.mxu1 %v5084_v40 }
  0x63   : > { %v794_v43 = vsel %vm5378_vm8, %v688_v36, %v793_v34  ;;  %v988_v53 = vor.u32 %v987_v10, %v984_v45  ;;  %527 = vst [vmem:[#allocation2 + $0x54] sm:$0x1] %v526_v47  ;;  %559 = vst [vmem:[#allocation2 + $0x5c] sm:$0x1] %v558_v48  ;;  %v797_v58 = vld [vmem:[#allocation2 + $0x50] sm:$0x1] }
  0x64   : > { %795 = vst [vmem:[#allocation2 + $0x48] sm:$0xf] %v794_v43  ;;  %v993_v61 = vrot.slane %v991_v46, 5  ;;  %v997_v59 = vrot.slane %v995_v21, 4  ;;  %v700_v63 = vshrl.u32 %v5616_v25, 16  ;;  %v697_v6 = vsel %vm5365_vm7, %v689_v38, %v696_v49 }
  0x65   : > { %v2011_v4 = vld [vmem:[#allocation2 + $0x3c] sm:$0xf]  ;;  %v798_v7 = vsel %vm5338_vm2, %v698_v50, %v797_v58  ;;  %v989_v52 = vrot.slane %v988_v53, 4  ;;  %v1003_v8 = vrot.slane %v1001_v32, 5  ;;  %796 = vst [vmem:[#allocation2 + $0x4c] sm:$0xf] %v697_v6  ;;  %4627 = vmatpush3.bf16.msra.mxu1 %v5084_v40 }
  0x66   : > { %v5647_v62 = vld [vmem:[#allocation2 + $0x3c] sm:$0xf]  ;;  %v2120_v56 = vshrl.u32 %v2011_v4, 16  ;;  %v2123_v0 = vshll.u32 %v2011_v4, 16  ;;  %799 = vst [vmem:[#allocation2 + $0x50] sm:$0x1] %v798_v7  ;;  %v998_v12 = vor.u32 %v997_v59, %v993_v61  ;;  %4644 = vmatprep.subr.bf16.mxu1 %v5641_v3 }
  0x67   : > { %v1006_v54 = vshrl.u32 %v5647_v62, 16  ;;  %v1009_v14 = vshll.u32 %v5647_v62, 16  ;;  %v5651_v2 = vrot.slane %v700_v63, 7  ;;  %v703_v18 = vshll.u32 %v5616_v25, 16  ;;  %v5655_v23 = vld [vmem:[#allocation2 + $0x40] sm:$0xf] }
  0x68   : > { %v708_v20 = vshrl.u32 %v5635_v55, 16  ;;  %v5657_v24 = vld [vmem:[#allocation2 + $0x44] sm:$0x1]  ;;  %v2122_v19 = vrot.slane %v2120_v56, 4  ;;  %v2125_v26 = vrot.slane %v2123_v0, 5  ;;  %v994_v33 = vsel %vm5434_vm12, %v989_v52, %v993_v61 }
  0x69   : > { %v2129_v36 = vshll.u32 %v5655_v23, 16  ;;  %v2133_v38 = vshrl.u32 %v5655_v23, 16  ;;  %v2139_v40 = vshll.u32 %v5657_v24, 16  ;;  %v999_v42 = vrot.slane %v998_v12, 4  ;;  %v5667_v45 = vld [vmem:[#allocation2 + $0x40] sm:$0xf] }
  0x6a   : > { %v2126_v10 = vor.u32 %v2125_v26, %v2122_v19  ;;  %v1008_v46 = vrot.slane %v1006_v54, 4  ;;  %v1011_v34 = vrot.slane %v1009_v14, 5  ;;  %v1015_v21 = vshll.u32 %v5667_v45, 16  ;;  %v5672_v59 = vld [vmem:[#allocation2 + $0x44] sm:$0x1] }
  0x6b   : > { %v2131_v32 = vrot.slane %v2129_v36, 5  ;;  %v2135_v47 = vrot.slane %v2133_v38, 4  ;;  %v2141_v48 = vrot.slane %v2139_v40, 5  ;;  %v2014_v49 = vld [vmem:[#allocation2 + $0x48] sm:$0xf]  ;;  %v1004_v50 = vsel %vm5434_vm12, %v999_v42, %v1003_v8 }
  0x6c   : > { %v2127_v43 = vrot.slane %v2126_v10, 4  ;;  %v2144_v53 = vshrl.u32 %v2014_v49, 16  ;;  %v2147_v58 = vshll.u32 %v2014_v49, 16  ;;  %v4077_v61 = vcombine.low %v994_v33, %v1004_v50  ;;  %v5674_v4 = vld [vmem:[#allocation2 + $0x4c] sm:$0xf] }
  0x6d   : > { %v2136_v63 = vor.u32 %v2135_v47, %v2131_v32  ;;  %v5676_v6 = vld [vmem:[#allocation2 + $0x50] sm:$0x1]  ;;  %v1012_v7 = vor.u32 %v1011_v34, %v1008_v46  ;;  %v1017_v52 = vrot.slane %v1015_v21, 5  ;;  %v1019_v56 = vshrl.u32 %v5667_v45, 16  ;;  %v528_v36 = vld [vmem:[#allocation2 + $0x60] sm:$0x1] }
  0x6e   : > { %v2132_v0 = vsel %vm5434_vm12, %v2127_v43, %v2131_v32  ;;  %v2146_v12 = vrot.slane %v2144_v53, 4  ;;  %v2149_v8 = vrot.slane %v2147_v58, 5  ;;  %v2153_v54 = vshll.u32 %v5674_v4, 16  ;;  %4604 = vmatprep.mubr.bf16.mxu1 %v4077_v61  ;;  %v560_v46 = vld [vmem:[#allocation2 + $0x68] sm:$0x1] }
  0x6f   : > { %v2137_v14 = vrot.slane %v2136_v63, 4  ;;  %v2157_v19 = vshrl.u32 %v5674_v4, 16  ;;  %v2163_v26 = vshll.u32 %v5676_v6, 16  ;;  %v1013_v33 = vrot.slane %v1012_v7, 4  ;;  %v800_v49 = vld [vmem:[#allocation2 + $0x54] sm:$0xf] }
  0x70   : > { %v2150_v38 = vor.u32 %v2149_v8, %v2146_v12  ;;  %v2155_v40 = vrot.slane %v2153_v54, 5  ;;  %v1021_v42 = vrot.slane %v1019_v56, 4  ;;  %v1025_v10 = vshll.u32 %v5672_v59, 16  ;;  %v483_v50 = vld [vmem:[%s5324_s16 + $0x38] sm:$0xf] }
  0x71   : > { %v2142_v34 = vsel %vm5434_vm12, %v2137_v14, %v2141_v48  ;;  %v2159_v21 = vrot.slane %v2157_v19, 4  ;;  %v2165_v32 = vrot.slane %v2163_v26, 5  ;;  %v1018_v47 = vsel %vm5434_vm12, %v1013_v33, %v1017_v52  ;;  %v804_v63 = vld [vmem:[#allocation2 + $0x5c] sm:$0x1]  ;;  %v5702_v19 = vld [vmem:[#allocation2 + $0x48] sm:$0xf] }
  0x72   : > { %v4197_v43 = vcombine.low %v2132_v0, %v2142_v34  ;;  %v2151_v53 = vrot.slane %v2150_v38, 4  ;;  %v1022_v58 = vor.u32 %v1021_v42, %v1017_v52  ;;  %v1027_v61 = vrot.slane %v1025_v10, 5  ;;  %v484_v7 = vld [vmem:[%s5324_s16 + $0x3c] sm:$0xf]  ;;  %v5704_v25 = vld [vmem:[#allocation2 + $0x4c] sm:$0xf] }
  0x73   : > { %v2160_v56 = vor.u32 %v2159_v21, %v2155_v40  ;;  %v705_v12 = vor.u32 %v703_v18, %v5651_v2  ;;  %v706_v48 = vrot.slane %v5651_v2, 4  ;;  %v710_v8 = vrot.slane %v708_v20, 7 }
  0x74   : > { %4732 = vmatprep.mubr.bf16.mxu0 %v4197_v43  ;;  %v2156_v0 = vsel %vm5434_vm12, %v2151_v53, %v2155_v40  ;;  %v1023_v54 = vrot.slane %v1022_v58, 4  ;;  %v711_v52 = vshll.u32 %v5635_v55, 16  ;;  %v529_v14 = vsel %vm5338_vm2, 0, %v528_v36  ;;  %v5712_v40 = vld [vmem:[#allocation2 + $0x50] sm:$0x1] }
  0x75   : > { %v2161_v18 = vrot.slane %v2160_v56, 4  ;;  %v715_v2 = vrot.slane %v710_v8, 4  ;;  %v801_v20 = vsel %vm5378_vm8, %v705_v12, %v800_v49  ;;  %530 = vst [vmem:[#allocation2 + $0x60] sm:$0x1] %v529_v14  ;;  %v561_v26 = vsel %vm5346_vm4, 0, %v560_v46 }
  0x76   : > { %v1028_v33 = vsel %vm5434_vm12, %v1023_v54, %v1027_v61  ;;  %v713_v55 = vor.u32 %v711_v52, %v710_v8  ;;  %802 = vst [vmem:[#allocation2 + $0x54] sm:$0xf] %v801_v20  ;;  %562 = vst [vmem:[#allocation2 + $0x68] sm:$0x1] %v561_v26  ;;  %v717_v36 = vshrl.u32 %v483_v50, 16  ;;  %v720_v38 = vshll.u32 %v483_v50, 16 }
  0x77   : > { %v2166_v42 = vsel %vm5434_vm12, %v2161_v18, %v2165_v32  ;;  %v4078_v10 = vcombine.low %v1018_v47, %v1028_v33  ;;  %v805_v34 = vsel %vm5338_vm2, %v715_v2, %v804_v63  ;;  %v725_v21 = vshrl.u32 %v484_v7, 16 }
  0x78   : > { %v4198_v49 = vcombine.low %v2156_v0, %v2166_v42  ;;  %v714_v46 = vsel %vm5365_vm7, %v706_v48, %v713_v55  ;;  %806 = vst [vmem:[#allocation2 + $0x5c] sm:$0x1] %v805_v34  ;;  %v719_v43 = vrot.slane %v717_v36, 7  ;;  %v728_v53 = vshll.u32 %v484_v7, 16 }
  0x79   : > { %4605 = vmatmul.mubr.bf16.gmra.mrb[8].mxu1 %v4078_v10  ;;  %803 = vst [vmem:[#allocation2 + $0x58] sm:$0xf] %v714_v46  ;;  %v727_v50 = vrot.slane %v725_v21, 7  ;;  %v1030_v58 = vshrl.u32 %v5702_v19, 16  ;;  %v1033_v61 = vshll.u32 %v5702_v19, 16  ;;  %v1039_v32 = vshll.u32 %v5704_v25, 16 }
  0x7a   : > { %4733 = vmatmul.mubr.bf16.gmra.mrb[8].mxu0 %v4198_v49  ;;  %v722_v47 = vor.u32 %v720_v38, %v719_v43  ;;  %v723_v63 = vrot.slane %v719_v43, 4  ;;  %v1043_v56 = vshrl.u32 %v5704_v25, 16  ;;  %v1049_v12 = vshll.u32 %v5712_v40, 16  ;;  %v5738_v49 = vld [vmem:[#allocation2 + $0x14] sm:$0x1] }
  0x7b   : > { %v730_v48 = vor.u32 %v728_v53, %v727_v50  ;;  %v732_v8 = vrot.slane %v727_v50, 4  ;;  %v1032_v0 = vrot.slane %v1030_v58, 4  ;;  %v1035_v7 = vrot.slane %v1033_v61, 5 }
  0x7c   : > { %v807_v54 = vld [vmem:[#allocation2 + $0x60] sm:$0xf]  ;;  %v1041_v52 = vrot.slane %v1039_v32, 5  ;;  %v1045_v14 = vrot.slane %v1043_v56, 4  ;;  %v1051_v18 = vrot.slane %v1049_v12, 5  ;;  %v5749_v58 = vsel %vm5734_vm15, %v5459_v22, %v2469_v30 }
  0x7d   : > { %v2017_v2 = vld [vmem:[#allocation2 + $0x54] sm:$0xf]  ;;  %v731_v20 = vsel %vm5365_vm7, %v723_v63, %v730_v48  ;;  %v808_v26 = vsel %vm5378_vm8, %v722_v47, %v807_v54  ;;  %v811_v33 = vld [vmem:[#allocation2 + $0x68] sm:$0x1]  ;;  %v1036_v55 = vor.u32 %v1035_v7, %v1032_v0 }
  0x7e   : > { %v5729_v36 = vld [vmem:[#allocation2 + $0x54] sm:$0xf]  ;;  %v2168_v38 = vshrl.u32 %v2017_v2, 16  ;;  %v2171_v42 = vshll.u32 %v2017_v2, 16  ;;  %809 = vst [vmem:[#allocation2 + $0x60] sm:$0xf] %v808_v26  ;;  %v812_v10 = vsel %vm5338_vm2, %v732_v8, %v811_v33  ;;  %v1046_v34 = vor.u32 %v1045_v14, %v1041_v52 }
  0x7f   : > { %810 = vst [vmem:[#allocation2 + $0x64] sm:$0xf] %v731_v20  ;;  %v5741_v43 = vld [vmem:[#allocation2 + $0x5c] sm:$0x1]  ;;  %813 = vst [vmem:[#allocation2 + $0x68] sm:$0x1] %v812_v10 }
  0x80   : > { %v1037_v53 = vrot.slane %v1036_v55, 4  ;;  %v1054_v50 = vshrl.u32 %v5729_v36, 16  ;;  %v5751_v61 = vld [vmem:[#allocation2 + $0x58] sm:$0xf]  ;;  %v2170_v32 = vrot.slane %v2168_v38, 4  ;;  %v2173_v47 = vrot.slane %v2171_v42, 5 }
  0x81   : > { %v2187_v63 = vshll.u32 %v5741_v43, 16  ;;  %v1047_v56 = vrot.slane %v1046_v34, 4  ;;  %v2177_v12 = vshll.u32 %v5751_v61, 16  ;;  %v2181_v48 = vshrl.u32 %v5751_v61, 16  ;;  %v5758_v60 = vld [vmem:[#allocation2 + $0x58] sm:$0xf] }
  0x82   : > { %v1042_v8 = vsel %vm5434_vm12, %v1037_v53, %v1041_v52  ;;  %v5760_v0 = vld [vmem:[#allocation2 + $0x5c] sm:$0x1]  ;;  %v2174_v22 = vor.u32 %v2173_v47, %v2170_v32  ;;  %v1056_v7 = vrot.slane %v1054_v50, 4  ;;  %v1057_v54 = vshll.u32 %v5729_v36, 16  ;;  %v2425_v42 = vld [vmem:[#allocation2 + $0xc] sm:$0xe] }
  0x83   : > { %6454 = vst [vmem:[#allocation7_spill] sm:$0xff] %v5760_v0  ;;  %v1052_v30 = vsel %vm5434_vm12, %v1047_v56, %v1051_v18  ;;  %v2179_v14 = vrot.slane %v2177_v12, 5  ;;  %v2183_v2 = vrot.slane %v2181_v48, 4  ;;  %v1063_v26 = vshll.u32 %v5758_v60, 16 }
  0x84   : > { %v4079_v20 = vcombine.low %v1042_v8, %v1052_v30  ;;  %v2175_v33 = vrot.slane %v2174_v22, 4  ;;  %v2189_v55 = vrot.slane %v2187_v63, 5  ;;  %v1059_v38 = vrot.slane %v1057_v54, 5 }
  0x85   : > { %v1067_v52 = vshrl.u32 %v5758_v60, 16  ;;  %v2184_v10 = vor.u32 %v2183_v2, %v2179_v14  ;;  %v2020_v34 = vld [vmem:[#allocation2 + $0x60] sm:$0xf]  ;;  %v1065_v18 = vrot.slane %v1063_v26, 5  ;;  %v1073_v50 = vshll.u32 %v5760_v0, 16 }
  0x86   : > { %v5767_v53 = vld [vmem:[#allocation2 + $0x64] sm:$0xf]  ;;  %4608 = vmatprep.mubr.bf16.mxu1 %v4079_v20  ;;  %v4089_v32 = vcombine.low %v5462_v31, %v5469_v44  ;;  %v2180_v47 = vsel %vm5434_vm12, %v2175_v33, %v2179_v14  ;;  %v5774_v56 = vld [vmem:[#allocation2 + $0x68] sm:$0x1]  ;;  %v2192_v63 = vshrl.u32 %v2020_v34, 16  ;;  %v2195_v12 = vshll.u32 %v2020_v34, 16 }
  0x87   : > { %v2201_v48 = vshll.u32 %v5767_v53, 16  ;;  %v2185_v8 = vrot.slane %v2184_v10, 4  ;;  %v2205_v22 = vshrl.u32 %v5767_v53, 16  ;;  %v2211_v30 = vshll.u32 %v5774_v56, 16  ;;  %v2426_v2 = vld [vmem:[#allocation2 + $0x18] sm:$0xe] }
  0x88   : > { %v1060_v54 = vor.u32 %v1059_v38, %v1056_v7  ;;  %v2194_v20 = vrot.slane %v2192_v63, 4  ;;  %v2197_v26 = vrot.slane %v2195_v12, 5  ;;  %v1069_v31 = vrot.slane %v1067_v52, 4  ;;  %v2427_v34 = vld [vmem:[#allocation2 + $0x24] sm:$0xe] }
  0x89   : > { %v2203_v35 = vrot.slane %v2201_v48, 5  ;;  %v2190_v44 = vsel %vm5434_vm12, %v2185_v8, %v2189_v55  ;;  %v2207_v14 = vrot.slane %v2205_v22, 4  ;;  %v4209_v46 = vrot.slane %v2425_v42, 9  ;;  %v2428_v63 = vld [vmem:[#allocation2 + $0x30] sm:$0xe] }
  0x8a   : > { %v1061_v33 = vrot.slane %v1060_v54, 4  ;;  %v4199_v1 = vcombine.low %v2180_v47, %v2190_v44  ;;  %v2198_v17 = vor.u32 %v2197_v26, %v2194_v20  ;;  %v1070_v10 = vor.u32 %v1069_v31, %v1065_v18  ;;  %v2429_v44 = vld [vmem:[#allocation2 + $0x3c] sm:$0xe] }
  0x8b   : > { %v1075_v37 = vrot.slane %v1073_v50, 5  ;;  %v2208_v28 = vor.u32 %v2207_v14, %v2203_v35  ;;  %v2213_v0 = vrot.slane %v2211_v30, 5  ;;  %v2459_v7 = vrot.slane %v5149_v13, 5  ;;  %v5813_v14 = vld [vmem:[#allocation2 + $0x10] sm:$0xf] }
  0x8c   : > { %v4210_v38 = vrot.slane %v2426_v2, 9  ;;  %4736 = vmatprep.mubr.bf16.mxu0 %v4199_v1  ;;  %v2199_v12 = vrot.slane %v2198_v17, 4  ;;  %v1066_v52 = vsel %vm5434_vm12, %v1061_v33, %v1065_v18  ;;  %v1071_v55 = vrot.slane %v1070_v10, 4  ;;  %v5818_v33 = vld [vmem:[#allocation2 + $0x14] sm:$0x1]  ;;  %v5086_v10 = vld [vmem:[%s6426_s3 + $0x188] sm:$0xff]  }
  0x8d   : > { %v2473_v48 = vrot.slane %v5532_v16, 5  ;;  %v2209_v42 = vrot.slane %v2208_v28, 4  ;;  %v2460_v47 = vsel %vm5734_vm15, %v4209_v46, %v2459_v7  ;;  %v2461_v8 = vrot.slane %v2459_v7, 4 }
  0x8e   : > { %v6455_v50 = vrot.slane %v5430_v39, 5  ;;  %v2204_v1 = vsel %vm5434_vm12, %v2199_v12, %v2203_v35  ;;  %v1076_v17 = vsel %vm5434_vm12, %v1071_v55, %v1075_v37  ;;  %v4211_v22 = vrot.slane %v2427_v34, 9 }
  0x8f   : > { %v2214_v28 = vsel %vm5434_vm12, %v2209_v42, %v2213_v0  ;;  %v4080_v16 = vcombine.low %v1066_v52, %v1076_v17  ;;  %v6456_v46 = vrot.slane %v5738_v49, 5  ;;  %v2475_v30 = vrot.slane %v2473_v48, 4  ;;  %v5826_v52 = vld [vmem:[#allocation2 + $0x8] sm:$0x1]  ;;  %v2430_v42 = vld [vmem:[#allocation2 + $0x48] sm:$0xe] }
  0x90   : > { %v2467_v13 = vsel %vm5734_vm15, %v4210_v38, %v6455_v50  ;;  %v4200_v54 = vcombine.low %v2204_v1, %v2214_v28  ;;  %v2476_v35 = vrot.slane %v5524_v11, 5  ;;  %v4212_v20 = vrot.slane %v2428_v63, 9  ;;  %v5089_v1 = vld [vmem:[%s6426_s3 + $0x190] sm:$0xff]  }
  0x91   : > { %v4234_v18 = vcombine.low %v2467_v13, %v5749_v58  ;;  %v2463_v39 = vsel %vm5734_vm15, %v2461_v8, %v6456_v46  ;;  %4609 = vmatmul.mubr.bf16.gmra.mrb[12].mxu1 %v4080_v16  ;;  %v2480_v37 = vrot.slane %v5561_v57, 5  ;;  %v2483_v58 = vrot.slane %v5567_v5, 5  ;;  %v5150_v57 = vld [vmem:[#allocation2 + $0xc] sm:$0xf]  ;;  %v5832_v8 = vld [vmem:[#allocation2 + $0x1c] sm:$0xf] }
  0x92   : > { %v4233_v2 = vcombine.low %v2460_v47, %v2463_v39  ;;  %4737 = vmatmul.mubr.bf16.gmra.mrb[12].mxu0 %v4200_v54  ;;  %4628 = vmatprep.mubr.bf16.mxu1 %v4089_v32  ;;  %v2487_v26 = vrot.slane %v5655_v23, 5  ;;  %v2474_v31 = vsel %vm5734_vm15, %v4211_v22, %v2473_v48  ;;  %v2477_v11 = vsel %vm5734_vm15, %v2475_v30, %v2476_v35  ;;  %v5090_v48 = vld [vmem:[%s6426_s3 + $0x88] sm:$0xff]   ;;  %v5154_v47 = vld [vmem:[#allocation2 + $0x18] sm:$0xf]  ;;  %v5094_v13 = vld [vmem:[%s6426_s3 + $0x90] sm:$0xff]  }
  0x93   : > { %v5806_v49 = vsel %vm5734_vm15, %v4212_v20, %v2480_v37  ;;  %v2482_v0 = vrot.slane %v2480_v37, 4  ;;  %v4090_v5 = vcombine.low %v5150_v57, %v5813_v14  ;;  %v1503_v34 = vrot.slane %v5818_v33, 5  ;;  %v2431_v17 = vld [vmem:[#allocation2 + $0x54] sm:$0xe]  ;;  %v5092_v54 = vld [vmem:[%s6426_s3 + $0x198] sm:$0xff]  }
  0x94   : > { %4756 = vmatprep.mubr.bf16.mxu0 %v4233_v2  ;;  %v4235_v7 = vcombine.low %v2474_v31, %v2477_v11  ;;  %v4213_v38 = vrot.slane %v2429_v44, 9  ;;  %v2489_v63 = vrot.slane %v2487_v26, 4  ;;  %v2490_v12 = vrot.slane %v5657_v24, 5  ;;  %v5096_v2 = vld [vmem:[%s6426_s3 + $0x98] sm:$0xff]  }
  0x95   : > { %v2484_v32 = vsel %vm5734_vm15, %v2482_v0, %v2483_v58  ;;  %v1496_v55 = vrot.slane %v5826_v52, 5  ;;  %v4091_v50 = vcombine.low %v5154_v47, %v5832_v8  ;;  %v2494_v24 = vrot.slane %v5674_v4, 5  ;;  %v5100_v58 = vld [vmem:[%s6426_s3 + $0xa0] sm:$0xff]   ;;  %v5098_v47 = vld [vmem:[%s6426_s3 + $0x1a8] sm:$0xff]  }
  0x96   : > { %v4236_v23 = vcombine.low %v5806_v49, %v2484_v32  ;;  %v2488_v22 = vsel %vm5734_vm15, %v4213_v38, %v2487_v26  ;;  %v2491_v28 = vsel %vm5734_vm15, %v2489_v63, %v2490_v12  ;;  %v4214_v16 = vrot.slane %v2430_v42, 9  ;;  %v5095_v26 = vld [vmem:[%s6426_s3 + $0x1a0] sm:$0xff]   ;;  %v1469_v12 = vld [vmem:[#allocation2 + $0x3c] sm:$0xe] }
  0x97   : > { %v2501_v4 = vrot.slane %v5751_v61, 5  ;;  %v2496_v46 = vrot.slane %v2494_v24, 4  ;;  %v4215_v39 = vrot.slane %v2431_v17, 9  ;;  %v2504_v30 = vrot.slane %v5741_v43, 5  ;;  %v5866_v43 = vld [vmem:[#allocation2 + $0x4] sm:$0xf] }
  0x98   : > { %v4237_v61 = vcombine.low %v2488_v22, %v2491_v28  ;;  %v2508_v35 = vrot.slane %v5767_v53, 5  ;;  %v1493_v20 = vrot.slane %v5866_v43, 5  ;;  %v1500_v37 = vrot.slane %v5813_v14, 5  ;;  %v531_v17 = vld [vmem:[#allocation2 + $0x6c] sm:$0x1] }
  0x99   : > { %4629 = vmatmul.mubr.bf16.vlgmr.msra.gmra.mrb[0].mxu1 %v4090_v5  ;;  %v2511_v0 = vrot.slane %v5774_v56, 5  ;;  %v2495_v31 = vsel %vm5734_vm15, %v4214_v16, %v2494_v24  ;;  %v2502_v32 = vsel %vm5734_vm15, %v4215_v39, %v2501_v4  ;;  %v6457_v38 = vcombine.low %v5596_v51, %v5610_v9  ;;  %v5930_v24 = vld [vmem:[%s6426_s3 + $0xb0] sm:$0xff]   ;;  %v1470_v22 = vld [vmem:[#allocation2 + $0x48] sm:$0xe] }
  0x9a   : > { %4757 = vmatmul.mubr.bf16.vlgmr.msra.gmra.mrb[0].mxu0 %v4234_v18  ;;  %4645 = vmatpush3.bf16.msra.mxu1 %v5641_v3  ;;  %v4092_v3 = vcombine.low %v5530_v15, %v5537_v29  ;;  %v5851_v18 = vld [vmem:[#allocation2 + $0x60] sm:$0xe]  ;;  %v5863_v29 = vld [vmem:[#allocation2 + $0xc] sm:$0xe]  ;;  %v2510_v44 = vrot.slane %v2508_v35, 4  ;;  %v5887_v57 = vrot.slane %v1493_v20, 4  ;;  %v4094_v63 = vcombine.low %v5647_v62, %v5667_v45 }
  0x9b   : > { %4773 = vmatpush3.bf16.msra.mxu0 %v5586_v27  ;;  %4760 = vmatprep.mubr.bf16.mxu0 %v4235_v7  ;;  %v2497_v27 = vrot.slane %v5676_v6, 5  ;;  %v5861_v15 = vld [vmem:[#allocation2] sm:$0xe]  ;;  %v2503_v6 = vrot.slane %v2501_v4, 4  ;;  %v4216_v49 = vrot.slane %v5851_v18, 9  ;;  %v4106_v5 = vrot.slane %v5863_v29, 9 }
  0x9c   : > { %4774 = vmatprep.subr.bf16.mxu0 %v5086_v10  ;;  %4646 = vmatprep.subr.bf16.mxu1 %v5090_v48  ;;  %v4105_v56 = vrot.slane %v5861_v15, 9  ;;  %v1528_v7 = vrot.slane %v5667_v45, 5  ;;  %v4110_v51 = vrot.slane %v1469_v12, 9  ;;  %v1535_v28 = vrot.slane %v5704_v25, 5 }
  0x9d   : > { %4632 = vmatprep.mubr.bf16.mxu1 %v4091_v50  ;;  %v2498_v11 = vsel %vm5734_vm15, %v2496_v46, %v2497_v27  ;;  %v5102_v50 = vld [vmem:[%s6426_s3 + $0xa8] sm:$0xff]   ;;  %v1538_v16 = vrot.slane %v5712_v40, 5  ;;  %v4096_v4 = vcombine.low %v5729_v36, %v5758_v60  ;;  %v1507_v18 = vrot.slane %v5832_v8, 5  ;;  %v6062_v8 = vld [vmem:[#allocation2 + $0x20] sm:$0x1] }
  0x9e   : > { %4647 = vmatpush3.bf16.msra.mxu1 %v5090_v48  ;;  %v1531_v48 = vrot.slane %v5672_v59, 5  ;;  %v4238_v42 = vcombine.low %v2495_v31, %v2498_v11  ;;  %v1530_v9 = vrot.slane %v1528_v7, 4  ;;  %v5914_v45 = vsel %vm5734_vm15, %v4110_v51, %v1528_v7  ;;  %v5157_v31 = vld [vmem:[#allocation2 + $0x20] sm:$0x1] }
  0x9f   : > { %4775 = vmatpush3.bf16.msra.mxu0 %v5086_v10  ;;  %4648 = vmatprep.subr.bf16.mxu1 %v5094_v13  ;;  %v5896_v10 = vrot.slane %v1500_v37, 4  ;;  %v532_v40 = vsel %vm5338_vm2, 0, %v531_v17  ;;  %v4111_v46 = vrot.slane %v1470_v22, 9  ;;  %v2509_v36 = vsel %vm5734_vm15, %v4216_v49, %v2508_v35 }
  0xa0   : > { %4776 = vmatprep.subr.bf16.mxu0 %v5089_v1  ;;  %v5918_v59 = vsel %vm5734_vm15, %v1530_v9, %v1531_v48  ;;  %v2512_v27 = vsel %vm5734_vm15, %v2510_v44, %v2511_v0  ;;  %533 = vst [vmem:[#allocation2 + $0x6c] sm:$0x1] %v532_v40  ;;  %v1537_v39 = vrot.slane %v1535_v28, 4  ;;  %v5967_v53 = vsel %vm5734_vm15, %v4105_v56, %v1493_v20  ;;  %v5991_v20 = vld [vmem:[%s6426_s3 + $0x1b8] sm:$0xff]   ;;  %v1467_v44 = vld [vmem:[#allocation2 + $0x24] sm:$0xe] }
  0xa1   : > { %4633 = vmatmul.mubr.bf16.gmra.mrb[4].mxu1 %v4092_v3  ;;  %v5943_v3 = vld [vmem:[#allocation2 + $0x18] sm:$0xe]  ;;  %v497_v29 = vstv %s5960_s21  ;;  %v4240_v43 = vcombine.low %v2509_v36, %v2512_v27  ;;  %v1497_v49 = vsel %vm5734_vm15, %v5887_v57, %v1496_v55  ;;  %v6006_v0 = vsel %vm5734_vm15, %v5896_v10, %v1503_v34  ;;  %v5160_v36 = vld [vmem:[#allocation2 + $0x34] sm:$0xf] }
  0xa2   : > { %4761 = vmatmul.mubr.bf16.gmra.mrb[4].mxu0 %v4236_v23  ;;  %4649 = vmatpush3.bf16.msra.mxu1 %v5094_v13  ;;  %v2505_v23 = vsel %vm5734_vm15, %v2503_v6, %v2504_v30  ;;  %v4095_v13 = vcombine.low %v5702_v19, %v5704_v25  ;;  %v5939_v19 = vld [vmem:[%s6426_s3 + $0x1b0] sm:$0xff]   ;;  %v1542_v30 = vrot.slane %v5758_v60, 5  ;;  %v5986_v6 = vsel %vm5734_vm15, %v1537_v39, %v1538_v16  ;;  %v2966_v55 = vld [vmem:[#allocation2 + $0x18] sm:$0xf]  ;;  %v6055_v39 = vld [vmem:[#allocation2 + $0x1c] sm:$0xf] }
  0xa3   : > { %4777 = vmatpush3.bf16.msra.mxu0 %v5089_v1  ;;  %4764 = vmatprep.mubr.bf16.mxu0 %v4237_v61  ;;  %v4239_v62 = vcombine.low %v2502_v32, %v2505_v23  ;;  %v4134_v1 = vcombine.low %v5914_v45, %v5918_v59  ;;  %v5980_v61 = vsel %vm5734_vm15, %v4111_v46, %v1535_v28  ;;  %v1471_v60 = vld [vmem:[#allocation2 + $0x54] sm:$0xe]  ;;  %v4107_v52 = vrot.slane %v5943_v3, 9  ;;  %v5158_v23 = vld [vmem:[#allocation2 + $0x28] sm:$0xf] }
  0xa4   : > { %4778 = vmatprep.subr.bf16.mxu0 %v5092_v54  ;;  %4650 = vmatprep.subr.bf16.mxu1 %v5096_v2  ;;  %v4112_v14 = vrot.slane %v1471_v60, 9  ;;  %v1544_v35 = vrot.slane %v1542_v30, 4  ;;  %v1510_v11 = vrot.slane %v5157_v31, 5  ;;  %vm6022_vm1 = vcmp.eq.s32.totalorder %v497_v29, 1  ;;  %v1468_v46 = vld [vmem:[#allocation2 + $0x30] sm:$0xe] }
  0xa5   : > { %4636 = vmatprep.mubr.bf16.mxu1 %v6457_v38  ;;  %v1509_v32 = vrot.slane %v1507_v18, 4  ;;  %v1514_v10 = vrot.slane %v5158_v23, 5  ;;  %v487_v38 = vld [vmem:[%s444_s15] sm:$0xf]  ;;  %v2991_v12 = vshrl.u32 %v2966_v55, 16  ;;  %v2994_v48 = vshll.u32 %v2966_v55, 16 }
  0xa6   : > { %4651 = vmatpush3.bf16.msra.mxu1 %v5096_v2  ;;  %v6460_v2 = vld [vmem:[#allocation7_spill] sm:$0xff]  ;;  %v6015_v33 = vsel %vm5734_vm15, %v4112_v14, %v1542_v30  ;;  %v499_v9 = vsel %vm6022_vm1, 0, %v487_v38  ;;  %v1521_v27 = vrot.slane %v5160_v36, 5  ;;  %v5111_v30 = vld [vmem:[%s6426_s3 + $0x1c8] sm:$0xff]   ;;  %v2969_v29 = vld [vmem:[#allocation2 + $0x24] sm:$0xf] }
  0xa7   : > { %4779 = vmatpush3.bf16.msra.mxu0 %v5092_v54  ;;  %4652 = vmatprep.subr.bf16.mxu1 %v5100_v58  ;;  %v5973_v54 = vsel %vm5734_vm15, %v4106_v5, %v1500_v37  ;;  %v1545_v15 = vrot.slane %v6460_v2, 5  ;;  %v5107_v37 = vld [vmem:[#allocation2 + $0x18] sm:$0xff]   ;;  %v4129_v5 = vcombine.low %v5967_v53, %v1497_v49  ;;  %v815_v17 = vshrl.u32 %v499_v9, 16  ;;  %v5115_v14 = vld [vmem:[%s6426_s3 + $0xc8] sm:$0xff]   ;;  %v6112_v36 = vld [vmem:[#allocation2 + $0x34] sm:$0xf] }
  0xa8   : > { %4780 = vmatprep.subr.bf16.mxu0 %v5095_v26  ;;  %v4130_v7 = vcombine.low %v5973_v54, %v6006_v0  ;;  %v818_v22 = vshll.u32 %v499_v9, 16  ;;  %v1511_v3 = vsel %vm5734_vm15, %v1509_v32, %v1510_v11  ;;  %v1516_v40 = vrot.slane %v1514_v10, 4  ;;  %v5161_v11 = vld [vmem:[#allocation2 + $0x38] sm:$0x1]  ;;  %v6079_v23 = vld [vmem:[#allocation2 + $0x28] sm:$0xf] }
  0xa9   : > { %4637 = vmatmul.mubr.bf16.gmra.mrb[8].mxu1 %v4094_v63  ;;  %v6019_v34 = vsel %vm5734_vm15, %v1544_v35, %v1545_v15  ;;  %v488_v63 = vld [vmem:[%s444_s15 + $0x4] sm:$0xf]  ;;  %v817_v53 = vrot.slane %v815_v17, 7  ;;  %v2996_v60 = vrot.slane %v2994_v48, 5  ;;  %v835_v15 = vld [vmem:[#allocation2 + $0x6c] sm:$0xf] }
  0xaa   : > { %4765 = vmatmul.mubr.bf16.gmra.mrb[8].mxu0 %v4238_v42  ;;  %4653 = vmatpush3.bf16.msra.mxu1 %v5100_v58  ;;  %v5109_v58 = vld [vmem:[%s6426_s3 + $0xb8] sm:$0xff]   ;;  %v4136_v57 = vcombine.low %v6015_v33, %v6019_v34  ;;  %v5112_v42 = vld [vmem:[%s6426_s3 + $0xc0] sm:$0xff]   ;;  %v1523_v49 = vrot.slane %v1521_v27, 4  ;;  %v3000_v0 = vshll.u32 %v6055_v39, 16  ;;  %v4109_v31 = vrot.slane %v1468_v46, 9  ;;  %v5114_v48 = vld [vmem:[%s6426_s3 + $0x1d0] sm:$0xff]  }
  0xab   : > { %4781 = vmatpush3.bf16.msra.mxu0 %v5095_v26  ;;  %4768 = vmatprep.mubr.bf16.mxu0 %v4239_v62  ;;  %v4135_v26 = vcombine.low %v5980_v61, %v5986_v6  ;;  %v500_v62 = vsel %vm6022_vm1, 0, %v488_v63  ;;  %v1524_v55 = vrot.slane %v5161_v11, 5  ;;  %v3010_v38 = vshll.u32 %v6062_v8, 16  ;;  %v5121_v17 = vld [vmem:[%s6426_s3 + $0xd8] sm:$0xff]   ;;  %v6110_v46 = vld [vmem:[#allocation2 + $0x2c] sm:$0x1] }
  0xac   : > { %4782 = vmatprep.subr.bf16.mxu0 %v5098_v47  ;;  %4654 = vmatprep.subr.bf16.mxu1 %v5102_v50  ;;  %v823_v28 = vshrl.u32 %v500_v62, 16  ;;  %v826_v16 = vshll.u32 %v500_v62, 16  ;;  %v3015_v63 = vshrl.u32 %v2969_v29, 16  ;;  %v3024_v9 = vshll.u32 %v6079_v23, 16  ;;  %v6130_v11 = vld [vmem:[#allocation2 + $0x38] sm:$0x1] }
  0xad   : > { %4640 = vmatprep.mubr.bf16.mxu1 %v4095_v13  ;;  %v5108_v13 = vld [vmem:[%s6426_s3 + $0x1c0] sm:$0xff]   ;;  %v3028_v62 = vshrl.u32 %v6079_v23, 16  ;;  %v5126_v59 = vld [vmem:[%s6426_s3 + $0x1f0] sm:$0xff]   ;;  %v5135_v34 = vld [vmem:[#allocation2 + $0x18] sm:$0xff]   ;;  %v3440_v41 = vrot.slane %v6112_v36, 5 }
  0xae   : > { %4655 = vmatpush3.bf16.msra.mxu1 %v5102_v50  ;;  %v5159_v50 = vld [vmem:[#allocation2 + $0x2c] sm:$0x1]  ;;  %v6060_v54 = vrot.slane %v823_v28, 7  ;;  %v1525_v28 = vsel %vm5734_vm15, %v1523_v49, %v1524_v55  ;;  %v2981_v6 = vld [vmem:[#allocation2 + $0x54] sm:$0xf]  ;;  %v5131_v33 = vld [vmem:[%s6426_s3 + $0x200] sm:$0xff]  }
  0xaf   : > { %4783 = vmatpush3.bf16.msra.mxu0 %v5098_v47  ;;  %4656 = vmatprep.subr.bf16.mxu1 %v5930_v24  ;;  %v4108_v47 = vrot.slane %v1467_v44, 9  ;;  %v1517_v51 = vrot.slane %v5159_v50, 5  ;;  %v6088_v50 = vrot.slane %v3000_v0, 5  ;;  %v5125_v0 = vld [vmem:[#allocation2 + $0x60] sm:$0xff]  }
  0xb0   : > { %4784 = vmatprep.subr.bf16.mxu0 %v5939_v19 }
  0xb1   : > { %4641 = vmatmul.mubr.bf16.gmra.mrb[12].mxu1 %v4096_v4  ;;  %v1508_v4 = vsel %vm5734_vm15, %v4107_v52, %v1507_v18  ;;  %v2993_v18 = vrot.slane %v2991_v12, 4  ;;  %v1515_v2 = vsel %vm5734_vm15, %v4108_v47, %v1514_v10  ;;  %v3004_v52 = vshrl.u32 %v6055_v39, 16  ;;  %v5118_v10 = vld [vmem:[%s6426_s3 + $0xd0] sm:$0xff]  }
  0xb2   : > { %4769 = vmatmul.mubr.bf16.gmra.mrb[12].mxu0 %v4240_v43  ;;  %4657 = vmatpush3.bf16.msra.mxu1 %v5930_v24  ;;  %v5110_v24 = vld [vmem:[#allocation2 + $0x24] sm:$0xff]   ;;  %v4131_v35 = vcombine.low %v1508_v4, %v1511_v3  ;;  %v820_v43 = vor.u32 %v818_v22, %v817_v53  ;;  %v3018_v12 = vshll.u32 %v2969_v29, 16  ;;  %v1522_v22 = vsel %vm5734_vm15, %v4109_v31, %v1521_v27  ;;  %v6125_v29 = vld [vmem:[#allocation2 + $0x40] sm:$0xf] }
  0xb3   : > { %4785 = vmatpush3.bf16.msra.mxu0 %v5939_v19  ;;  %4788 = vmatprep.mubr.bf16.mxu0 %v5107_v37  ;;  %v5113_v19 = vld [vmem:[#allocation2 + $0x30] sm:$0xff]   ;;  %v821_v37 = vrot.slane %v817_v53, 4  ;;  %v6106_v4 = vrot.slane %v3015_v63, 4  ;;  %v4133_v27 = vcombine.low %v1522_v22, %v1525_v28  ;;  %v3034_v31 = vshll.u32 %v6110_v46, 16 }
  0xb4   : > { %4786 = vmatprep.subr.bf16.mxu0 %v5991_v20  ;;  %4658 = vmatprep.subr.bf16.mxu1 %v5109_v58  ;;  %v836_v32 = vsel %vm5378_vm8, %v820_v43, %v835_v15  ;;  %v6108_v3 = vrot.slane %v3018_v12, 5  ;;  %v5120_v15 = vld [vmem:[%s6426_s3 + $0x1e0] sm:$0xff]   ;;  %v3048_v43 = vshll.u32 %v6112_v36, 16  ;;  %v3072_v55 = vshll.u32 %v6125_v29, 16 }
  0xb5   : > { %4660 = vmatprep.mubr.bf16.mxu1 %v4129_v5  ;;  %837 = vst [vmem:[#allocation2 + $0x6c] sm:$0xf] %v836_v32  ;;  %v3076_v44 = vshrl.u32 %v6125_v29, 16  ;;  %v2978_v32 = vld [vmem:[#allocation2 + $0x48] sm:$0xf] }
  0xb6   : > { %4659 = vmatpush3.bf16.msra.mxu1 %v5109_v58  ;;  %v828_v58 = vor.u32 %v826_v16, %v6060_v54  ;;  %v3021_v5 = vor.u32 %v6108_v3, %v6106_v4  ;;  %v6141_v63 = vrot.slane %v3048_v43, 5  ;;  %v6163_v3 = vrot.slane %v3072_v55, 5  ;;  %v5129_v43 = vld [vmem:[%s6426_s3 + $0x1f8] sm:$0xff]  }
  0xb7   : > { %4787 = vmatpush3.bf16.msra.mxu0 %v5991_v20  ;;  %4676 = vmatprep.subr.bf16.mxu1 %v5112_v42  ;;  %v1518_v20 = vsel %vm5734_vm15, %v1516_v40, %v1517_v51  ;;  %v3006_v51 = vrot.slane %v3004_v52, 4  ;;  %v2972_v40 = vld [vmem:[#allocation2 + $0x30] sm:$0xf]  ;;  %v3078_v45 = vrot.slane %v3076_v44, 4  ;;  %v6194_v55 = vld [vmem:[#allocation2 + $0x58] sm:$0xf] }
  0xb8   : > { %4804 = vmatprep.subr.bf16.mxu0 %v5108_v13  ;;  %v829_v56 = vsel %vm5365_vm7, %v821_v37, %v828_v58  ;;  %v4132_v47 = vcombine.low %v1515_v2, %v1518_v20  ;;  %v2975_v2 = vld [vmem:[#allocation2 + $0x3c] sm:$0xf]  ;;  %v3052_v37 = vshrl.u32 %v6112_v36, 16  ;;  %v5122_v58 = vld [vmem:[#allocation2 + $0x54] sm:$0xff]  }
  0xb9   : > { %4661 = vmatmul.mubr.bf16.vlgmr.msra.gmra.mrb[0].mxu1 %v4130_v7  ;;  %838 = vst [vmem:[#allocation2 + $0x70] sm:$0xf] %v829_v56  ;;  %v2997_v7 = vor.u32 %v2996_v60, %v2993_v18  ;;  %v3007_v53 = vor.u32 %v3006_v51, %v6088_v50  ;;  %v6118_v18 = vrot.slane %v3024_v9, 5  ;;  %v6120_v60 = vrot.slane %v3028_v62, 4  ;;  %v5123_v56 = vld [vmem:[%s6426_s3 + $0x1e8] sm:$0xff]  }
  0xba   : > { %4789 = vmatmul.mubr.bf16.vlgmr.msra.gmra.mrb[0].mxu0 %v5110_v24  ;;  %4677 = vmatpush3.bf16.msra.mxu1 %v5112_v42  ;;  %v5116_v42 = vld [vmem:[#allocation2 + $0x3c] sm:$0xff]   ;;  %v5119_v24 = vld [vmem:[#allocation2 + $0x48] sm:$0xff]   ;;  %v3063_v20 = vshrl.u32 %v2975_v2, 16  ;;  %v3066_v49 = vshll.u32 %v2975_v2, 16  ;;  %v3054_v12 = vrot.slane %v3052_v37, 4  ;;  %v3079_v61 = vor.u32 %v3078_v45, %v6163_v3 }
  0xbb   : > { %4805 = vmatpush3.bf16.msra.mxu0 %v5108_v13  ;;  %4792 = vmatprep.mubr.bf16.mxu0 %v5113_v19  ;;  %v5117_v13 = vld [vmem:[%s6426_s3 + $0x1d8] sm:$0xff]   ;;  %v6102_v16 = vrot.slane %v2997_v7, 4  ;;  %v6104_v19 = vrot.slane %v3010_v38, 5  ;;  %v3008_v52 = vrot.slane %v3007_v53, 4  ;;  %v6149_v51 = vld [vmem:[#allocation2 + $0x44] sm:$0x1] }
  0xbc   : > { %4806 = vmatprep.subr.bf16.mxu0 %v5111_v30  ;;  %4678 = vmatprep.subr.bf16.mxu1 %v5115_v14  ;;  %v3065_v9 = vrot.slane %v3063_v20, 4  ;;  %v3068_v62 = vrot.slane %v3066_v49, 5  ;;  %v6177_v53 = vld [vmem:[#allocation2 + $0x50] sm:$0x1] }
  0xbd   : > { %4664 = vmatprep.mubr.bf16.mxu1 %v4131_v35  ;;  %v3042_v35 = vshll.u32 %v2972_v40, 16  ;;  %v3003_v28 = vsel %vm5434_vm12, %v6102_v16, %v6088_v50  ;;  %v3013_v4 = vsel %vm5434_vm12, %v3008_v52, %v6104_v19  ;;  %v3055_v16 = vor.u32 %v3054_v12, %v6141_v63 }
  0xbe   : > { %4679 = vmatpush3.bf16.msra.mxu1 %v5115_v14  ;;  %v3039_v14 = vshrl.u32 %v2972_v40, 16  ;;  %v6171_v40 = vrot.slane %v3034_v31, 5  ;;  %v3082_v19 = vshll.u32 %v6149_v51, 16  ;;  %v4297_v37 = vcombine.low %v3003_v28, %v3013_v4 }
  0xbf   : > { %4807 = vmatpush3.bf16.msra.mxu0 %v5111_v30  ;;  %4680 = vmatprep.subr.bf16.mxu1 %v5118_v10  ;;  %v5124_v30 = vld [vmem:[%s6426_s3 + $0xe0] sm:$0xff]   ;;  %v3044_v38 = vrot.slane %v3042_v35, 5  ;;  %v3069_v49 = vor.u32 %v3068_v62, %v3065_v9  ;;  %v3106_v31 = vshll.u32 %v6177_v53, 16  ;;  %v3120_v9 = vshll.u32 %v6194_v55, 16 }
  0xc0   : > { %4808 = vmatprep.subr.bf16.mxu0 %v5114_v48  ;;  %v3041_v7 = vrot.slane %v3039_v14, 4  ;;  %v5128_v35 = vld [vmem:[#allocation2 + $0x6c] sm:$0xff]   ;;  %v6191_v52 = vrot.slane %v3082_v19, 5  ;;  %v3124_v62 = vshrl.u32 %v6194_v55, 16 }
  0xc1   : > { %4665 = vmatmul.mubr.bf16.gmra.mrb[4].mxu1 %v4132_v47  ;;  %v3058_v47 = vshll.u32 %v6130_v11, 16 }
  0xc2   : > { %4793 = vmatmul.mubr.bf16.gmra.mrb[4].mxu0 %v5116_v42  ;;  %4681 = vmatpush3.bf16.msra.mxu1 %v5118_v10  ;;  %v6139_v10 = vld [vmem:[#allocation2 + $0x4c] sm:$0xf]  ;;  %v3031_v42 = vor.u32 %v6120_v60, %v6118_v18  ;;  %v3045_v50 = vor.u32 %v3044_v38, %v3041_v7 }
  0xc3   : > { %4809 = vmatpush3.bf16.msra.mxu0 %v5114_v48  ;;  %4796 = vmatprep.mubr.bf16.mxu0 %v5119_v24  ;;  %v5127_v48 = vld [vmem:[%s6426_s3 + $0xe8] sm:$0xff]   ;;  %v3090_v24 = vshll.u32 %v2978_v32, 16  ;;  %v3100_v22 = vshrl.u32 %v6139_v10, 16  ;;  %v3060_v20 = vrot.slane %v3058_v47, 5  ;;  %v6211_v47 = vrot.slane %v3079_v61, 4 }
  0xc4   : > { %4810 = vmatprep.subr.bf16.mxu0 %v5117_v13  ;;  %4682 = vmatprep.subr.bf16.mxu1 %v5121_v17  ;;  %v5133_v7 = vld [vmem:[#allocation2 + $0xc] sm:$0xff]  }
  0xc5   : > { %4668 = vmatprep.mubr.bf16.mxu1 %v4133_v27  ;;  %v6175_v27 = vrot.slane %v3021_v5, 4  ;;  %v3092_v2 = vrot.slane %v3090_v24, 5  ;;  %v3102_v14 = vrot.slane %v3100_v22, 4  ;;  %v2987_v61 = vld [vmem:[#allocation2 + $0x6c] sm:$0xf] }
  0xc6   : > { %4683 = vmatpush3.bf16.msra.mxu1 %v5121_v17  ;;  %v3096_v17 = vshll.u32 %v6139_v10, 16 }
  0xc7   : > { %4811 = vmatpush3.bf16.msra.mxu0 %v5117_v13  ;;  %4684 = vmatprep.subr.bf16.mxu1 %v5124_v30  ;;  %v3087_v13 = vshrl.u32 %v2978_v32, 16  ;;  %v3027_v44 = vsel %vm5434_vm12, %v6175_v27, %v6118_v18  ;;  %v6203_v32 = vld [vmem:[#allocation2 + $0x64] sm:$0xf]  ;;  %v6209_v18 = vrot.slane %v3069_v49, 4 }
  0xc8   : > { %4812 = vmatprep.subr.bf16.mxu0 %v5120_v15  ;;  %v3144_v22 = vshll.u32 %v6203_v32, 16  ;;  %v3148_v45 = vshrl.u32 %v6203_v32, 16 }
  0xc9   : > { %4669 = vmatmul.mubr.bf16.gmra.mrb[8].mxu1 %v4134_v1  ;;  %v5130_v1 = vld [vmem:[%s6426_s3 + $0xf0] sm:$0xff]   ;;  %v3089_v60 = vrot.slane %v3087_v13, 4 }
  0xca   : > { %4797 = vmatmul.mubr.bf16.gmra.mrb[8].mxu0 %v5122_v58  ;;  %4685 = vmatpush3.bf16.msra.mxu1 %v5124_v30  ;;  %v3032_v30 = vrot.slane %v3031_v42, 4  ;;  %v5132_v58 = vld [vmem:[%s6426_s3 + $0xf8] sm:$0xff]   ;;  %v3114_v42 = vshll.u32 %v2981_v6, 16  ;;  %v563_v13 = vld [vmem:[#allocation2 + $0x74] sm:$0x1]  ;;  %v3150_v49 = vrot.slane %v3148_v45, 4 }
  0xcb   : > { %4813 = vmatpush3.bf16.msra.mxu0 %v5120_v15  ;;  %4800 = vmatprep.mubr.bf16.mxu0 %v5125_v0  ;;  %v6182_v15 = vrot.slane %v3096_v17, 5  ;;  %v3056_v0 = vrot.slane %v3055_v16, 4  ;;  %v3093_v38 = vor.u32 %v3092_v2, %v3089_v60  ;;  %v3126_v60 = vrot.slane %v3124_v62, 4  ;;  %v5139_v62 = vld [vmem:[#allocation2 + $0x30] sm:$0xff]   ;;  %v5138_v45 = vld [vmem:[%s6426_s3 + $0x218] sm:$0xff]  }
  0xcc   : > { %4814 = vmatprep.subr.bf16.mxu0 %v5123_v56  ;;  %4686 = vmatprep.subr.bf16.mxu1 %v5127_v48  ;;  %v3037_v5 = vsel %vm5434_vm12, %v3032_v30, %v6171_v40  ;;  %v3116_v19 = vrot.slane %v3114_v42, 5  ;;  %v6232_v30 = vrot.slane %v3120_v9, 5 }
  0xcd   : > { %4672 = vmatprep.mubr.bf16.mxu1 %v4135_v26  ;;  %v3046_v26 = vrot.slane %v3045_v50, 4  ;;  %v3103_v12 = vor.u32 %v3102_v14, %v6182_v15  ;;  %v3061_v4 = vsel %vm5434_vm12, %v3056_v0, %v3060_v20  ;;  %v3094_v40 = vrot.slane %v3093_v38, 4  ;;  %v6234_v14 = vld [vmem:[#allocation2 + $0x5c] sm:$0x1]  ;;  %v5137_v0 = vld [vmem:[#allocation2 + $0x24] sm:$0xff]  }
  0xce   : > { %4687 = vmatpush3.bf16.msra.mxu1 %v5127_v48  ;;  %v3111_v48 = vshrl.u32 %v2981_v6, 16  ;;  %v4298_v27 = vcombine.low %v3027_v44, %v3037_v5  ;;  %v6236_v20 = vrot.slane %v3144_v22, 5  ;;  %v830_v6 = vrot.slane %v6060_v54, 4  ;;  %v6252_v44 = vld [vmem:[#allocation2 + $0x68] sm:$0x1] }
  0xcf   : > { %4815 = vmatpush3.bf16.msra.mxu0 %v5123_v56  ;;  %4688 = vmatprep.subr.bf16.mxu1 %v5130_v1  ;;  %v2984_v56 = vld [vmem:[#allocation2 + $0x60] sm:$0xf]  ;;  %v3051_v28 = vsel %vm5434_vm12, %v3046_v26, %v6141_v63  ;;  %v3104_v50 = vrot.slane %v3103_v12, 4  ;;  %v5134_v63 = vld [vmem:[%s6426_s3 + $0x208] sm:$0xff]   ;;  %v3085_v26 = vsel %vm5434_vm12, %v6211_v47, %v6191_v52  ;;  %v3159_v52 = vshrl.u32 %v2987_v61, 16  ;;  %v5136_v12 = vld [vmem:[%s6426_s3 + $0x210] sm:$0xff]  }
  0xd0   : > { %4816 = vmatprep.subr.bf16.mxu0 %v5126_v59  ;;  %v3135_v24 = vshrl.u32 %v2984_v56, 16  ;;  %v3138_v17 = vshll.u32 %v2984_v56, 16  ;;  %v3113_v16 = vrot.slane %v3111_v48, 4  ;;  %v4299_v2 = vcombine.low %v3051_v28, %v3061_v4 }
  0xd1   : > { %4673 = vmatmul.mubr.bf16.gmra.mrb[12].mxu1 %v4136_v57  ;;  %v6218_v57 = vrot.slane %v3106_v31, 5  ;;  %v3099_v31 = vsel %vm5434_vm12, %v3094_v40, %v6182_v15  ;;  %v3130_v56 = vshll.u32 %v6234_v14, 16  ;;  %v3151_v42 = vor.u32 %v3150_v49, %v6236_v20  ;;  %v5141_v40 = vld [vmem:[#allocation2 + $0x3c] sm:$0xff]   ;;  %v3392_v49 = vld [vmem:[#allocation2 + $0x18] sm:$0xe] }
  0xd2   : > { %4801 = vmatmul.mubr.bf16.gmra.mrb[12].mxu0 %v5128_v35  ;;  %4689 = vmatpush3.bf16.msra.mxu1 %v5130_v1  ;;  %v564_v1 = vsel %vm5346_vm4, 0, %v563_v13  ;;  %v3137_v35 = vrot.slane %v3135_v24, 4  ;;  %v3117_v5 = vor.u32 %v3116_v19, %v3113_v16 }
  0xd3   : > { %4817 = vmatpush3.bf16.msra.mxu0 %v5126_v59  ;;  %4820 = vmatprep.mubr.bf16.mxu0 %v4297_v37  ;;  %565 = vst [vmem:[#allocation2 + $0x74] sm:$0x1] %v564_v1  ;;  %v3140_v37 = vrot.slane %v3138_v17, 5  ;;  %v3109_v54 = vsel %vm5434_vm12, %v3104_v50, %v6218_v57  ;;  %v3132_v24 = vrot.slane %v3130_v56, 5  ;;  %v3161_v17 = vrot.slane %v3159_v52, 4 }
  0xd4   : > { %4818 = vmatprep.subr.bf16.mxu0 %v5129_v43  ;;  %4690 = vmatprep.subr.bf16.mxu1 %v5132_v58  ;;  %v3152_v59 = vrot.slane %v3151_v42, 4  ;;  %v3429_v52 = vrot.slane %v6062_v8, 5 }
  0xd5   : > { %4692 = vmatprep.mubr.bf16.mxu1 %v5133_v7  ;;  %v3162_v7 = vshll.u32 %v2987_v61, 16  ;;  %v3141_v48 = vor.u32 %v3140_v37, %v3137_v35  ;;  %v5143_v35 = vld [vmem:[#allocation2 + $0x48] sm:$0xff]  }
  0xd6   : > { %4691 = vmatpush3.bf16.msra.mxu1 %v5132_v58  ;;  %v6238_v58 = vld [vmem:[#allocation2 + $0x70] sm:$0xf] }
  0xd7   : > { %4819 = vmatpush3.bf16.msra.mxu0 %v5129_v43  ;;  %4868 = vmatprep.subr.bf16.mxu1 %v5131_v33  ;;  %v3075_v43 = vsel %vm5434_vm12, %v6209_v18, %v6163_v3  ;;  %v3127_v3 = vor.u32 %v3126_v60, %v6232_v30  ;;  %v3168_v38 = vshll.u32 %v6238_v58, 16  ;;  %v3172_v15 = vshrl.u32 %v6238_v58, 16 }
  0xd8   : > { %4836 = vmatprep.subr.bf16.mxu0 %v5131_v33  ;;  %v3154_v18 = vshll.u32 %v6252_v44, 16  ;;  %v4300_v9 = vcombine.low %v3075_v43, %v3085_v26  ;;  %v3164_v22 = vrot.slane %v3162_v7, 5  ;;  %v3142_v25 = vrot.slane %v3141_v48, 4 }
  0xd9   : > { %4693 = vmatmul.mubr.bf16.vlgmr.msra.gmra.mrb[0].mxu1 %v5135_v34  ;;  %v3118_v34 = vrot.slane %v3117_v5, 4  ;;  %v3128_v57 = vrot.slane %v3127_v3, 4  ;;  %v6268_v28 = vrot.slane %v3168_v38, 5  ;;  %v3174_v4 = vrot.slane %v3172_v15, 4  ;;  %v3393_v38 = vld [vmem:[#allocation2 + $0x24] sm:$0xe] }
  0xda   : > { %4821 = vmatmul.mubr.bf16.vlgmr.msra.gmra.mrb[0].mxu0 %v4298_v27  ;;  %4876 = vmatpush3.bf16.msra.mxu1 %v5131_v33  ;;  %v839_v47 = vld [vmem:[#allocation2 + $0x74] sm:$0x1]  ;;  %v3156_v1 = vrot.slane %v3154_v18, 5  ;;  %v3165_v19 = vor.u32 %v3164_v22, %v3161_v17  ;;  %v3147_v60 = vsel %vm5434_vm12, %v3142_v25, %v6236_v20  ;;  %v3454_v43 = vrot.slane %v6139_v10, 5 }
  0xdb   : > { %4837 = vmatpush3.bf16.msra.mxu0 %v5131_v33  ;;  %4824 = vmatprep.mubr.bf16.mxu0 %v4299_v2  ;;  %v840_v13 = vsel %vm5338_vm2, %v830_v6, %v839_v47  ;;  %v4301_v33 = vcombine.low %v3099_v31, %v3109_v54  ;;  %v3123_v50 = vsel %vm5434_vm12, %v3118_v34, %v6232_v30  ;;  %v3426_v2 = vrot.slane %v6055_v39, 5  ;;  %v3396_v54 = vld [vmem:[#allocation2 + $0x48] sm:$0xe]  ;;  %v5145_v10 = vld [vmem:[#allocation2 + $0x54] sm:$0xff]   ;;  %v5147_v34 = vld [vmem:[#allocation2 + $0x60] sm:$0xff]  }
  0xdc   : > { %4838 = vmatprep.subr.bf16.mxu0 %v5134_v63  ;;  %4869 = vmatprep.subr.bf16.mxu1 %v5134_v63  ;;  %841 = vst [vmem:[#allocation2 + $0x74] sm:$0x1] %v840_v13  ;;  %v3133_v16 = vsel %vm5434_vm12, %v3128_v57, %v3132_v24  ;;  %v3175_v27 = vor.u32 %v3174_v4, %v6268_v28  ;;  %v3461_v26 = vrot.slane %v6194_v55, 5  ;;  %v5142_v39 = vld [vmem:[%s6426_s3 + $0x228] sm:$0xff]   ;;  %v4313_v3 = vrot.slane %v3392_v49, 9 }
  0xdd   : > { %4696 = vmatprep.mubr.bf16.mxu1 %v5137_v0  ;;  %v3157_v30 = vsel %vm5434_vm12, %v3152_v59, %v3156_v1  ;;  %v4302_v61 = vcombine.low %v3123_v50, %v3133_v16  ;;  %v3166_v0 = vrot.slane %v3165_v19, 4  ;;  %v3428_v56 = vrot.slane %v3426_v2, 4  ;;  %v3394_v24 = vld [vmem:[#allocation2 + $0x30] sm:$0xe] }
  0xde   : > { %4877 = vmatpush3.bf16.msra.mxu1 %v5134_v63  ;;  %v4303_v20 = vcombine.low %v3147_v60, %v3157_v30  ;;  %v3176_v31 = vrot.slane %v3175_v27, 4  ;;  %v3433_v7 = vrot.slane %v6079_v23, 5  ;;  %v4317_v15 = vrot.slane %v3396_v54, 9  ;;  %v3397_v23 = vld [vmem:[#allocation2 + $0x54] sm:$0xe] }
  0xdf   : > { %4839 = vmatpush3.bf16.msra.mxu0 %v5134_v63  ;;  %4870 = vmatprep.subr.bf16.mxu1 %v5136_v12  ;;  %v5140_v63 = vld [vmem:[%s6426_s3 + $0x220] sm:$0xff]   ;;  %v3457_v48 = vrot.slane %v6177_v53, 5  ;;  %v3463_v42 = vrot.slane %v3461_v26, 4  ;;  %v3171_v8 = vsel %vm5434_vm12, %v3166_v0, %v6268_v28  ;;  %v3468_v47 = vrot.slane %v6203_v32, 5  ;;  %v5144_v53 = vld [vmem:[%s6426_s3 + $0x230] sm:$0xff]  }
  0xe0   : > { %4840 = vmatprep.subr.bf16.mxu0 %v5136_v12  ;;  %v3430_v13 = vsel %vm5734_vm15, %v3428_v56, %v3429_v52  ;;  %v4314_v32 = vrot.slane %v3393_v38, 9  ;;  %v3435_v57 = vrot.slane %v3433_v7, 4  ;;  %v3455_v22 = vsel %vm5734_vm15, %v4317_v15, %v3454_v43 }
  0xe1   : > { %4697 = vmatmul.mubr.bf16.gmra.mrb[4].mxu1 %v5139_v62  ;;  %v3427_v62 = vsel %vm5734_vm15, %v4313_v3, %v3426_v2  ;;  %v4318_v4 = vrot.slane %v3397_v23, 9  ;;  %v3470_v25 = vrot.slane %v3468_v47, 4  ;;  %v3471_v59 = vrot.slane %v6252_v44, 5 }
  0xe2   : > { %4825 = vmatmul.mubr.bf16.gmra.mrb[4].mxu0 %v4300_v9  ;;  %4878 = vmatpush3.bf16.msra.mxu1 %v5136_v12  ;;  %v3464_v9 = vrot.slane %v6234_v14, 5  ;;  %v3436_v14 = vrot.slane %v6110_v46, 5  ;;  %v4337_v36 = vcombine.low %v3427_v62, %v3430_v13  ;;  %v5146_v46 = vld [vmem:[%s6426_s3 + $0x238] sm:$0xff]   ;;  %v4315_v1 = vrot.slane %v3394_v24, 9 }
  0xe3   : > { %4841 = vmatpush3.bf16.msra.mxu0 %v5136_v12  ;;  %4828 = vmatprep.mubr.bf16.mxu0 %v4301_v33  ;;  %v6288_v37 = vld [vmem:[#allocation2 + $0x74] sm:$0x1]  ;;  %v3456_v12 = vrot.slane %v3454_v43, 4  ;;  %v3398_v33 = vld [vmem:[#allocation2 + $0x60] sm:$0xe]  ;;  %v3443_v50 = vrot.slane %v6130_v11, 5  ;;  %v3434_v27 = vsel %vm5734_vm15, %v4314_v32, %v3433_v7  ;;  %v3472_v2 = vsel %vm5734_vm15, %v3470_v25, %v3471_v59 }
  0xe4   : > { %4842 = vmatprep.subr.bf16.mxu0 %v5138_v45  ;;  %4871 = vmatprep.subr.bf16.mxu1 %v5138_v45  ;;  %v3178_v6 = vshll.u32 %v6288_v37, 16  ;;  %v3465_v19 = vsel %vm5734_vm15, %v3463_v42, %v3464_v9  ;;  %v3437_v44 = vsel %vm5734_vm15, %v3435_v57, %v3436_v14  ;;  %v3475_v11 = vrot.slane %v6238_v58, 5  ;;  %v3395_v58 = vld [vmem:[#allocation2 + $0x3c] sm:$0xe] }
  0xe5   : > { %4700 = vmatprep.mubr.bf16.mxu1 %v5141_v40  ;;  %v3458_v28 = vsel %vm5734_vm15, %v3456_v12, %v3457_v48  ;;  %v3442_v40 = vrot.slane %v3440_v41, 4  ;;  %v3447_v60 = vrot.slane %v6125_v29, 5  ;;  %v3441_v55 = vsel %vm5734_vm15, %v4315_v1, %v3440_v41 }
  0xe6   : > { %4879 = vmatpush3.bf16.msra.mxu1 %v5138_v45  ;;  %v3180_v5 = vrot.slane %v3178_v6, 5  ;;  %v4341_v16 = vcombine.low %v3455_v22, %v3458_v28 }
  0xe7   : > { %4843 = vmatpush3.bf16.msra.mxu0 %v5138_v45  ;;  %4872 = vmatprep.subr.bf16.mxu1 %v5140_v63  ;;  %v4319_v45 = vrot.slane %v3398_v33, 9  ;;  %v3444_v49 = vsel %vm5734_vm15, %v3442_v40, %v3443_v50  ;;  %v3449_v54 = vrot.slane %v3447_v60, 4 }
  0xe8   : > { %4844 = vmatprep.subr.bf16.mxu0 %v5140_v63  ;;  %v3181_v18 = vsel %vm5434_vm12, %v3176_v31, %v3180_v5  ;;  %v4339_v0 = vcombine.low %v3441_v55, %v3444_v49  ;;  %v4316_v31 = vrot.slane %v3395_v58, 9 }
  0xe9   : > { %4701 = vmatmul.mubr.bf16.gmra.mrb[8].mxu1 %v5143_v35  ;;  %v4304_v17 = vcombine.low %v3171_v8, %v3181_v18  ;;  %v3469_v30 = vsel %vm5734_vm15, %v4319_v45, %v3468_v47  ;;  %v3399_v35 = vld [vmem:[#allocation2 + $0x6c] sm:$0xe] }
  0xea   : > { %4829 = vmatmul.mubr.bf16.gmra.mrb[8].mxu0 %v4302_v61  ;;  %4880 = vmatpush3.bf16.msra.mxu1 %v5140_v63  ;;  %v4338_v61 = vcombine.low %v3434_v27, %v3437_v44  ;;  %v4343_v29 = vcombine.low %v3469_v30, %v3472_v2  ;;  %v4320_v43 = vrot.slane %v3399_v35, 9  ;;  %v3448_v56 = vsel %vm5734_vm15, %v4316_v31, %v3447_v60 }
  0xeb   : > { %4845 = vmatpush3.bf16.msra.mxu0 %v5140_v63  ;;  %4832 = vmatprep.mubr.bf16.mxu0 %v4303_v20  ;;  %v3462_v63 = vsel %vm5734_vm15, %v4318_v4, %v3461_v26  ;;  %v3477_v26 = vrot.slane %v3475_v11, 4  ;;  %v3478_v20 = vrot.slane %v6288_v37, 5 }
  0xec   : > { %4846 = vmatprep.subr.bf16.mxu0 %v5142_v39  ;;  %4873 = vmatprep.subr.bf16.mxu1 %v5142_v39  ;;  %v4342_v6 = vcombine.low %v3462_v63, %v3465_v19  ;;  %v3476_v5 = vsel %vm5734_vm15, %v4320_v43, %v3475_v11 }
  0xed   : > { %4704 = vmatprep.mubr.bf16.mxu1 %v5145_v10  ;;  %v3479_v3 = vsel %vm5734_vm15, %v3477_v26, %v3478_v20 }
  0xee   : > { %4881 = vmatpush3.bf16.msra.mxu1 %v5142_v39  ;;  %v4344_v52 = vcombine.low %v3476_v5, %v3479_v3 }
  0xef   : > { %4847 = vmatpush3.bf16.msra.mxu0 %v5142_v39  ;;  %4874 = vmatprep.subr.bf16.mxu1 %v5144_v53  ;;  %v3450_v39 = vrot.slane %v6149_v51, 5 }
  0xf0   : > { %4848 = vmatprep.subr.bf16.mxu0 %v5144_v53 }
  0xf1   : > { %4705 = vmatmul.mubr.bf16.gmra.mrb[12].mxu1 %v5147_v34  ;;  %v3451_v37 = vsel %vm5734_vm15, %v3449_v54, %v3450_v39 }
  0xf2   : > { %4833 = vmatmul.mubr.bf16.gmra.mrb[12].mxu0 %v4304_v17  ;;  %4882 = vmatpush3.bf16.msra.mxu1 %v5144_v53  ;;  %v4340_v10 = vcombine.low %v3448_v56, %v3451_v37 }
  0xf3   : > { %4849 = vmatpush3.bf16.msra.mxu0 %v5144_v53  ;;  %4852 = vmatprep.mubr.bf16.mxu0 %v4337_v36 }
  0xf4   : > { %4850 = vmatprep.subr.bf16.mxu0 %v5146_v46  ;;  %4875 = vmatprep.subr.bf16.mxu1 %v5146_v46 }
  0xf5   : > { %4860 = vmatprep.mubr.bf16.mxu1 %v4341_v16 }
  0xf6   : > { %4883 = vmatpush3.bf16.msra.mxu1 %v5146_v46 }
  0xf7   : > { %4851 = vmatpush3.bf16.msra.mxu0 %v5146_v46 }
  0xf9   : > { %4861 = vmatmul.mubr.bf16.vlgmr.msra.gmra.mrb[16].mxu1 %v4342_v6 }
  0xfa   : > { %4853 = vmatmul.mubr.bf16.vlgmr.msra.gmra.mrb[0].mxu0 %v4338_v61  ;;  %4864 = vmatprep.mubr.bf16.mxu1 %v4343_v29 }
  0xfb   : > { %4856 = vmatprep.mubr.bf16.mxu0 %v4339_v0 }
 0x101   : > { %4865 = vmatmul.mubr.bf16.gmra.mrb[20].mxu1 %v4344_v52 }
 0x102   : > { %4857 = vmatmul.mubr.bf16.gmra.mrb[4].mxu0 %v4340_v10 }
 0x1ac   : > { %v4694_v51 = vpop.f32.mrb[0].mxu1 }
 0x1ad   : > { %v1920_v7 = vpop.f32.mrb[1].mxu1 }
 0x1ae   : > { %v4695_v38 = vpop.f32.mrb[2].mxu1 }
 0x1af   : > { %v1923_v15 = vpop.f32.mrb[3].mxu1 }
 0x1b4   : > { %v6356_v12 = vpop.f32.mrb[4].mxu1 }
 0x1b5   : > { %v6358_v48 = vpop.f32.mrb[5].mxu1 }
 0x1b6   : > { %v6360_v42 = vpop.f32.mrb[6].mxu1 }
 0x1b7   : > { %v6362_v8 = vpop.f32.mrb[7].mxu1 }
 0x1bc   : > { %v4702_v18 = vpop.f32.mrb[8].mxu1 }
 0x1bd   : > { %v4830_v23 = vpop.f32.mrb[8].mxu0  ;;  %v1952_v21 = vpop.f32.mrb[9].mxu1 }
 0x1be   : > { %v3345_v47 = vpop.f32.mrb[9].mxu0  ;;  %v4892_v9 = vadd.f32 %v4830_v23, %v4702_v18  ;;  %v4703_v53 = vpop.f32.mrb[10].mxu1 }
 0x1bf   : > { %v4831_v62 = vpop.f32.mrb[10].mxu0  ;;  %v4894_v13 = vadd.f32 %v3345_v47, %v1952_v21  ;;  %v1955_v41 = vpop.f32.mrb[11].mxu1 }
 0x1c0   : > { %v3348_v33 = vpop.f32.mrb[11].mxu0  ;;  %v4896_v34 = vadd.f32 %v4831_v62, %v4703_v53 }
 0x1c1   : > { %v4898_v32 = vadd.f32 %v3348_v33, %v1955_v41 }
 0x1c4   : > { %v4706_v57 = vpop.f32.mrb[12].mxu1 }
 0x1c5   : > { %v4834_v14 = vpop.f32.mrb[12].mxu0  ;;  %v1968_v24 = vpop.f32.mrb[13].mxu1 }
 0x1c6   : > { %v3361_v17 = vpop.f32.mrb[13].mxu0  ;;  %v4900_v22 = vadd.f32 %v4834_v14, %v4706_v57  ;;  %v4707_v28 = vpop.f32.mrb[14].mxu1 }
 0x1c7   : > { %v4835_v4 = vpop.f32.mrb[14].mxu0  ;;  %v4902_v36 = vadd.f32 %v3361_v17, %v1968_v24  ;;  %v1971_v45 = vpop.f32.mrb[15].mxu1 }
 0x1c8   : > { %v3364_v25 = vpop.f32.mrb[15].mxu0  ;;  %v4904_v59 = vadd.f32 %v4835_v4, %v4707_v28 }
 0x1c9   : > { %v4906_v46 = vadd.f32 %v3364_v25, %v1971_v45 }
 0x1cc   : > { %v4862_v1 = vpop.f32.mrb[16].mxu1 }
 0x1cd   : > { %v4854_v40 = vpop.f32.mrb[0].mxu0  ;;  %v6364_v50 = vadd.f32 %v4892_v9, %v4862_v1  ;;  %v3643_v16 = vpop.f32.mrb[17].mxu1 }
 0x1ce   : > { %v4884_v19 = vadd.f32 %v4854_v40, %v4694_v51  ;;  %v3611_v27 = vpop.f32.mrb[1].mxu0  ;;  %v6366_v44 = vadd.f32 %v4894_v13, %v3643_v16  ;;  %v4863_v63 = vpop.f32.mrb[18].mxu1 }
 0x1cf   : > { %v4885_v11 = vadd.f32 %v3611_v27, %v1920_v7  ;;  %v4855_v60 = vpop.f32.mrb[2].mxu0  ;;  %v6368_v30 = vadd.f32 %v4896_v34, %v4863_v63  ;;  %v3646_v2 = vpop.f32.mrb[19].mxu1 }
 0x1d0   : > { %v4886_v35 = vadd.f32 %v4855_v60, %v4695_v38  ;;  %v3614_v55 = vpop.f32.mrb[3].mxu0  ;;  %v4899_v49 = vadd.f32 %v4898_v32, %v3646_v2  ;;  %v3793_v54 = vmul.f32 %v4884_v19, %v4884_v19 }
 0x1d1   : > { %v4887_v58 = vadd.f32 %v3614_v55, %v1923_v15  ;;  %v4417_v61 = vpack.c.bf16 %v6368_v30, %v6364_v50  ;;  %v3791_v43 = vmul.f32 %v4885_v11, %v4885_v11 }
 0x1d2   : > { %v4397_v6 = vpack.c.bf16 %v4886_v35, %v4884_v19  ;;  %v4412_v29 = vpack.c.bf16 %v4899_v49, %v6366_v44  ;;  %v3794_v38 = vmul.f32 %v4886_v35, %v4886_v35  ;;  %v3800_v40 = vmul.f32 %v4899_v49, %v4899_v49 }
 0x1d3   : > { %v4392_v26 = vpack.c.bf16 %v4887_v58, %v4885_v11  ;;  %v3770_v20 = vadd.f32 %v4887_v58, %v4885_v11  ;;  %v3792_v0 = vmul.f32 %v4887_v58, %v4887_v58  ;;  %4433 = vst [vmem:[%s6375_s17 + $0x28] sm:$0xff] %v4417_v61   ;;  %v3802_v11 = vmul.f32 %v6368_v30, %v6368_v30 }
 0x1d4   : > { %4429 = vst [vmem:[%s6375_s17 + $0x8] sm:$0xff] %v4397_v6   ;;  %4432 = vst [vmem:[%s6375_s17 + $0x20] sm:$0xff] %v4412_v29   ;;  %v4866_v31 = vpop.f32.mrb[20].mxu1 }
 0x1d5   : > { %4393 = vst [vmem:[%s6375_s17] sm:$0xff] %v4392_v26   ;;  %v3771_v39 = vadd.f32 %v4884_v19, %v3770_v20  ;;  %v3807_v5 = vadd.f32 %v3792_v0, %v3791_v43  ;;  %v4858_v3 = vpop.f32.mrb[4].mxu0  ;;  %v4901_v56 = vadd.f32 %v4900_v22, %v4866_v31  ;;  %v3659_v37 = vpop.f32.mrb[21].mxu1 }
 0x1d6   : > { %v4888_v52 = vadd.f32 %v4858_v3, %v6356_v12  ;;  %v3627_v10 = vpop.f32.mrb[5].mxu0  ;;  %v4903_v51 = vadd.f32 %v4902_v36, %v3659_v37  ;;  %v4867_v7 = vpop.f32.mrb[22].mxu1 }
 0x1d7   : > { %v3808_v15 = vadd.f32 %v3807_v5, %v3793_v54  ;;  %v4889_v18 = vadd.f32 %v3627_v10, %v6358_v48  ;;  %v3772_v23 = vadd.f32 %v4886_v35, %v3771_v39  ;;  %v4859_v21 = vpop.f32.mrb[6].mxu0  ;;  %v3662_v47 = vpop.f32.mrb[23].mxu1  ;;  %v4905_v62 = vadd.f32 %v4904_v59, %v4867_v7 }
 0x1d8   : > { %v4890_v9 = vadd.f32 %v4859_v21, %v6360_v42  ;;  %v3630_v53 = vpop.f32.mrb[7].mxu0  ;;  %v4907_v17 = vadd.f32 %v4906_v46, %v3662_v47  ;;  %v3797_v22 = vmul.f32 %v4888_v52, %v4888_v52  ;;  %v3801_v46 = vmul.f32 %v6364_v50, %v6364_v50 }
 0x1d9   : > { %v3773_v13 = vadd.f32 %v4889_v18, %v3772_v23  ;;  %v3795_v41 = vmul.f32 %v4889_v18, %v4889_v18  ;;  %v3809_v12 = vadd.f32 %v3808_v15, %v3794_v38  ;;  %v4891_v33 = vadd.f32 %v3630_v53, %v6362_v8 }
 0x1da   : > { %v4407_v34 = vpack.c.bf16 %v4890_v9, %v4888_v52  ;;  %v4427_v32 = vpack.c.bf16 %v4905_v62, %v4901_v56  ;;  %v4422_v4 = vpack.c.bf16 %v4907_v17, %v4903_v51  ;;  %v3798_v36 = vmul.f32 %v4890_v9, %v4890_v9 }
 0x1db   : > { %v3810_v57 = vadd.f32 %v3809_v12, %v3795_v41  ;;  %v4402_v48 = vpack.c.bf16 %v4891_v33, %v4889_v18  ;;  %v3774_v14 = vadd.f32 %v4891_v33, %v3773_v13  ;;  %v3796_v24 = vmul.f32 %v4891_v33, %v4891_v33 }
 0x1dc   : > { %4431 = vst [vmem:[%s6375_s17 + $0x18] sm:$0xff] %v4407_v34   ;;  %4435 = vst [vmem:[%s6375_s17 + $0x38] sm:$0xff] %v4427_v32   ;;  %v3799_v8 = vmul.f32 %v6366_v44, %v6366_v44  ;;  %v3804_v61 = vmul.f32 %v4907_v17, %v4907_v17  ;;  %v3805_v6 = vmul.f32 %v4901_v56, %v4901_v56 }
 0x1dd   : > { %4430 = vst [vmem:[%s6375_s17 + $0x10] sm:$0xff] %v4402_v48   ;;  %v3775_v42 = vadd.f32 %v4888_v52, %v3774_v14  ;;  %v3811_v28 = vadd.f32 %v3810_v57, %v3796_v24  ;;  %4434 = vst [vmem:[%s6375_s17 + $0x30] sm:$0xff] %v4422_v4   ;;  %v3806_v26 = vmul.f32 %v4905_v62, %v4905_v62 }
 0x1df   : > { %v3776_v45 = vadd.f32 %v4890_v9, %v3775_v42  ;;  %v3812_v25 = vadd.f32 %v3811_v28, %v3797_v22 }
 0x1e1   : > { %v3777_v59 = vadd.f32 %v6366_v44, %v3776_v45  ;;  %v3813_v1 = vadd.f32 %v3812_v25, %v3798_v36  ;;  %v3803_v44 = vmul.f32 %v4903_v51, %v4903_v51 }
 0x1e3   : > { %v3814_v16 = vadd.f32 %v3813_v1, %v3799_v8  ;;  %v3778_v19 = vadd.f32 %v4899_v49, %v3777_v59 }
 0x1e5   : > { %v3779_v27 = vadd.f32 %v6364_v50, %v3778_v19  ;;  %v3815_v63 = vadd.f32 %v3814_v16, %v3800_v40 }
 0x1e7   : > { %v3780_v60 = vadd.f32 %v6368_v30, %v3779_v27  ;;  %v3816_v2 = vadd.f32 %v3815_v63, %v3801_v46 }
 0x1e9   : > { %v3781_v35 = vadd.f32 %v4903_v51, %v3780_v60  ;;  %v3817_v55 = vadd.f32 %v3816_v2, %v3802_v11 }
 0x1eb   : > { %v3818_v58 = vadd.f32 %v3817_v55, %v3803_v44  ;;  %v3782_v49 = vadd.f32 %v4907_v17, %v3781_v35 }
 0x1ed   : > { %v3783_v29 = vadd.f32 %v4901_v56, %v3782_v49  ;;  %v3819_v43 = vadd.f32 %v3818_v58, %v3804_v61 }
 0x1ef   : > { %v3784_v50 = vadd.f32 %v4905_v62, %v3783_v29  ;;  %v3820_v20 = vadd.f32 %v3819_v43, %v3805_v6 }
 0x1f1   : > { %v3785_v0 = vrot.slane %v3784_v50, 4  ;;  %v3821_v31 = vadd.f32 %v3820_v20, %v3806_v26 }
 0x1f3   : > { %v3786_v30 = vadd.f32 %v3785_v0, %v3784_v50  ;;  %v3822_v54 = vrot.slane %v3821_v31, 4 }
 0x1f5   : > { %v3787_v39 = vrot.slane %v3786_v30, 2  ;;  %v3823_v5 = vadd.f32 %v3822_v54, %v3821_v31 }
 0x1f7   : > { %v3788_v3 = vadd.f32 %v3787_v39, %v3786_v30  ;;  %v3824_v37 = vrot.slane %v3823_v5, 2 }
 0x1f9   : > { %v3789_v52 = vrot.slane %v3788_v3, 1  ;;  %v3825_v10 = vadd.f32 %v3824_v37, %v3823_v5 }
 0x1fb   : > { %v3826_v56 = vrot.slane %v3825_v10, 1  ;;  %v3790_v51 = vadd.f32 %v3789_v52, %v3788_v3 }
 0x1fd   : > { %v3827_v7 = vadd.f32 %v3826_v56, %v3825_v10 }
 0x1ff   : > { %v3829_v38 = vsel %vm501_vm0, %v3790_v51, %v3827_v7 }
 0x200   : > { %3830 = vst [vmem:[%s467_s23] sm:$0x3] %v3829_v38 }
 0x201 PF: > { %s18_s28 = sadd.s32 1, %s5200_s28   ;;  %s6466_s24 = smov %s5192_s26 }
 0x202   : > { %p15_p13 = scmp.ge.s32.totalorder %s18_s28, 6   ;;  %s6467_s25 = smov %s5196_s27 }
 0x203   : > { %s6468_s26 = smov %s6471_s4  ;;  %s6469_s27 = smov %s6475_s5 }
 0x204   :  { %17 = sbr.rel (!%p15_p13) target bundleno = 3 (0x3), region = 103 }

// kernel: vgg_encoder_block_forward.4
= control target key start
LH: loop header
LB: loop body
LE: loop exit
PB: predicated region body
PF: predicated region fallthrough
CT: control target
= control target key end

     0   :  { %s5483_s24 = smov 0   ;;  %s5485_s25 = smov 0   ;;  %s6730_s0 = inlined_call_operand.vmem [shape: bf16[2,16,16,128], index: 0, kind: input, shape index: {}, may-alias: {0,1,2}]   ;;  %s6731_s1 = inlined_call_operand.vmem [shape: bf16[2,16,16,128], index: 1, kind: input, shape index: {}, may-alias: {0,1,2}]   ;;  %s6732_s2 = inlined_call_operand.vmem [shape: bf16[2,16,16,128], index: 2, kind: input, shape index: {}, may-alias: {0,1,2}]   ;;  %s6733_s3 = inlined_call_operand.vmem [shape: bf16[9,128,128], index: 3, kind: input, shape index: {}]   ;;  %s6734_s4 = inlined_call_operand.vmem [shape: f32[1,128], index: 4, kind: input, shape index: {}]   ;;  %s6735_s5 = inlined_call_operand.vmem [shape: f32[1,128], index: 5, kind: input, shape index: {}]   ;;  %s6736_s6 = inlined_call_operand.vmem [shape: bf16[2,16,16,128], index: 6, kind: output, shape index: {0}]   ;;  %s6737_s7 = inlined_call_operand.vmem [shape: f32[2,2,2,128], index: 7, kind: output, shape index: {1}]  }
   0x1   :  { %s5487_s26 = smov 0   ;;  %s5489_s27 = smov 0  }
   0x2   :  { %s5491_s28 = smov 0  }
   0x3 LB: > { %s27_s29 = sadd.s32 1, %s5433_s26  ;;  %s30_s30 = sadd.s32 1, %s5437_s27  ;;  %s5441_s28 = sphi %s5491_s28, %s18_s28   ;;  %s5437_s27 = sphi %s5489_s27, %s6758_s27   ;;  %s5433_s26 = sphi %s5487_s26, %s6757_s26   ;;  %s5429_s25 = sphi %s5485_s25, %s6756_s25   ;;  %s5425_s24 = sphi %s5483_s24, %s6755_s24  }
   0x4   : > { %p28_p0 = scmp.ge.s32.totalorder %s27_s29, 2  ;;  %p4181_p1 = scmp.ge.s32.totalorder %s5441_s28, 1 }
   0x5   : > { %p328_p2 = scmp.lt.s32.totalorder %s5441_s28, 5 }
   0x6   : > { %s6760_s29 = smov (%p28_p0, %s27_s29), 0  ;;  %s6762_s30 = smov (!%p28_p0, %s30_s30), %s5437_s27 }
   0x7   : > { %p329_p3 = pnand %p4181_p1, %p328_p2  ;;  %p32_p4 = scmp.ge.s32.totalorder %s6762_s30, 2 }
   0x8   : > { %v5289_v0 = vld [vmem:[%s6733_s3 + $0x100] sm:$0xff] (!%p329_p3)   ;;  %s5519_s10 = sshll.u32 (!%p329_p3), %s5425_s24, 3  ;;  %v5290_v1 = vld [vmem:[%s6733_s3 + $0x108] sm:$0xff] (!%p329_p3)   ;;  %p408_p5 = scmp.lt.s32.totalorder (!%p329_p3), %s5429_s25, 1  ;;  %v5292_v3 = vld [vmem:[%s6733_s3 + $0x110] sm:$0xff] (!%p329_p3)   ;;  %vm603_vm0 = vcmask (!%p329_p3), 1040384  }
   0x9   : > { %s6764_s30 = smov (%p32_p4, %s6762_s30), 0  ;;  %332 = sbr.rel (%p329_p3) target bundleno = 531 (0x213), region = 44 }
   0xa   : > { %4945 = vmatprep.subr.bf16.mxu0 (!%p329_p3), %v5289_v0  ;;  %v5291_v2 = vld [vmem:[%s6733_s3 + $0x40] sm:$0xff] (!%p329_p3)   ;;  %p424_p6 = scmp.lt.s32.totalorder (!%p329_p3), %s5519_s10, 15  ;;  %v5293_v4 = vld [vmem:[%s6733_s3 + $0x48] sm:$0xff] (!%p329_p3)   ;;  %v5295_v5 = vld [vmem:[%s6733_s3 + $0x50] sm:$0xff] (!%p329_p3)   ;;  %s4183_s15 = sadd.s32 (!%p329_p3), 4294967295, %s5519_s10  ;;  %vm695_vm6 = vcmask (!%p329_p3), 1043456  }
   0xb   : > { %4946 = vmatpush3.bf16.msra.mxu0 (!%p329_p3), %v5289_v0  ;;  %4817 = vmatprep.subr.bf16.mxu1 (!%p329_p3), %v5291_v2  ;;  %v5294_v6 = vld [vmem:[%s6733_s3 + $0x118] sm:$0xff] (!%p329_p3)   ;;  %p406_p7 = scmp.gt.s32.totalorder (!%p329_p3), %s4183_s15, 0  ;;  %v5296_v8 = vld [vmem:[%s6733_s3 + $0x120] sm:$0xff] (!%p329_p3)   ;;  %p4184_p8 = scmp.lt.s32.totalorder (!%p329_p3), %s4183_s15, 15  ;;  %v5298_v10 = vld [vmem:[%s6733_s3 + $0x128] sm:$0xff] (!%p329_p3)   ;;  %vm1640_vm13 = vcmask (!%p329_p3), 1042432  }
   0xc   : > { %4947 = vmatprep.subr.bf16.mxu0 (!%p329_p3), %v5290_v1  ;;  %4818 = vmatpush3.bf16.msra.mxu1 (!%p329_p3), %v5291_v2  ;;  %v5297_v7 = vld [vmem:[%s6733_s3 + $0x58] sm:$0xff] (!%p329_p3)   ;;  %v5299_v9 = vld [vmem:[%s6733_s3 + $0x60] sm:$0xff] (!%p329_p3)   ;;  %vm604_vm1 = vsmask.f32 (!%p329_p3), 256  ;;  %v609_v15 = vld [vmem:[#allocation2 + $0xc] sm:$0x1] (!%p329_p3) }
   0xd   : > { %4819 = vmatprep.subr.bf16.mxu1 (!%p329_p3), %v5293_v4  ;;  %v5574_v12 = vld [vmem:[%s6734_s4] ss:$0 sm:$0xff] (!%p329_p3)  ;;  %vm636_vm2 = vsmask.f32 (!%p329_p3), 7938  ;;  %vm5585_vm3 = vmand (!%p329_p3), %vm603_vm0, %vm604_vm1  ;;  %v641_v18 = vld [vmem:[#allocation2 + $0x14] sm:$0x1] (!%p329_p3) }
   0xe   : > { %v5581_v16 = vld [vmem:[%s6735_s5] ss:$0 sm:$0xff] (!%p329_p3)  ;;  %v5301_v19 = vld [vmem:[%s6733_s3 + $0x68] sm:$0xff] (!%p329_p3)   ;;  %v610_v22 = vsel (!%p329_p3), %vm5585_vm3, 0, %v609_v15  ;;  %vm5598_vm4 = vmand (!%p329_p3), %vm603_vm0, %vm636_vm2  ;;  %vm673_vm5 = vsmask.f32 (!%p329_p3), 4368 }
   0xf   : > { %4948 = vmatpush3.bf16.msra.mxu0 (!%p329_p3), %v5290_v1  ;;  %611 = vst [vmem:[#allocation2 + $0xc] sm:$0x1] (!%p329_p3), %v610_v22  ;;  %v642_v24 = vsel (!%p329_p3), %vm5598_vm4, 0, %v641_v18  ;;  %v5300_v26 = vld [vmem:[%s6733_s3 + $0x130] sm:$0xff] (!%p329_p3)   ;;  %v612_v31 = vld [vmem:[#allocation2 + $0x18] sm:$0x1] (!%p329_p3)  ;;  %vm5642_vm7 = vmor (!%p329_p3), %vm604_vm1, %vm673_vm5 }
  0x10   : > { %s6766_s25 = smov (!%p408_p5, %s5429_s25), 1  ;;  %4949 = vmatprep.subr.bf16.mxu0 %v5292_v3  ;;  %4820 = vmatpush3.bf16.msra.mxu1 %v5293_v4  ;;  %s6768_s15 = smov (!%p406_p7, %s4183_s15), 0  ;;  %643 = vst [vmem:[#allocation2 + $0x14] sm:$0x1] %v642_v24  ;;  %v644_v32 = vld [vmem:[#allocation2 + $0x20] sm:$0x1]  ;;  %vm5653_vm8 = vmand %vm695_vm6, %vm636_vm2 }
  0x11   : > { %s425_s19 = scalar_select %p424_p6, %s5519_s10, 15  ;;  %4821 = vmatprep.subr.bf16.mxu1 %v5295_v5  ;;  %v613_v33 = vsel %vm5585_vm3, 0, %v612_v31  ;;  %v645_v34 = vsel %vm5598_vm4, 0, %v644_v32  ;;  %v5302_v35 = vld [vmem:[%s6733_s3 + $0x138] sm:$0xff]   ;;  %v5303_v36 = vld [vmem:[%s6733_s3 + $0x70] sm:$0xff]   ;;  %v5649_v57 = vld [vmem:[%s6733_s3 + $0x140] sm:$0xff]  }
  0x12   : > { %s5538_s20 = sshll.u32 %s6766_s25, 5  ;;  %s6770_s15 = smov (!%p4184_p8, %s6768_s15), 15  ;;  %614 = vst [vmem:[#allocation2 + $0x18] sm:$0x1] %v613_v33  ;;  %646 = vst [vmem:[#allocation2 + $0x20] sm:$0x1] %v645_v34 }
  0x13   : > { %s4193_s23 = sshll.u32 %s425_s19, 1  ;;  %4950 = vmatpush3.bf16.msra.mxu0 %v5292_v3  ;;  %s4189_s22 = sshll.u32 %s6770_s15, 1  ;;  %v606_v41 = vld [vmem:[#allocation2] sm:$0x1]  ;;  %v638_v46 = vld [vmem:[#allocation2 + $0x8] sm:$0x1] }
  0x14   : > { %s5544_s8 = sadd.s32 %s4193_s23, %s5538_s20  ;;  %4951 = vmatprep.subr.bf16.mxu0 %v5294_v6  ;;  %4822 = vmatpush3.bf16.msra.mxu1 %v5295_v5  ;;  %s414_s11 = sadd.s32 %s5538_s20, %s4189_s22  ;;  %v607_v48 = vsel %vm5585_vm3, 0, %v606_v41  ;;  %v639_v49 = vsel %vm5598_vm4, 0, %v638_v46  ;;  %v5305_v55 = vld [vmem:[%s6733_s3 + $0x78] sm:$0xff]   ;;  %vm1034_vm9 = vsmask.f32 3328  ;;  %vm1641_vm14 = vcmask 1046532  }
  0x15   : > { %s4195_s12 = sshll.u32 %s5544_s8, 2  ;;  %4823 = vmatprep.subr.bf16.mxu1 %v5297_v7  ;;  %s4191_s17 = sshll.u32 %s414_s11, 2  ;;  %608 = vst [vmem:[#allocation2] sm:$0x1] %v607_v48  ;;  %640 = vst [vmem:[#allocation2 + $0x8] sm:$0x1] %v639_v49 }
  0x16   : > { %s5562_s21 = scalar_lea.vmem %s6731_s1, %s4195_s12  ;;  %p593_p9 = scmp.eq.s32.totalorder %s5425_s24, 0  ;;  %v905_v2 = vld [vmem:[#allocation2 + $0xc] sm:$0xf]  ;;  %vm1035_vm10 = vsmask.f32 7440  ;;  %vm6056_vm15 = vmor %vm1640_vm13, %vm1641_vm14 }
  0x17   : > { %4952 = vmatpush3.bf16.msra.mxu0 %v5294_v6  ;;  %v4580_v11 = vld [vmem:[%s5562_s21] sm:$0xff]   ;;  %v4659_v25 = vld [vmem:[%s5562_s21 + $0x8] sm:$0xff]   ;;  %s416_s22 = scalar_lea.vmem %s6730_s0, %s4191_s17  ;;  %v5635_v50 = vld [vmem:[%s5562_s21 + $0x10] sm:$0xff]   ;;  %p598_p11 = scmp.eq.s32.totalorder %s5425_s24, 1 }
  0x18   : > { %4953 = vmatprep.subr.bf16.mxu0 %v5296_v8  ;;  %v4581_v13 = vunpack.c.l.bf16 %v4580_v11  ;;  %v4582_v14 = vunpack.c.h.bf16 %v4580_v11  ;;  %4824 = vmatpush3.bf16.msra.mxu1 %v5297_v7  ;;  %v4585_v29 = vunpack.c.l.bf16 %v4659_v25  ;;  %v4586_v30 = vunpack.c.h.bf16 %v4659_v25  ;;  %v4612_v47 = vld [vmem:[%s416_s22] sm:$0xff]   ;;  %s5659_s13 = scalar_select %p593_p9, 1, 0  ;;  %v909_v3 = vld [vmem:[#allocation2 + $0x14] sm:$0x1]  ;;  %v4661_v33 = vld [vmem:[%s5562_s21 + $0x18] sm:$0xff]  }
  0x19   : > { %4825 = vmatprep.subr.bf16.mxu1 %v5299_v9  ;;  %v4613_v60 = vunpack.c.l.bf16 %v4612_v47  ;;  %v4614_v61 = vunpack.c.h.bf16 %v4612_v47  ;;  %v4589_v1 = vunpack.c.l.bf16 %v5635_v50  ;;  %v650_v47 = vld [vmem:[#allocation2 + $0x38] sm:$0x1]  ;;  %vm5728_vm12 = vmor %vm1034_vm9, %vm1035_vm10  ;;  %s6674_s23 = scalar_lea.vmem %s6736_s6, %s4195_s12  ;;  %p462_p12 = scmp.lt.s32.totalorder %s5425_s24, 1 }
  0x1a   : > { %v508_v20 = vmul.f32 %v4581_v13, %v5574_v12  ;;  %v509_v21 = vmul.f32 %v4582_v14, %v5574_v12  ;;  %v510_v39 = vmul.f32 %v4585_v29, %v5574_v12  ;;  %v511_v40 = vmul.f32 %v4586_v30, %v5574_v12  ;;  %v5667_v13 = vld [vmem:[%s6733_s3] sm:$0xff]   ;;  %s4207_s8 = sshll.u32 %s6766_s25, 1 }
  0x1b   : > { %4954 = vmatpush3.bf16.msra.mxu0 %v5296_v8  ;;  %v575_v6 = vmul.f32 %v4613_v60, %v5574_v12  ;;  %v576_v7 = vmul.f32 %v4614_v61, %v5574_v12  ;;  %v615_v14 = vld [vmem:[#allocation2 + $0x24] sm:$0x1]  ;;  %v916_v30 = vld [vmem:[#allocation2 + $0x20] sm:$0x1]  ;;  %v595_v32 = vstv %s5659_s13  ;;  %v5707_v60 = vld [vmem:[%s5562_s21 + $0x28] sm:$0xff]   ;;  %s6776_s24 = smov (!%p462_p12, %s5425_s24), 1 }
  0x1c   : > { %4955 = vmatprep.subr.bf16.mxu0 %v5298_v10  ;;  %v531_v27 = vadd.f32 %v5581_v16, %v508_v20  ;;  %v532_v28 = vadd.f32 %v5581_v16, %v509_v21  ;;  %4826 = vmatpush3.bf16.msra.mxu1 %v5299_v9  ;;  %v533_v44 = vadd.f32 %v5581_v16, %v510_v39  ;;  %v647_v21 = vld [vmem:[#allocation2 + $0x2c] sm:$0x1]  ;;  %vm5698_vm11 = vcmp.eq.s32.totalorder %v595_v32, 1  ;;  %s6241_s13 = scalar_select %p598_p11, 1, 0 }
  0x1d   : > { %4827 = vmatprep.subr.bf16.mxu1 %v5301_v19  ;;  %v534_v45 = vadd.f32 %v5581_v16, %v511_v40  ;;  %v578_v31 = vadd.f32 %v5581_v16, %v576_v7  ;;  %v648_v46 = vsel %vm5598_vm4, 0, %v647_v21  ;;  %s465_s12 = sadd.s32 %s4207_s8, %s6776_s24 }
  0x1e   : > { %v547_v37 = vmax.f32 %v531_v27, 0.0  ;;  %v548_v38 = vmax.f32 %v532_v28, 0.0  ;;  %v549_v58 = vmax.f32 %v533_v44, 0.0  ;;  %v577_v27 = vadd.f32 %v5581_v16, %v575_v6  ;;  %649 = vst [vmem:[#allocation2 + $0x2c] sm:$0x1] %v648_v46  ;;  %s4208_s9 = sshll.u32 %s465_s12, 1 }
  0x1f   : > { %4956 = vmatpush3.bf16.msra.mxu0 %v5298_v10  ;;  %v550_v59 = vmax.f32 %v534_v45, 0.0  ;;  %s467_s15 = scalar_lea.vmem %s6737_s7, %s4208_s9 }
  0x20   : > { %4957 = vmatprep.subr.bf16.mxu0 %v5300_v26  ;;  %v4547_v42 = vpack.c.bf16 %v547_v37, %v547_v37  ;;  %v4548_v43 = vpack.c.bf16 %v548_v38, %v548_v38  ;;  %4828 = vmatpush3.bf16.msra.mxu1 %v5301_v19  ;;  %v4549_v4 = vpack.c.bf16 %v549_v58, %v549_v58  ;;  %v579_v34 = vmax.f32 %v577_v27, 0.0  ;;  %v618_v38 = vld [vmem:[#allocation2 + $0x30] sm:$0x1] }
  0x21   : > { %4829 = vmatprep.subr.bf16.mxu1 %v5303_v36  ;;  %v4550_v5 = vpack.c.bf16 %v550_v59, %v550_v59  ;;  %v616_v37 = vsel %vm5585_vm3, 0, %v615_v14  ;;  %v619_v58 = vsel %vm5585_vm3, 0, %v618_v38  ;;  %v651_v59 = vsel %vm5598_vm4, 0, %v650_v47 }
  0x22   : > { %v745_v51 = vshrl.u32 %v4547_v42, 16  ;;  %v748_v52 = vshll.u32 %v4547_v42, 16  ;;  %v753_v53 = vshrl.u32 %v4548_v43, 16  ;;  %v756_v54 = vshll.u32 %v4548_v43, 16  ;;  %617 = vst [vmem:[#allocation2 + $0x24] sm:$0x1] %v616_v37 }
  0x23   : > { %4958 = vmatpush3.bf16.msra.mxu0 %v5300_v26  ;;  %v762_v15 = vshrl.u32 %v4549_v4, 16  ;;  %v765_v18 = vshll.u32 %v4549_v4, 16  ;;  %v770_v19 = vshrl.u32 %v4550_v5, 16  ;;  %v773_v20 = vshll.u32 %v4550_v5, 16  ;;  %v912_v26 = vld [vmem:[#allocation2 + $0x18] sm:$0xf] }
  0x24   : > { %4959 = vmatprep.subr.bf16.mxu0 %v5302_v35  ;;  %v747_v63 = vrot.slane %v745_v51, 7  ;;  %v755_v0 = vrot.slane %v753_v53, 7  ;;  %4830 = vmatpush3.bf16.msra.mxu1 %v5303_v36  ;;  %v512_v36 = vmul.f32 %v4589_v1, %v5574_v12  ;;  %v580_v43 = vmax.f32 %v578_v31, 0.0  ;;  %620 = vst [vmem:[#allocation2 + $0x30] sm:$0x1] %v619_v58 }
  0x25   : > { %4831 = vmatprep.subr.bf16.mxu1 %v5305_v55  ;;  %v764_v28 = vrot.slane %v762_v15, 7  ;;  %v772_v29 = vrot.slane %v770_v19, 7  ;;  %v4593_v51 = vunpack.c.l.bf16 %v4661_v33  ;;  %652 = vst [vmem:[#allocation2 + $0x38] sm:$0x1] %v651_v59 }
  0x26   : > { %v750_v8 = vor.u32 %v748_v52, %v747_v63  ;;  %v751_v9 = vrot.slane %v747_v63, 4  ;;  %v758_v10 = vor.u32 %v756_v54, %v755_v0  ;;  %v760_v11 = vrot.slane %v755_v0, 4  ;;  %v5696_v52 = vld [vmem:[%s5562_s21 + $0x20] sm:$0xff]  }
  0x27   : > { %4960 = vmatpush3.bf16.msra.mxu0 %v5302_v35  ;;  %v4590_v35 = vunpack.c.h.bf16 %v5635_v50  ;;  %v767_v39 = vor.u32 %v765_v18, %v764_v28  ;;  %v768_v40 = vrot.slane %v764_v28, 4  ;;  %v775_v41 = vor.u32 %v773_v20, %v772_v29 }
  0x28   : > { %v759_v22 = vsel %vm5642_vm7, %v751_v9, %v758_v10  ;;  %v906_v24 = vsel %vm5653_vm8, %v750_v8, %v905_v2  ;;  %v910_v25 = vsel %vm5585_vm3, %v760_v11, %v909_v3  ;;  %4977 = vmatprep.subr.bf16.mxu0 %v5649_v57  ;;  %4832 = vmatpush3.bf16.msra.mxu1 %v5305_v55  ;;  %v777_v42 = vrot.slane %v772_v29, 4 }
  0x29   : > { %907 = vst [vmem:[#allocation2 + $0xc] sm:$0xf] %v906_v24  ;;  %908 = vst [vmem:[#allocation2 + $0x10] sm:$0xf] %v759_v22  ;;  %4849 = vmatprep.subr.bf16.mxu1 %v5667_v13  ;;  %v513_v44 = vmul.f32 %v4590_v35, %v5574_v12  ;;  %v535_v45 = vadd.f32 %v5581_v16, %v512_v36  ;;  %v776_v48 = vsel %vm5642_vm7, %v768_v40, %v775_v41 }
  0x2a   : > { %911 = vst [vmem:[#allocation2 + $0x14] sm:$0x1] %v910_v25  ;;  %v913_v49 = vsel %vm5653_vm8, %v767_v39, %v912_v26  ;;  %v917_v50 = vsel %vm5585_vm3, %v777_v42, %v916_v30  ;;  %915 = vst [vmem:[#allocation2 + $0x1c] sm:$0xf] %v776_v48  ;;  %v581_v53 = vpack.c.bf16 %v580_v43, %v579_v34  ;;  %v4594_v2 = vunpack.c.h.bf16 %v4661_v33 }
  0x2b   : > { %914 = vst [vmem:[#allocation2 + $0x18] sm:$0xf] %v913_v49  ;;  %918 = vst [vmem:[#allocation2 + $0x20] sm:$0x1] %v917_v50  ;;  %v551_v54 = vmax.f32 %v535_v45, 0.0  ;;  %v5712_v1 = vadd.f32 %v5581_v16, %v513_v44  ;;  %v514_v3 = vmul.f32 %v4593_v51, %v5574_v12  ;;  %v4597_v4 = vunpack.c.l.bf16 %v5696_v52 }
  0x2c   : > { %v597_v11 = vsel %vm5698_vm11, 0, %v581_v53  ;;  %v515_v24 = vmul.f32 %v4594_v2, %v5574_v12  ;;  %v4598_v25 = vunpack.c.h.bf16 %v5696_v52  ;;  %v4601_v26 = vunpack.c.l.bf16 %v5707_v60 }
  0x2d   : > { %v5719_v15 = vpack.c.bf16 %v551_v54, %v551_v54  ;;  %v4211_v32 = vcombine.low %v597_v11, %v597_v11  ;;  %v4212_v33 = vcombine.high %v597_v11, %v597_v11  ;;  %v537_v51 = vadd.f32 %v5581_v16, %v514_v3 }
  0x2e   : > { %v538_v53 = vadd.f32 %v5581_v16, %v515_v24 }
  0x2f   : > { %v684_v2 = vshrl.u32 %v4212_v33, 16 }
  0x30   : > { %v2151_v61 = vld [vmem:[#allocation2 + $0xc] sm:$0xf]  ;;  %v2152_v63 = vld [vmem:[#allocation2 + $0x10] sm:$0xf] }
  0x31   : > { %v5709_v0 = vld [vmem:[#allocation2 + $0x14] sm:$0x1]  ;;  %v2176_v5 = vshrl.u32 %v2151_v61, 16  ;;  %v2179_v6 = vshll.u32 %v2151_v61, 16  ;;  %v2185_v7 = vshll.u32 %v2152_v63, 16  ;;  %v2189_v8 = vshrl.u32 %v2152_v63, 16 }
  0x32   : > { %v996_v9 = vld [vmem:[#allocation2 + $0xc] sm:$0xf]  ;;  %v2195_v10 = vshll.u32 %v5709_v0, 16  ;;  %v2154_v29 = vld [vmem:[#allocation2 + $0x18] sm:$0xf]  ;;  %v676_v61 = vshrl.u32 %v4211_v32, 16 }
  0x33   : > { %v1062_v14 = vshrl.u32 %v996_v9, 16  ;;  %v2178_v18 = vrot.slane %v2176_v5, 4  ;;  %v2181_v19 = vrot.slane %v2179_v6, 5  ;;  %v2187_v20 = vrot.slane %v2185_v7, 5  ;;  %v5724_v30 = vld [vmem:[#allocation2 + $0x1c] sm:$0xf] }
  0x34   : > { %v2191_v21 = vrot.slane %v2189_v8, 4  ;;  %v2197_v22 = vrot.slane %v2195_v10, 5  ;;  %v2156_v31 = vld [vmem:[#allocation2 + $0x20] sm:$0x1]  ;;  %v2200_v35 = vshrl.u32 %v2154_v29, 16  ;;  %v2203_v36 = vshll.u32 %v2154_v29, 16 }
  0x35   : > { %v2182_v27 = vor.u32 %v2181_v19, %v2178_v18  ;;  %v2209_v37 = vshll.u32 %v5724_v30, 16  ;;  %v2213_v38 = vshrl.u32 %v5724_v30, 16  ;;  %v2219_v41 = vshll.u32 %v2156_v31, 16  ;;  %v997_v49 = vld [vmem:[#allocation2 + $0x10] sm:$0xf] }
  0x36   : > { %v2192_v28 = vor.u32 %v2191_v21, %v2187_v20  ;;  %v1064_v42 = vrot.slane %v1062_v14, 4  ;;  %v2202_v43 = vrot.slane %v2200_v35, 4  ;;  %v2205_v44 = vrot.slane %v2203_v36, 5  ;;  %v1027_v50 = vld [vmem:[#allocation2 + $0x14] sm:$0x1] }
  0x37   : > { %v2183_v39 = vrot.slane %v2182_v27, 4  ;;  %v2211_v45 = vrot.slane %v2209_v37, 5  ;;  %v2215_v46 = vrot.slane %v2213_v38, 4  ;;  %v2221_v59 = vrot.slane %v2219_v41, 5  ;;  %v697_v18 = vld [vmem:[#allocation2] sm:$0xf] }
  0x38   : > { %v2193_v40 = vrot.slane %v2192_v28, 4  ;;  %v2206_v55 = vor.u32 %v2205_v44, %v2202_v43  ;;  %v679_v63 = vshll.u32 %v4211_v32, 16  ;;  %v687_v5 = vshll.u32 %v4212_v33, 16  ;;  %v5306_v28 = vld [vmem:[%s6733_s3 + $0x148] sm:$0xff]   ;;  %v5753_v43 = vld [vmem:[#allocation2 + $0x18] sm:$0xf] }
  0x39   : > { %v2188_v47 = vsel %vm5728_vm12, %v2183_v39, %v2187_v20  ;;  %v2216_v58 = vor.u32 %v2215_v46, %v2211_v45  ;;  %v1065_v8 = vshll.u32 %v996_v9, 16  ;;  %v1071_v10 = vshll.u32 %v997_v49, 16  ;;  %v701_v32 = vld [vmem:[#allocation2 + $0x8] sm:$0x1] }
  0x3a   : > { %v2198_v48 = vsel %vm5728_vm12, %v2193_v40, %v2197_v22  ;;  %v2207_v6 = vrot.slane %v2206_v55, 4  ;;  %v678_v11 = vrot.slane %v676_v61, 7  ;;  %v686_v14 = vrot.slane %v684_v2, 7 }
  0x3b   : > { %v4367_v54 = vcombine.low %v2188_v47, %v2198_v48  ;;  %v2217_v7 = vrot.slane %v2216_v58, 4  ;;  %v1075_v19 = vshrl.u32 %v997_v49, 16  ;;  %v1081_v3 = vshll.u32 %v1027_v50, 16  ;;  %v919_v49 = vld [vmem:[#allocation2 + $0x24] sm:$0xf] }
  0x3c   : > { %v2212_v20 = vsel %vm5728_vm12, %v2207_v6, %v2211_v45  ;;  %v1067_v22 = vrot.slane %v1065_v8, 5  ;;  %v1073_v24 = vrot.slane %v1071_v10, 5  ;;  %v681_v9 = vor.u32 %v679_v63, %v678_v11  ;;  %v923_v10 = vld [vmem:[#allocation2 + $0x2c] sm:$0x1] }
  0x3d   : > { %4961 = vmatprep.mubr.bf16.mxu0 %v4367_v54  ;;  %v2222_v21 = vsel %vm5728_vm12, %v2217_v7, %v2221_v59  ;;  %v682_v29 = vrot.slane %v678_v11, 4  ;;  %v689_v31 = vor.u32 %v687_v5, %v686_v14  ;;  %v2614_v33 = vrot.slane %v5709_v0, 5 }
  0x3e   : > { %v4368_v27 = vcombine.low %v2212_v20, %v2222_v21  ;;  %v691_v35 = vrot.slane %v686_v14, 4  ;;  %v1068_v36 = vor.u32 %v1067_v22, %v1064_v42  ;;  %v1077_v37 = vrot.slane %v1075_v19, 4 }
  0x3f   : > { %v690_v38 = vsel %vm5642_vm7, %v682_v29, %v689_v31  ;;  %v698_v39 = vsel %vm5653_vm8, %v681_v9, %v697_v18  ;;  %v1083_v40 = vrot.slane %v1081_v3, 5  ;;  %v552_v41 = vmax.f32 %v5712_v1, 0.0  ;;  %v5308_v1 = vld [vmem:[%s6733_s3 + $0x150] sm:$0xff]  }
  0x40   : > { %4962 = vmatmul.mubr.bf16.vlgmr.msra.gmra.mrb[0].mxu0 %v4368_v27  ;;  %699 = vst [vmem:[#allocation2] sm:$0xf] %v698_v39  ;;  %700 = vst [vmem:[#allocation2 + $0x4] sm:$0xf] %v690_v38  ;;  %v702_v42 = vsel %vm5585_vm3, %v691_v35, %v701_v32  ;;  %v1069_v44 = vrot.slane %v1068_v36, 4  ;;  %v1078_v45 = vor.u32 %v1077_v37, %v1073_v24  ;;  %v779_v46 = vshrl.u32 %v5719_v15, 16 }
  0x41   : > { %4978 = vmatpush3.bf16.msra.mxu0 %v5649_v57  ;;  %703 = vst [vmem:[#allocation2 + $0x8] sm:$0x1] %v702_v42  ;;  %v4552_v47 = vpack.c.bf16 %v552_v41, %v552_v41  ;;  %v782_v48 = vshll.u32 %v5719_v15, 16  ;;  %v553_v57 = vmax.f32 %v537_v51, 0.0  ;;  %v554_v50 = vmax.f32 %v538_v53, 0.0  ;;  %v5310_v53 = vld [vmem:[%s6733_s3 + $0x158] sm:$0xff]  }
  0x42   : > { %4979 = vmatprep.subr.bf16.mxu0 %v5306_v28  ;;  %v2618_v54 = vrot.slane %v5724_v30, 5  ;;  %v1079_v55 = vrot.slane %v1078_v45, 4  ;;  %v781_v58 = vrot.slane %v779_v46, 7  ;;  %v1086_v59 = vshrl.u32 %v5753_v43, 16  ;;  %v926_v38 = vld [vmem:[#allocation2 + $0x30] sm:$0xf] }
  0x43   : > { %v787_v61 = vshrl.u32 %v4552_v47, 16  ;;  %v790_v63 = vshll.u32 %v4552_v47, 16  ;;  %v4553_v2 = vpack.c.bf16 %v553_v57, %v553_v57  ;;  %v4554_v5 = vpack.c.bf16 %v554_v50, %v554_v50 }
  0x44   : > { %v1074_v15 = vsel %vm5728_vm12, %v1069_v44, %v1073_v24  ;;  %v1084_v6 = vsel %vm5728_vm12, %v1079_v55, %v1083_v40  ;;  %v784_v7 = vor.u32 %v782_v48, %v781_v58  ;;  %v785_v51 = vrot.slane %v781_v58, 4  ;;  %v5312_v44 = vld [vmem:[%s6733_s3 + $0x160] sm:$0xff]  }
  0x45   : > { %4980 = vmatpush3.bf16.msra.mxu0 %v5306_v28  ;;  %v789_v8 = vrot.slane %v787_v61, 7  ;;  %v796_v11 = vshrl.u32 %v4553_v2, 16  ;;  %v799_v14 = vshll.u32 %v4553_v2, 16  ;;  %v5772_v18 = vrot.slane %v1086_v59, 4 }
  0x46   : > { %4981 = vmatprep.subr.bf16.mxu0 %v5308_v1  ;;  %v920_v19 = vsel %vm5653_vm8, %v784_v7, %v919_v49  ;;  %v804_v3 = vshrl.u32 %v4554_v5, 16  ;;  %v807_v20 = vshll.u32 %v4554_v5, 16  ;;  %v1089_v21 = vshll.u32 %v5753_v43, 16  ;;  %v999_v43 = vld [vmem:[#allocation2 + $0x1c] sm:$0xf] }
  0x47   : > { %v994_v22 = vld [vmem:[#allocation2] sm:$0xf]  ;;  %v995_v24 = vld [vmem:[#allocation2 + $0x4] sm:$0xf]  ;;  %v5777_v27 = vcombine.low %v1074_v15, %v1084_v6  ;;  %v792_v28 = vor.u32 %v790_v63, %v789_v8  ;;  %v794_v9 = vrot.slane %v789_v8, 4  ;;  %v798_v29 = vrot.slane %v796_v11, 7 }
  0x48   : > { %921 = vst [vmem:[#allocation2 + $0x24] sm:$0xf] %v920_v19  ;;  %v1026_v31 = vld [vmem:[#allocation2 + $0x8] sm:$0x1]  ;;  %v1038_v32 = vshrl.u32 %v994_v22, 16  ;;  %v1041_v35 = vshll.u32 %v994_v22, 16  ;;  %v5786_v42 = vmul.f32 %v4597_v4, %v5574_v12 }
  0x49   : > { %v1047_v36 = vshll.u32 %v995_v24, 16  ;;  %v1051_v37 = vshrl.u32 %v995_v24, 16  ;;  %4982 = vmatpush3.bf16.msra.mxu0 %v5308_v1  ;;  %v1057_v39 = vshll.u32 %v1026_v31, 16  ;;  %v793_v40 = vsel %vm5642_vm7, %v785_v51, %v792_v28  ;;  %v930_v49 = vld [vmem:[#allocation2 + $0x38] sm:$0x1]  ;;  %v5314_v4 = vld [vmem:[%s6733_s3 + $0x168] sm:$0xff]  }
  0x4a   : > { %v924_v41 = vsel %vm5585_vm3, %v794_v9, %v923_v10  ;;  %4983 = vmatprep.subr.bf16.mxu0 %v5310_v53  ;;  %v1040_v45 = vrot.slane %v1038_v32, 4  ;;  %v1043_v46 = vrot.slane %v1041_v35, 5  ;;  %922 = vst [vmem:[#allocation2 + $0x28] sm:$0xf] %v793_v40  ;;  %v801_v57 = vor.u32 %v799_v14, %v798_v29  ;;  %v1028_v10 = vld [vmem:[#allocation2 + $0x20] sm:$0x1] }
  0x4b   : > { %v1049_v47 = vrot.slane %v1047_v36, 5  ;;  %v1053_v48 = vrot.slane %v1051_v37, 4  ;;  %925 = vst [vmem:[#allocation2 + $0x2c] sm:$0x1] %v924_v41  ;;  %v1059_v1 = vrot.slane %v1057_v39, 5  ;;  %v802_v50 = vrot.slane %v798_v29, 4 }
  0x4c   : > { %v806_v55 = vrot.slane %v804_v3, 7  ;;  %v1044_v58 = vor.u32 %v1043_v46, %v1040_v45  ;;  %v1091_v61 = vrot.slane %v1089_v21, 5  ;;  %v1095_v63 = vshll.u32 %v999_v43, 16  ;;  %v5316_v22 = vld [vmem:[%s6733_s3 + $0x170] sm:$0xff]   ;;  %v5309_v41 = vld [vmem:[%s6733_s3 + $0x8] sm:$0xff]  }
  0x4d   : > { %v1054_v59 = vor.u32 %v1053_v48, %v1049_v47  ;;  %4984 = vmatpush3.bf16.msra.mxu0 %v5310_v53  ;;  %v927_v15 = vsel %vm5653_vm8, %v801_v57, %v926_v38  ;;  %v1099_v6 = vshrl.u32 %v999_v43, 16  ;;  %v5817_v37 = vmul.f32 %v4598_v25, %v5574_v12 }
  0x4e   : > { %v809_v2 = vor.u32 %v807_v20, %v806_v55  ;;  %v811_v5 = vrot.slane %v806_v55, 4  ;;  %4985 = vmatprep.subr.bf16.mxu0 %v5312_v44  ;;  %v1045_v7 = vrot.slane %v1044_v58, 4  ;;  %928 = vst [vmem:[#allocation2 + $0x30] sm:$0xf] %v927_v15  ;;  %v1092_v11 = vor.u32 %v1091_v61, %v5772_v18 }
  0x4f   : > { %v1055_v51 = vrot.slane %v1054_v59, 4  ;;  %v2157_v8 = vld [vmem:[#allocation2 + $0x24] sm:$0xf]  ;;  %v5797_v14 = vrot.slane %v1095_v63, 5  ;;  %v1101_v9 = vrot.slane %v1099_v6, 4  ;;  %v1105_v25 = vshll.u32 %v1028_v10, 16 }
  0x50   : > { %v2224_v19 = vshrl.u32 %v2157_v8, 16  ;;  %v2227_v53 = vshll.u32 %v2157_v8, 16  ;;  %v810_v3 = vsel %vm5642_vm7, %v802_v50, %v809_v2  ;;  %v931_v20 = vsel %vm5585_vm3, %v811_v5, %v930_v49  ;;  %v1000_v21 = vld [vmem:[#allocation2 + $0x24] sm:$0xf] }
  0x51   : > { %v1050_v24 = vsel %vm5728_vm12, %v1045_v7, %v1049_v47  ;;  %v1060_v18 = vsel %vm5728_vm12, %v1055_v51, %v1059_v1  ;;  %929 = vst [vmem:[#allocation2 + $0x34] sm:$0xf] %v810_v3  ;;  %932 = vst [vmem:[#allocation2 + $0x38] sm:$0x1] %v931_v20  ;;  %v1093_v28 = vrot.slane %v1092_v11, 4  ;;  %4986 = vmatpush3.bf16.msra.mxu0 %v5312_v44  ;;  %v1110_v46 = vshrl.u32 %v1000_v21, 16 }
  0x52   : > { %v4247_v29 = vcombine.low %v1050_v24, %v1060_v18  ;;  %v5810_v31 = vld [vmem:[#allocation2 + $0x28] sm:$0xf]  ;;  %v5812_v32 = vld [vmem:[#allocation2 + $0x2c] sm:$0x1]  ;;  %v2226_v35 = vrot.slane %v2224_v19, 4  ;;  %v2229_v36 = vrot.slane %v2227_v53, 5  ;;  %4987 = vmatprep.subr.bf16.mxu0 %v5314_v4  ;;  %v1102_v52 = vor.u32 %v1101_v9, %v5797_v14 }
  0x53   : > { %v2233_v38 = vshll.u32 %v5810_v31, 16  ;;  %v2237_v39 = vshrl.u32 %v5810_v31, 16  ;;  %v2243_v40 = vshll.u32 %v5812_v32, 16  ;;  %v1098_v43 = vsel %vm5728_vm12, %v1093_v28, %v5797_v14  ;;  %v1001_v45 = vld [vmem:[#allocation2 + $0x28] sm:$0xf]  ;;  %v5318_v47 = vld [vmem:[%s6733_s3 + $0x178] sm:$0xff]  }
  0x54   : > { %4833 = vmatprep.mubr.bf16.mxu1 %v4247_v29  ;;  %v2230_v44 = vor.u32 %v2229_v36, %v2226_v35  ;;  %v1113_v57 = vshll.u32 %v1000_v21, 16  ;;  %v1103_v58 = vrot.slane %v1102_v52, 4  ;;  %v1107_v59 = vrot.slane %v1105_v25, 5  ;;  %v621_v53 = vld [vmem:[#allocation2 + $0x3c] sm:$0x1]  ;;  %v5854_v9 = vld [vmem:[%s6733_s3 + $0x180] sm:$0xff]  }
  0x55   : > { %4834 = vmatmul.mubr.bf16.vlgmr.msra.gmra.mrb[0].mxu1 %v5777_v27  ;;  %v2235_v48 = vrot.slane %v2233_v38, 5  ;;  %v2239_v49 = vrot.slane %v2237_v39, 4  ;;  %v2245_v1 = vrot.slane %v2243_v40, 5  ;;  %4988 = vmatpush3.bf16.msra.mxu0 %v5314_v4  ;;  %v2160_v55 = vld [vmem:[#allocation2 + $0x30] sm:$0xf]  ;;  %v1112_v61 = vrot.slane %v1110_v46, 4 }
  0x56   : > { %4850 = vmatpush3.bf16.msra.mxu1 %v5667_v13  ;;  %v2231_v50 = vrot.slane %v2230_v44, 4  ;;  %4989 = vmatprep.subr.bf16.mxu0 %v5316_v22  ;;  %v2248_v2 = vshrl.u32 %v2160_v55, 16  ;;  %v2251_v5 = vshll.u32 %v2160_v55, 16  ;;  %v1115_v15 = vrot.slane %v1113_v57, 5  ;;  %v5311_v27 = vld [vmem:[%s6733_s3 + $0x10] sm:$0xff]   ;;  %v5313_v28 = vld [vmem:[%s6733_s3 + $0x18] sm:$0xff]  }
  0x57   : > { %v2240_v63 = vor.u32 %v2239_v49, %v2235_v48  ;;  %4851 = vmatprep.subr.bf16.mxu1 %v5309_v41  ;;  %v1108_v7 = vsel %vm5728_vm12, %v1103_v58, %v1107_v59  ;;  %v1119_v51 = vshll.u32 %v1001_v45, 16  ;;  %v1123_v8 = vshrl.u32 %v1001_v45, 16  ;;  %v1029_v24 = vld [vmem:[#allocation2 + $0x2c] sm:$0x1]  ;;  %v653_v38 = vld [vmem:[#allocation2 + $0x44] sm:$0x1] }
  0x58   : > { %v2236_v4 = vsel %vm5728_vm12, %v2231_v50, %v2235_v48  ;;  %v5839_v6 = vld [vmem:[#allocation2 + $0x34] sm:$0xf]  ;;  %v5841_v13 = vld [vmem:[#allocation2 + $0x38] sm:$0x1]  ;;  %v2250_v11 = vrot.slane %v2248_v2, 4  ;;  %v2253_v14 = vrot.slane %v2251_v5, 5  ;;  %v4249_v21 = vcombine.low %v1098_v43, %v1108_v7 }
  0x59   : > { %v2241_v10 = vrot.slane %v2240_v63, 4  ;;  %v2257_v19 = vshll.u32 %v5839_v6, 16  ;;  %4990 = vmatpush3.bf16.msra.mxu0 %v5316_v22  ;;  %v2261_v3 = vshrl.u32 %v5839_v6, 16  ;;  %v2267_v20 = vshll.u32 %v5841_v13, 16  ;;  %v624_v44 = vld [vmem:[#allocation2 + $0x48] sm:$0x1] }
  0x5a   : > { %4852 = vmatpush3.bf16.msra.mxu1 %v5309_v41  ;;  %v1116_v18 = vor.u32 %v1115_v15, %v1112_v61  ;;  %4991 = vmatprep.subr.bf16.mxu0 %v5318_v47  ;;  %v2254_v29 = vor.u32 %v2253_v14, %v2250_v11  ;;  %v1121_v36 = vrot.slane %v1119_v51, 5  ;;  %v1125_v25 = vrot.slane %v1123_v8, 4  ;;  %v656_v48 = vld [vmem:[#allocation2 + $0x50] sm:$0x1]  ;;  %v5315_v55 = vld [vmem:[%s6733_s3 + $0x20] sm:$0xff]  }
  0x5b   : > { %v2246_v22 = vsel %vm5728_vm12, %v2241_v10, %v2245_v1  ;;  %v2259_v35 = vrot.slane %v2257_v19, 5  ;;  %4853 = vmatprep.subr.bf16.mxu1 %v5311_v27  ;;  %v2263_v40 = vrot.slane %v2261_v3, 4  ;;  %v2269_v41 = vrot.slane %v2267_v20, 5  ;;  %4837 = vmatprep.mubr.bf16.mxu1 %v4249_v21  ;;  %v5875_v2 = vld [vmem:[#allocation2 + $0x30] sm:$0xf] }
  0x5c   : > { %v4369_v39 = vcombine.low %v2236_v4, %v2246_v22  ;;  %v1117_v43 = vrot.slane %v1116_v18, 4  ;;  %v2255_v52 = vrot.slane %v2254_v29, 4  ;;  %v1129_v45 = vshll.u32 %v1029_v24, 16  ;;  %v5882_v7 = vld [vmem:[#allocation2 + $0x34] sm:$0xf] }
  0x5d   : > { %v539_v46 = vadd.f32 %v5581_v16, %v5786_v42  ;;  %4992 = vmatpush3.bf16.msra.mxu0 %v5318_v47  ;;  %v2264_v49 = vor.u32 %v2263_v40, %v2259_v35  ;;  %v540_v57 = vadd.f32 %v5581_v16, %v5817_v37  ;;  %v622_v50 = vsel %vm5585_vm3, 0, %v621_v53  ;;  %v5897_v21 = vld [vmem:[%s6735_s5] ss:$0 sm:$0xff]  ;;  %v5350_v62 = vld [vmem:[#allocation2 + $0x30] sm:$0xff]  }
  0x5e   : > { %4965 = vmatprep.mubr.bf16.mxu0 %v4369_v39  ;;  %v1122_v1 = vsel %vm5728_vm12, %v1117_v43, %v1121_v36  ;;  %4854 = vmatpush3.bf16.msra.mxu1 %v5311_v27  ;;  %v2260_v42 = vsel %vm5728_vm12, %v2255_v52, %v2259_v35  ;;  %v1126_v47 = vor.u32 %v1125_v25, %v1121_v36  ;;  %v1131_v58 = vrot.slane %v1129_v45, 5  ;;  %v4664_v25 = vld [vmem:[%s5562_s21 + $0x30] sm:$0xff]  }
  0x5f   : > { %v555_v59 = vmax.f32 %v539_v46, 0.0  ;;  %623 = vst [vmem:[#allocation2 + $0x3c] sm:$0x1] %v622_v50  ;;  %4855 = vmatprep.subr.bf16.mxu1 %v5313_v28  ;;  %5009 = vmatprep.subr.bf16.mxu0 %v5854_v9  ;;  %v2265_v61 = vrot.slane %v2264_v49, 4  ;;  %v556_v63 = vmax.f32 %v540_v57, 0.0  ;;  %v654_v16 = vsel %vm5598_vm4, 0, %v653_v38 }
  0x60   : > { %v4602_v37 = vunpack.c.h.bf16 %v5707_v60  ;;  %v1127_v5 = vrot.slane %v1126_v47, 4  ;;  %655 = vst [vmem:[#allocation2 + $0x44] sm:$0x1] %v654_v16  ;;  %v518_v27 = vmul.f32 %v4601_v26, %v5574_v12  ;;  %v625_v4 = vsel %vm5585_vm3, 0, %v624_v44  ;;  %v5317_v60 = vld [vmem:[%s6733_s3 + $0x28] sm:$0xff]   ;;  %v5319_v45 = vld [vmem:[%s6733_s3 + $0x30] sm:$0xff]  }
  0x61   : > { %v4555_v15 = vpack.c.bf16 %v555_v59, %v555_v59  ;;  %v2270_v51 = vsel %vm5728_vm12, %v2265_v61, %v2269_v41  ;;  %v4556_v8 = vpack.c.bf16 %v556_v63, %v556_v63  ;;  %626 = vst [vmem:[#allocation2 + $0x48] sm:$0x1] %v625_v4  ;;  %v657_v11 = vsel %vm5598_vm4, 0, %v656_v48  ;;  %v1030_v47 = vld [vmem:[#allocation2 + $0x38] sm:$0x1] }
  0x62   : > { %v519_v10 = vmul.f32 %v4602_v37, %v5574_v12  ;;  %4856 = vmatpush3.bf16.msra.mxu1 %v5313_v28  ;;  %v4370_v26 = vcombine.low %v2260_v42, %v2270_v51  ;;  %v1132_v14 = vsel %vm5728_vm12, %v1127_v5, %v1131_v58  ;;  %658 = vst [vmem:[#allocation2 + $0x50] sm:$0x1] %v657_v11  ;;  %v1134_v22 = vshrl.u32 %v5875_v2, 16  ;;  %v627_v37 = vld [vmem:[#allocation2 + $0x54] sm:$0x1]  ;;  %v5321_v5 = vld [vmem:[%s6733_s3 + $0x38] sm:$0xff]  }
  0x63   : > { %v813_v19 = vshrl.u32 %v4555_v15, 16  ;;  %v816_v53 = vshll.u32 %v4555_v15, 16  ;;  %4857 = vmatprep.subr.bf16.mxu1 %v5315_v55  ;;  %v4250_v3 = vcombine.low %v1122_v1, %v1132_v14  ;;  %v821_v20 = vshrl.u32 %v4556_v8, 16 }
  0x64   : > { %v824_v12 = vshll.u32 %v4556_v8, 16  ;;  %v541_v24 = vadd.f32 %v5897_v21, %v518_v27  ;;  %4966 = vmatmul.mubr.bf16.gmra.mrb[4].mxu0 %v4370_v26  ;;  %v542_v28 = vadd.f32 %v5897_v21, %v519_v10  ;;  %v1137_v29 = vshll.u32 %v5875_v2, 16  ;;  %v659_v10 = vld [vmem:[#allocation2 + $0x5c] sm:$0x1] }
  0x65   : > { %v815_v18 = vrot.slane %v813_v19, 7  ;;  %4838 = vmatmul.mubr.bf16.gmra.mrb[4].mxu1 %v4250_v3  ;;  %v823_v35 = vrot.slane %v821_v20, 7  ;;  %v1143_v39 = vshll.u32 %v5882_v7, 16  ;;  %v1147_v40 = vshrl.u32 %v5882_v7, 16 }
  0x66   : > { %v933_v36 = vld [vmem:[#allocation2 + $0x3c] sm:$0xf]  ;;  %v557_v38 = vmax.f32 %v541_v24, 0.0  ;;  %v558_v44 = vmax.f32 %v542_v28, 0.0  ;;  %v1136_v52 = vrot.slane %v1134_v22, 4  ;;  %4858 = vmatpush3.bf16.msra.mxu1 %v5315_v55  ;;  %v1139_v57 = vrot.slane %v1137_v29, 5 }
  0x67   : > { %v818_v41 = vor.u32 %v816_v53, %v815_v18  ;;  %v819_v43 = vrot.slane %v815_v18, 4  ;;  %v826_v46 = vor.u32 %v824_v12, %v823_v35  ;;  %v828_v48 = vrot.slane %v823_v35, 4  ;;  %v937_v49 = vld [vmem:[#allocation2 + $0x44] sm:$0x1]  ;;  %4859 = vmatprep.subr.bf16.mxu1 %v5317_v60 }
  0x68   : > { %v4557_v1 = vpack.c.bf16 %v557_v38, %v557_v38  ;;  %v4558_v42 = vpack.c.bf16 %v558_v44, %v558_v44  ;;  %v1145_v58 = vrot.slane %v1143_v39, 5  ;;  %v1149_v59 = vrot.slane %v1147_v40, 4  ;;  %v940_v4 = vld [vmem:[#allocation2 + $0x48] sm:$0xf]  ;;  %v5930_v40 = vld [vmem:[%s5562_s21 + $0x38] sm:$0xff]   ;;  %s433_s21 = sadd.s32 8, %s5519_s10 }
  0x69   : > { %v934_v50 = vsel %vm5653_vm8, %v818_v41, %v933_v36  ;;  %v827_v55 = vsel %vm5642_vm7, %v819_v43, %v826_v46  ;;  %v938_v61 = vsel %vm5585_vm3, %v828_v48, %v937_v49  ;;  %v1140_v51 = vor.u32 %v1139_v57, %v1136_v52  ;;  %v944_v3 = vld [vmem:[#allocation2 + $0x50] sm:$0x1]  ;;  %p6096_p10 = scmp.lt.s32.totalorder %s433_s21, 15 }
  0x6a   : > { %935 = vst [vmem:[#allocation2 + $0x3c] sm:$0xf] %v934_v50  ;;  %v830_v63 = vshrl.u32 %v4557_v1, 16  ;;  %v833_v16 = vshll.u32 %v4557_v1, 16  ;;  %936 = vst [vmem:[#allocation2 + $0x40] sm:$0xf] %v827_v55  ;;  %v1150_v8 = vor.u32 %v1149_v59, %v1145_v58  ;;  %4860 = vmatpush3.bf16.msra.mxu1 %v5317_v60  ;;  %v4605_v14 = vunpack.c.l.bf16 %v4664_v25 }
  0x6b   : > { %939 = vst [vmem:[#allocation2 + $0x44] sm:$0x1] %v938_v61  ;;  %v838_v15 = vshrl.u32 %v4558_v42, 16  ;;  %v841_v27 = vshll.u32 %v4558_v42, 16  ;;  %v1153_v26 = vshll.u32 %v1030_v47, 16  ;;  %v4606_v19 = vunpack.c.h.bf16 %v4664_v25  ;;  %4861 = vmatprep.subr.bf16.mxu1 %v5319_v45  ;;  %v5942_v25 = vld [vmem:[%s6733_s3 + $0x80] sm:$0xff]  }
  0x6c   : > { %v832_v11 = vrot.slane %v830_v63, 7  ;;  %v1141_v20 = vrot.slane %v1140_v51, 4  ;;  %v1151_v12 = vrot.slane %v1150_v8, 4  ;;  %v628_v24 = vsel %vm5585_vm3, 0, %v627_v37  ;;  %v5923_v60 = vld [vmem:[%s6734_s4] ss:$0 sm:$0xff] }
  0x6d   : > { %v840_v53 = vrot.slane %v838_v15, 7  ;;  %v1155_v22 = vrot.slane %v1153_v26, 5  ;;  %v520_v29 = vmul.f32 %v5923_v60, %v4605_v14  ;;  %629 = vst [vmem:[#allocation2 + $0x54] sm:$0x1] %v628_v24  ;;  %v521_v39 = vmul.f32 %v5923_v60, %v4606_v19  ;;  %s6772_s21 = smov (!%p6096_p10, %s433_s21), 15 }
  0x6e   : > { %v835_v18 = vor.u32 %v833_v16, %v832_v11  ;;  %v836_v28 = vrot.slane %v832_v11, 4  ;;  %v1146_v38 = vsel %vm5728_vm12, %v1141_v20, %v1145_v58  ;;  %4862 = vmatpush3.bf16.msra.mxu1 %v5319_v45  ;;  %v660_v52 = vsel %vm5598_vm4, 0, %v659_v10  ;;  %s6774_s21 = smov (!%p6096_p10, %s6772_s21), 15 }
  0x6f   : > { %v843_v35 = vor.u32 %v841_v27, %v840_v53  ;;  %v845_v36 = vrot.slane %v840_v53, 4  ;;  %v1156_v43 = vsel %vm5728_vm12, %v1151_v12, %v1155_v22  ;;  %v543_v44 = vadd.f32 %v5897_v21, %v520_v29  ;;  %4863 = vmatprep.subr.bf16.mxu1 %v5321_v5  ;;  %661 = vst [vmem:[#allocation2 + $0x5c] sm:$0x1] %v660_v52  ;;  %s6121_s10 = sshll.u32 %s6774_s21, 1 }
  0x70   : > { %v941_v41 = vsel %vm5653_vm8, %v835_v18, %v940_v4  ;;  %v4251_v49 = vcombine.low %v1146_v38, %v1156_v43  ;;  %v544_v57 = vadd.f32 %v5897_v21, %v521_v39  ;;  %v4609_v59 = vunpack.c.l.bf16 %v5930_v40  ;;  %s442_s11 = sadd.s32 %s6121_s10, %s5538_s20 }
  0x71   : > { %v2163_v46 = vld [vmem:[#allocation2 + $0x3c] sm:$0xf]  ;;  %v844_v45 = vsel %vm5642_vm7, %v836_v28, %v843_v35  ;;  %942 = vst [vmem:[#allocation2 + $0x48] sm:$0xf] %v941_v41  ;;  %v945_v48 = vsel %vm5585_vm3, %v845_v36, %v944_v3  ;;  %v5951_v50 = vld [vmem:[#allocation2 + $0x40] sm:$0xf]  ;;  %v4610_v55 = vunpack.c.h.bf16 %v5930_v40 }
  0x72   : > { %v5948_v1 = vld [vmem:[#allocation2 + $0x3c] sm:$0xf]  ;;  %v5953_v42 = vld [vmem:[#allocation2 + $0x44] sm:$0x1]  ;;  %v2272_v47 = vshrl.u32 %v2163_v46, 16  ;;  %v2275_v58 = vshll.u32 %v2163_v46, 16  ;;  %4841 = vmatprep.mubr.bf16.mxu1 %v4251_v49  ;;  %4864 = vmatpush3.bf16.msra.mxu1 %v5321_v5  ;;  %v522_v38 = vmul.f32 %v5923_v60, %v4609_v59 }
  0x73   : > { %943 = vst [vmem:[#allocation2 + $0x4c] sm:$0xf] %v844_v45  ;;  %946 = vst [vmem:[#allocation2 + $0x50] sm:$0x1] %v945_v48  ;;  %v2281_v61 = vshll.u32 %v5951_v50, 16  ;;  %v2285_v63 = vshrl.u32 %v5951_v50, 16  ;;  %4881 = vmatprep.subr.bf16.mxu1 %v5942_v25 }
  0x74   : > { %v2291_v16 = vshll.u32 %v5953_v42, 16  ;;  %v5960_v37 = vld [vmem:[#allocation2 + $0x40] sm:$0xf]  ;;  %v1158_v15 = vshrl.u32 %v5948_v1, 16  ;;  %v2274_v27 = vrot.slane %v2272_v47, 4  ;;  %v2277_v4 = vrot.slane %v2275_v58, 5 }
  0x75   : > { %v5963_v51 = vld [vmem:[#allocation2 + $0x44] sm:$0x1]  ;;  %v1161_v8 = vshll.u32 %v5948_v1, 16  ;;  %v1167_v10 = vshll.u32 %v5960_v37, 16  ;;  %v2283_v11 = vrot.slane %v2281_v61, 5  ;;  %v2287_v26 = vrot.slane %v2285_v63, 4 }
  0x76   : > { %v2293_v14 = vrot.slane %v2291_v16, 5  ;;  %v1160_v19 = vrot.slane %v1158_v15, 4  ;;  %v2278_v53 = vor.u32 %v2277_v4, %v2274_v27  ;;  %v1171_v12 = vshrl.u32 %v5960_v37, 16  ;;  %s6151_s20 = sshll.u32 %s442_s11, 2  ;;  %v6477_v23 = vld [vmem:[#allocation2 + $0x44] sm:$0x1] }
  0x77   : > { %v1163_v3 = vrot.slane %v1161_v8, 5  ;;  %v1169_v20 = vrot.slane %v1167_v10, 5  ;;  %v2288_v5 = vor.u32 %v2287_v26, %v2283_v11  ;;  %v1177_v24 = vshll.u32 %v5963_v51, 16  ;;  %v630_v26 = vld [vmem:[#allocation2 + $0x60] sm:$0x1]  ;;  %s444_s19 = scalar_lea.vmem %s6732_s2, %s6151_s20 }
  0x78   : > { %v559_v18 = vmax.f32 %v543_v44, 0.0  ;;  %v560_v28 = vmax.f32 %v544_v57, 0.0  ;;  %v2279_v22 = vrot.slane %v2278_v53, 4  ;;  %v2166_v29 = vld [vmem:[#allocation2 + $0x48] sm:$0xf]  ;;  %v1173_v36 = vrot.slane %v1171_v12, 4 }
  0x79   : > { %v1164_v35 = vor.u32 %v1163_v3, %v1160_v19  ;;  %v2289_v39 = vrot.slane %v2288_v5, 4  ;;  %v2296_v52 = vshrl.u32 %v2166_v29, 16  ;;  %v2299_v49 = vshll.u32 %v2166_v29, 16  ;;  %v662_v29 = vld [vmem:[#allocation2 + $0x68] sm:$0x1] }
  0x7a   : > { %v5971_v41 = vld [vmem:[#allocation2 + $0x4c] sm:$0xf]  ;;  %v5973_v43 = vld [vmem:[#allocation2 + $0x50] sm:$0x1]  ;;  %v4559_v46 = vpack.c.bf16 %v559_v18, %v559_v18  ;;  %v4560_v45 = vpack.c.bf16 %v560_v28, %v560_v28  ;;  %v2284_v48 = vsel %vm5728_vm12, %v2279_v22, %v2283_v11  ;;  %v1174_v10 = vor.u32 %v1173_v36, %v1169_v20  ;;  %v947_v28 = vld [vmem:[#allocation2 + $0x54] sm:$0xf] }
  0x7b   : > { %v2305_v44 = vshll.u32 %v5971_v41, 16  ;;  %v2309_v57 = vshrl.u32 %v5971_v41, 16  ;;  %v2294_v47 = vsel %vm5728_vm12, %v2289_v39, %v2293_v14  ;;  %v2298_v58 = vrot.slane %v2296_v52, 4  ;;  %v5988_v36 = vld [vmem:[#allocation2 + $0x48] sm:$0xf] }
  0x7c   : > { %v2315_v59 = vshll.u32 %v5973_v43, 16  ;;  %v1165_v61 = vrot.slane %v1164_v35, 4  ;;  %v4371_v63 = vcombine.low %v2284_v48, %v2294_v47  ;;  %v2301_v16 = vrot.slane %v2299_v49, 5  ;;  %v5995_v49 = vld [vmem:[#allocation2 + $0x4c] sm:$0xf] }
  0x7d   : > { %v2307_v15 = vrot.slane %v2305_v44, 5  ;;  %v2311_v27 = vrot.slane %v2309_v57, 4  ;;  %v1179_v11 = vrot.slane %v1177_v24, 5  ;;  %v847_v3 = vshrl.u32 %v4559_v46, 16 }
  0x7e   : > { %v2317_v4 = vrot.slane %v2315_v59, 5  ;;  %v1170_v8 = vsel %vm5728_vm12, %v1165_v61, %v1169_v20  ;;  %4969 = vmatprep.mubr.bf16.mxu0 %v4371_v63  ;;  %v2302_v19 = vor.u32 %v2301_v16, %v2298_v58  ;;  %v850_v14 = vshll.u32 %v4559_v46, 16  ;;  %v951_v20 = vld [vmem:[#allocation2 + $0x5c] sm:$0x1] }
  0x7f   : > { %v2312_v53 = vor.u32 %v2311_v27, %v2307_v15  ;;  %v1175_v12 = vrot.slane %v1174_v10, 4  ;;  %v855_v5 = vshrl.u32 %v4560_v45, 16  ;;  %v858_v18 = vshll.u32 %v4560_v45, 16 }
  0x80   : > { %v523_v22 = vmul.f32 %v5923_v60, %v4610_v55  ;;  %v2303_v35 = vrot.slane %v2302_v19, 4  ;;  %v849_v52 = vrot.slane %v847_v3, 7  ;;  %v545_v24 = vadd.f32 %v5897_v21, %v522_v38 }
  0x81   : > { %v2313_v39 = vrot.slane %v2312_v53, 4  ;;  %v1180_v46 = vsel %vm5728_vm12, %v1175_v12, %v1179_v11  ;;  %v857_v48 = vrot.slane %v855_v5, 7  ;;  %v631_v40 = vsel %vm5585_vm3, 0, %v630_v26  ;;  %v6015_v12 = vld [vmem:[#allocation2 + $0x18] sm:$0xe] }
  0x82   : > { %v546_v45 = vadd.f32 %v5897_v21, %v523_v22  ;;  %v2308_v55 = vsel %vm5728_vm12, %v2303_v35, %v2307_v15  ;;  %v4252_v38 = vcombine.low %v1170_v8, %v1180_v46  ;;  %v852_v57 = vor.u32 %v850_v14, %v849_v52  ;;  %632 = vst [vmem:[#allocation2 + $0x60] sm:$0x1] %v631_v40  ;;  %v6005_v15 = vld [vmem:[#allocation2 + $0x50] sm:$0x1] }
  0x83   : > { %v2318_v44 = vsel %vm5728_vm12, %v2313_v39, %v2317_v4  ;;  %v853_v58 = vrot.slane %v849_v52, 4  ;;  %v860_v59 = vor.u32 %v858_v18, %v857_v48  ;;  %v862_v61 = vrot.slane %v857_v48, 4 }
  0x84   : > { %v4372_v47 = vcombine.low %v2308_v55, %v2318_v44  ;;  %4842 = vmatmul.mubr.bf16.gmra.mrb[8].mxu1 %v4252_v38  ;;  %v948_v63 = vsel %vm5653_vm8, %v852_v57, %v947_v28  ;;  %v561_v16 = vmax.f32 %v545_v24, 0.0  ;;  %v562_v27 = vmax.f32 %v546_v45, 0.0 }
  0x85   : > { %v663_v10 = vsel %vm5598_vm4, 0, %v662_v29  ;;  %v861_v4 = vsel %vm5642_vm7, %v853_v58, %v860_v59  ;;  %949 = vst [vmem:[#allocation2 + $0x54] sm:$0xf] %v948_v63  ;;  %v952_v8 = vsel %vm5585_vm3, %v862_v61, %v951_v20  ;;  %v1182_v11 = vshrl.u32 %v5988_v36, 16  ;;  %v6022_v20 = vld [vmem:[#allocation2 + $0x20] sm:$0x1] }
  0x86   : > { %4970 = vmatmul.mubr.bf16.gmra.mrb[8].mxu0 %v4372_v47  ;;  %664 = vst [vmem:[#allocation2 + $0x68] sm:$0x1] %v663_v10  ;;  %v1185_v26 = vshll.u32 %v5988_v36, 16  ;;  %950 = vst [vmem:[#allocation2 + $0x58] sm:$0xf] %v861_v4  ;;  %v4561_v19 = vpack.c.bf16 %v561_v16, %v561_v16  ;;  %v4562_v53 = vpack.c.bf16 %v562_v27, %v562_v27  ;;  %v1191_v3 = vshll.u32 %v5995_v49, 16 }
  0x87   : > { %953 = vst [vmem:[#allocation2 + $0x5c] sm:$0x1] %v952_v8  ;;  %v1195_v14 = vshrl.u32 %v5995_v49, 16  ;;  %v6019_v5 = vrot.slane %v2618_v54, 4  ;;  %v1184_v18 = vrot.slane %v1182_v11, 4  ;;  %v1201_v22 = vshll.u32 %v6005_v15, 16 }
  0x88   : > { %v1187_v28 = vrot.slane %v1185_v26, 5  ;;  %v864_v29 = vshrl.u32 %v4561_v19, 16  ;;  %v867_v35 = vshll.u32 %v4561_v19, 16  ;;  %v872_v39 = vshrl.u32 %v4562_v53, 16 }
  0x89   : > { %v875_v52 = vshll.u32 %v4562_v53, 16  ;;  %v2621_v24 = vrot.slane %v6022_v20, 5  ;;  %v1193_v48 = vrot.slane %v1191_v3, 5  ;;  %v1197_v45 = vrot.slane %v1195_v14, 4  ;;  %v954_v44 = vld [vmem:[#allocation2 + $0x60] sm:$0xf] }
  0x8a   : > { %v1188_v46 = vor.u32 %v1187_v28, %v1184_v18  ;;  %v866_v40 = vrot.slane %v864_v29, 7  ;;  %v874_v55 = vrot.slane %v872_v39, 7  ;;  %v1203_v38 = vrot.slane %v1201_v22, 5 }
  0x8b   : > { %v1198_v47 = vor.u32 %v1197_v45, %v1193_v48  ;;  %v4384_v58 = vrot.slane %v6015_v12, 9  ;;  %v5389_v12 = vld [vmem:[#allocation2] sm:$0xf] }
  0x8c   : > { %v1189_v57 = vrot.slane %v1188_v46, 4  ;;  %v2169_v59 = vld [vmem:[#allocation2 + $0x54] sm:$0xf]  ;;  %v869_v61 = vor.u32 %v867_v35, %v866_v40  ;;  %v870_v63 = vrot.slane %v866_v40, 4  ;;  %v877_v16 = vor.u32 %v875_v52, %v874_v55 }
  0x8d   : > { %v879_v27 = vrot.slane %v874_v55, 4  ;;  %v958_v10 = vld [vmem:[#allocation2 + $0x68] sm:$0x1]  ;;  %v6026_v4 = vld [vmem:[#allocation2 + $0x58] sm:$0xf]  ;;  %v2320_v11 = vshrl.u32 %v2169_v59, 16  ;;  %v6083_v20 = vsel %vm6056_vm15, %v4384_v58, %v2618_v54 }
  0x8e   : > { %v6028_v8 = vld [vmem:[#allocation2 + $0x5c] sm:$0x1]  ;;  %v2323_v26 = vshll.u32 %v2169_v59, 16  ;;  %v1194_v19 = vsel %vm5728_vm12, %v1189_v57, %v1193_v48  ;;  %v2329_v53 = vshll.u32 %v6026_v4, 16  ;;  %v2333_v3 = vshrl.u32 %v6026_v4, 16 }
  0x8f   : > { %v2339_v14 = vshll.u32 %v6028_v8, 16  ;;  %v878_v18 = vsel %vm5642_vm7, %v870_v63, %v877_v16  ;;  %v6037_v28 = vld [vmem:[#allocation2 + $0x54] sm:$0xf]  ;;  %v2322_v22 = vrot.slane %v2320_v11, 4  ;;  %v955_v35 = vsel %vm5653_vm8, %v869_v61, %v954_v44  ;;  %v6043_v52 = vld [vmem:[#allocation2 + $0x58] sm:$0xf] }
  0x90   : > { %v2325_v29 = vrot.slane %v2323_v26, 5  ;;  %957 = vst [vmem:[#allocation2 + $0x64] sm:$0xf] %v878_v18  ;;  %v959_v39 = vsel %vm5585_vm3, %v879_v27, %v958_v10  ;;  %v6045_v46 = vld [vmem:[#allocation2 + $0x5c] sm:$0x1]  ;;  %v2331_v48 = vrot.slane %v2329_v53, 5 }
  0x91   : > { %v2335_v45 = vrot.slane %v2333_v3, 4  ;;  %v2341_v40 = vrot.slane %v2339_v14, 5  ;;  %956 = vst [vmem:[#allocation2 + $0x60] sm:$0xf] %v955_v35  ;;  %960 = vst [vmem:[#allocation2 + $0x68] sm:$0x1] %v959_v39 }
  0x92   : > { %v1199_v55 = vrot.slane %v1198_v47, 4  ;;  %v2577_v57 = vld [vmem:[#allocation2 + $0xc] sm:$0xe]  ;;  %v2326_v59 = vor.u32 %v2325_v29, %v2322_v22  ;;  %v1206_v63 = vshrl.u32 %v6037_v28, 16  ;;  %v1209_v44 = vshll.u32 %v6037_v28, 16 }
  0x93   : > { %v1215_v61 = vshll.u32 %v6043_v52, 16  ;;  %v2336_v16 = vor.u32 %v2335_v45, %v2331_v48  ;;  %v1219_v10 = vshrl.u32 %v6043_v52, 16  ;;  %v1225_v11 = vshll.u32 %v6045_v46, 16 }
  0x94   : > { %v1204_v27 = vsel %vm5728_vm12, %v1199_v55, %v1203_v38  ;;  %v2327_v26 = vrot.slane %v2326_v59, 4  ;;  %v1208_v3 = vrot.slane %v1206_v63, 4  ;;  %v1211_v47 = vrot.slane %v1209_v44, 5  ;;  %v5388_v55 = vld [vmem:[#allocation2 + $0x10] sm:$0xf] }
  0x95   : > { %v4253_v53 = vcombine.low %v1194_v19, %v1204_v27  ;;  %v2337_v18 = vrot.slane %v2336_v16, 4  ;;  %v1217_v22 = vrot.slane %v1215_v61, 5  ;;  %v1221_v29 = vrot.slane %v1219_v10, 4 }
  0x96   : > { %v4383_v35 = vrot.slane %v2577_v57, 9  ;;  %v2332_v38 = vsel %vm5728_vm12, %v2327_v26, %v2331_v48  ;;  %v1212_v39 = vor.u32 %v1211_v47, %v1208_v3  ;;  %v1227_v45 = vrot.slane %v1225_v11, 5 }
  0x97   : > { %4845 = vmatprep.mubr.bf16.mxu1 %v4253_v53  ;;  %v2611_v19 = vrot.slane %v5388_v55, 5  ;;  %v2342_v59 = vsel %vm5728_vm12, %v2337_v18, %v2341_v40  ;;  %v6064_v63 = vld [vmem:[#allocation2 + $0x64] sm:$0xf]  ;;  %v1222_v44 = vor.u32 %v1221_v29, %v1217_v22  ;;  %v6071_v57 = vsel %vm6056_vm15, %v6019_v5, %v2621_v24 }
  0x98   : > { %v4373_v61 = vcombine.low %v2332_v38, %v2342_v59  ;;  %v2172_v48 = vld [vmem:[#allocation2 + $0x60] sm:$0xf]  ;;  %v6073_v16 = vld [vmem:[#allocation2 + $0x68] sm:$0x1]  ;;  %v2353_v27 = vshll.u32 %v6064_v63, 16  ;;  %v2357_v10 = vshrl.u32 %v6064_v63, 16  ;;  %v4408_v59 = vcombine.low %v6083_v20, %v6071_v57 }
  0x99   : > { %v2344_v40 = vshrl.u32 %v2172_v48, 16  ;;  %v2347_v5 = vshll.u32 %v2172_v48, 16  ;;  %v2363_v24 = vshll.u32 %v6073_v16, 16  ;;  %v1213_v11 = vrot.slane %v1212_v39, 4  ;;  %v6088_v38 = vld [vmem:[#allocation2 + $0x4] sm:$0xf] }
  0x9a   : > { %4973 = vmatprep.mubr.bf16.mxu0 %v4373_v61  ;;  %v2355_v26 = vrot.slane %v2353_v27, 5  ;;  %v2359_v53 = vrot.slane %v2357_v10, 4  ;;  %v1223_v3 = vrot.slane %v1222_v44, 4  ;;  %v2613_v47 = vrot.slane %v2611_v19, 4  ;;  %v2579_v27 = vld [vmem:[#allocation2 + $0x24] sm:$0xe] }
  0x9b   : > { %v2346_v18 = vrot.slane %v2344_v40, 4  ;;  %v2349_v29 = vrot.slane %v2347_v5, 5  ;;  %v1218_v30 = vsel %vm5728_vm12, %v1213_v11, %v1217_v22  ;;  %v4263_v54 = vcombine.low %v5389_v12, %v6088_v38  ;;  %v6123_v12 = vld [vmem:[#allocation2 + $0x1c] sm:$0xf] }
  0x9c   : > { %v2360_v58 = vor.u32 %v2359_v53, %v2355_v26  ;;  %v2365_v55 = vrot.slane %v2363_v24, 5  ;;  %v1228_v39 = vsel %vm5728_vm12, %v1223_v3, %v1227_v45  ;;  %v2612_v48 = vsel %vm6056_vm15, %v4383_v35, %v2611_v19  ;;  %v2580_v24 = vld [vmem:[#allocation2 + $0x30] sm:$0xe]  ;;  %v5391_v3 = vld [vmem:[#allocation2 + $0xc] sm:$0xf] }
  0x9d   : > { %v2350_v22 = vor.u32 %v2349_v29, %v2346_v18  ;;  %v4254_v44 = vcombine.low %v1218_v30, %v1228_v39  ;;  %v2615_v45 = vsel %vm6056_vm15, %v2613_v47, %v2614_v33  ;;  %v2625_v10 = vrot.slane %v5810_v31, 5  ;;  %v6117_v47 = vld [vmem:[#allocation2 + $0x10] sm:$0xf]  ;;  %v2581_v29 = vld [vmem:[#allocation2 + $0x3c] sm:$0xe]  ;;  %v5327_v39 = vld [vmem:[%s6733_s3 + $0x88] sm:$0xff]  }
  0x9e   : > { %v2361_v61 = vrot.slane %v2360_v58, 4  ;;  %v4407_v0 = vcombine.low %v2612_v48, %v2615_v45  ;;  %v4385_v19 = vrot.slane %v2579_v27, 9  ;;  %v2628_v31 = vrot.slane %v5812_v32, 5 }
  0x9f   : > { %v2351_v40 = vrot.slane %v2350_v22, 4  ;;  %4846 = vmatmul.mubr.bf16.gmra.mrb[12].mxu1 %v4254_v44  ;;  %v2627_v11 = vrot.slane %v2625_v10, 4  ;;  %v2632_v53 = vrot.slane %v5839_v6, 5  ;;  %v4264_v18 = vcombine.low %v5391_v3, %v6117_v47  ;;  %v2582_v22 = vld [vmem:[#allocation2 + $0x48] sm:$0xe] }
  0xa0   : > { %v2366_v5 = vsel %vm5728_vm12, %v2361_v61, %v2365_v55  ;;  %4865 = vmatprep.mubr.bf16.mxu1 %v4263_v54  ;;  %v2639_v30 = vrot.slane %v5951_v50, 5  ;;  %v2646_v6 = vrot.slane %v5971_v41, 5  ;;  %v6127_v54 = vld [vmem:[#allocation2 + $0x14] sm:$0x1]  ;;  %v2626_v50 = vsel %vm6056_vm15, %v4385_v19, %v2625_v10  ;;  %v2584_v19 = vld [vmem:[#allocation2 + $0x60] sm:$0xe] }
  0xa1   : > { %v2356_v35 = vsel %vm5728_vm12, %v2351_v40, %v2355_v26  ;;  %v5393_v26 = vld [vmem:[#allocation2 + $0x18] sm:$0xf]  ;;  %v1655_v58 = vrot.slane %v6127_v54, 5  ;;  %v4386_v55 = vrot.slane %v2580_v24, 9  ;;  %v2629_v44 = vsel %vm6056_vm15, %v2627_v11, %v2628_v31  ;;  %v2583_v40 = vld [vmem:[#allocation2 + $0x54] sm:$0xe] }
  0xa2   : > { %v4374_v33 = vcombine.low %v2356_v35, %v2366_v5  ;;  %v4265_v32 = vcombine.low %v5393_v26, %v6123_v12  ;;  %v2634_v61 = vrot.slane %v2632_v53, 4  ;;  %v2635_v41 = vrot.slane %v5841_v13, 5  ;;  %v6144_v24 = vld [vmem:[#allocation2 + $0x8] sm:$0x1] }
  0xa3   : > { %v4387_v48 = vrot.slane %v2581_v29, 9  ;;  %v2641_v45 = vrot.slane %v2639_v30, 4  ;;  %v2642_v27 = vrot.slane %v5953_v42, 5  ;;  %v4388_v10 = vrot.slane %v2582_v22, 9 }
  0xa4   : > { %4974 = vmatmul.mubr.bf16.gmra.mrb[12].mxu0 %v4374_v33  ;;  %v2648_v5 = vrot.slane %v2646_v6, 4  ;;  %v2649_v35 = vrot.slane %v5973_v43, 5  ;;  %v1648_v13 = vrot.slane %v6144_v24, 5  ;;  %v4409_v33 = vcombine.low %v2626_v50, %v2629_v44  ;;  %v5397_v43 = vld [vmem:[#allocation2 + $0x24] sm:$0xf] }
  0xa5   : > { %4993 = vmatprep.mubr.bf16.mxu0 %v4407_v0  ;;  %v2653_v0 = vrot.slane %v6026_v4, 5  ;;  %v6149_v11 = vsel %vm6056_vm15, %v4386_v55, %v2632_v53  ;;  %v6158_v42 = vsel %vm6056_vm15, %v2634_v61, %v2635_v41  ;;  %v6160_v4 = vld [vmem:[#allocation2 + $0x28] sm:$0xf]  ;;  %v5331_v53 = vld [vmem:[%s6733_s3 + $0x90] sm:$0xff]   ;;  %v6168_v3 = vsel %vm6056_vm15, %v4387_v48, %v2639_v30 }
  0xa6   : > { %v4266_v31 = vcombine.low %v5397_v43, %v6160_v4  ;;  %v6172_v29 = vsel %vm6056_vm15, %v2641_v45, %v2642_v27  ;;  %v4267_v26 = vcombine.low %v5875_v2, %v5882_v7  ;;  %v2660_v50 = vrot.slane %v6064_v63, 5  ;;  %v5333_v2 = vld [vmem:[%s6733_s3 + $0x98] sm:$0xff]   ;;  %v1616_v7 = vld [vmem:[#allocation2] sm:$0xe] }
  0xa7   : > { %4866 = vmatmul.mubr.bf16.vlgmr.msra.gmra.mrb[0].mxu1 %v4264_v18  ;;  %v4389_v18 = vrot.slane %v2583_v40, 9  ;;  %v6183_v30 = vsel %vm6056_vm15, %v4388_v10, %v2646_v6  ;;  %v6187_v55 = vsel %vm6056_vm15, %v2648_v5, %v2649_v35  ;;  %v2655_v22 = vrot.slane %v2653_v0, 4  ;;  %v1621_v6 = vld [vmem:[#allocation2 + $0x3c] sm:$0xe]  ;;  %v6218_v45 = vld [vmem:[#allocation2 + $0x18] sm:$0xe] }
  0xa8   : > { %4882 = vmatpush3.bf16.msra.mxu1 %v5942_v25  ;;  %4869 = vmatprep.mubr.bf16.mxu1 %v4265_v32  ;;  %v5322_v25 = vld [vmem:[%s6733_s3 + $0x188] sm:$0xff]   ;;  %v2656_v32 = vrot.slane %v6028_v8, 5  ;;  %v4390_v44 = vrot.slane %v2584_v19, 9  ;;  %v5326_v8 = vld [vmem:[%s6733_s3 + $0x190] sm:$0xff]   ;;  %v4410_v63 = vcombine.low %v6149_v11, %v6158_v42  ;;  %v4411_v57 = vcombine.low %v6168_v3, %v6172_v29  ;;  %v5337_v27 = vld [vmem:[%s6733_s3 + $0xa0] sm:$0xff]  }
  0xa9   : > { %4883 = vmatprep.subr.bf16.mxu1 %v5327_v39  ;;  %v2663_v20 = vrot.slane %v6073_v16, 5  ;;  %v6214_v61 = vsel %vm6056_vm15, %v4389_v18, %v2653_v0  ;;  %v2662_v41 = vrot.slane %v2660_v50, 4  ;;  %v4269_v48 = vcombine.low %v5988_v36, %v5995_v49  ;;  %v5328_v16 = vld [vmem:[%s6733_s3 + $0x198] sm:$0xff]   ;;  %v633_v35 = vld [vmem:[#allocation2 + $0x6c] sm:$0x1] }
  0xaa   : > { %v6228_v40 = vsel %vm6056_vm15, %v2655_v22, %v2656_v32  ;;  %v6232_v36 = vsel %vm6056_vm15, %v4390_v44, %v2660_v50  ;;  %v4270_v10 = vcombine.low %v6037_v28, %v6043_v52  ;;  %v4279_v5 = vrot.slane %v1616_v7, 9  ;;  %v1622_v3 = vld [vmem:[#allocation2 + $0x48] sm:$0xe]  ;;  %v1620_v28 = vld [vmem:[#allocation2 + $0x30] sm:$0xe] }
  0xab   : > { %v1645_v0 = vrot.slane %v6088_v38, 5  ;;  %v1680_v11 = vrot.slane %v5960_v37, 5  ;;  %v1652_v42 = vrot.slane %v6117_v47, 5  ;;  %v1683_v43 = vrot.slane %v5963_v51, 5  ;;  %v5339_v22 = vld [vmem:[%s6733_s3 + $0xa8] sm:$0xff]  }
  0xac   : > { %4994 = vmatmul.mubr.bf16.vlgmr.msra.gmra.mrb[0].mxu0 %v4408_v59  ;;  %4884 = vmatpush3.bf16.msra.mxu1 %v5327_v39  ;;  %v6208_v59 = vld [vmem:[#allocation2 + $0xc] sm:$0xe]  ;;  %v4412_v39 = vcombine.low %v6183_v30, %v6187_v55  ;;  %v4413_v38 = vcombine.low %v6214_v61, %v6228_v40  ;;  %v6249_v18 = vsel %vm6056_vm15, %v2662_v41, %v2663_v20  ;;  %v1659_v29 = vrot.slane %v6123_v12, 5  ;;  %v5340_v12 = vld [vmem:[%s6733_s3 + $0x1b8] sm:$0xff]  }
  0xad   : > { %5010 = vmatpush3.bf16.msra.mxu0 %v5854_v9  ;;  %4997 = vmatprep.mubr.bf16.mxu0 %v4409_v33  ;;  %v4268_v9 = vcombine.low %v5948_v1, %v5960_v37  ;;  %v4616_v1 = vld [vmem:[%s444_s19] sm:$0xff]   ;;  %v4280_v19 = vrot.slane %v6208_v59, 9  ;;  %v4284_v33 = vrot.slane %v1621_v6, 9  ;;  %v4281_v37 = vrot.slane %v6218_v45, 9  ;;  %v5344_v45 = vld [vmem:[#allocation2 + $0x18] sm:$0xff]  }
  0xae   : > { %5011 = vmatprep.subr.bf16.mxu0 %v5322_v25  ;;  %4885 = vmatprep.subr.bf16.mxu1 %v5331_v53  ;;  %v6264_v44 = vsel %vm6056_vm15, %v4279_v5, %v1645_v0  ;;  %v634_v7 = vsel %vm5585_vm3, 0, %v633_v35  ;;  %v600_v20 = vstv %s6241_s13  ;;  %v1687_v6 = vrot.slane %v5995_v49, 5 }
  0xaf   : > { %4870 = vmatmul.mubr.bf16.gmra.mrb[4].mxu1 %v4266_v31  ;;  %v4617_v31 = vunpack.c.l.bf16 %v4616_v1  ;;  %v6255_v51 = vsel %vm6056_vm15, %v4284_v33, %v1680_v11  ;;  %635 = vst [vmem:[#allocation2 + $0x6c] sm:$0x1] %v634_v7  ;;  %v1694_v33 = vrot.slane %v6043_v52, 5  ;;  %v1654_v49 = vrot.slane %v1652_v42, 4 }
  0xb0   : > { %4886 = vmatpush3.bf16.msra.mxu1 %v5331_v53  ;;  %4873 = vmatprep.mubr.bf16.mxu1 %v4267_v26  ;;  %v4618_v53 = vunpack.c.h.bf16 %v4616_v1  ;;  %v1682_v26 = vrot.slane %v1680_v11, 4  ;;  %v1690_v1 = vrot.slane %v6005_v15, 5  ;;  %vm6300_vm1 = vcmp.eq.s32.totalorder %v600_v20, 1 }
  0xb1   : > { %5012 = vmatpush3.bf16.msra.mxu0 %v5322_v25  ;;  %4887 = vmatprep.subr.bf16.mxu1 %v5333_v2  ;;  %v1623_v25 = vld [vmem:[#allocation2 + $0x54] sm:$0xe]  ;;  %v586_v32 = vmul.f32 %v5923_v60, %v4617_v31  ;;  %v1661_v11 = vrot.slane %v1659_v29, 4  ;;  %v1660_v47 = vsel %vm6056_vm15, %v4281_v37, %v1659_v29 }
  0xb2   : > { %5013 = vmatprep.subr.bf16.mxu0 %v5326_v8  ;;  %v587_v50 = vmul.f32 %v5923_v60, %v4618_v53  ;;  %v5332_v60 = vld [vmem:[%s6733_s3 + $0x1a0] sm:$0xff]   ;;  %v4286_v40 = vrot.slane %v1623_v25, 9  ;;  %v5400_v37 = vld [vmem:[#allocation2 + $0x34] sm:$0xf] }
  0xb3   : > { %v1673_v29 = vrot.slane %v5400_v37, 5 }
  0xb4   : > { %4998 = vmatmul.mubr.bf16.gmra.mrb[4].mxu0 %v4410_v63  ;;  %4888 = vmatpush3.bf16.msra.mxu1 %v5333_v2  ;;  %v1647_v2 = vrot.slane %v1645_v0, 4  ;;  %v4285_v63 = vrot.slane %v1622_v3, 9  ;;  %v589_v41 = vadd.f32 %v5897_v21, %v587_v50  ;;  %v1689_v0 = vrot.slane %v1687_v6, 4  ;;  %v5347_v50 = vld [vmem:[%s6733_s3 + $0xb8] sm:$0xff]  }
  0xb5   : > { %5014 = vmatpush3.bf16.msra.mxu0 %v5326_v8  ;;  %5001 = vmatprep.mubr.bf16.mxu0 %v4411_v57  ;;  %v6273_v8 = vsel %vm6056_vm15, %v1682_v26, %v1683_v43  ;;  %v588_v57 = vadd.f32 %v5897_v21, %v586_v32  ;;  %v5399_v43 = vld [vmem:[#allocation2 + $0x20] sm:$0x1]  ;;  %v4414_v32 = vcombine.low %v6232_v36, %v6249_v18 }
  0xb6   : > { %5015 = vmatprep.subr.bf16.mxu0 %v5328_v16  ;;  %4889 = vmatprep.subr.bf16.mxu1 %v5337_v27  ;;  %v4308_v61 = vcombine.low %v6255_v51, %v6273_v8  ;;  %v6284_v35 = vsel %vm6056_vm15, %v4285_v63, %v1687_v6  ;;  %v1649_v21 = vsel %vm6056_vm15, %v1647_v2, %v1648_v13  ;;  %v591_v15 = vmax.f32 %v589_v41, 0.0  ;;  %v987_v41 = vld [vmem:[#allocation2 + $0x6c] sm:$0xf]  ;;  %v5362_v51 = vld [vmem:[#allocation2 + $0x60] sm:$0xff]  }
  0xb7   : > { %4874 = vmatmul.mubr.bf16.gmra.mrb[8].mxu1 %v4268_v9  ;;  %v590_v5 = vmax.f32 %v588_v57, 0.0  ;;  %v1697_v9 = vrot.slane %v6045_v46, 5  ;;  %v6306_v13 = vsel %vm6056_vm15, %v1689_v0, %v1690_v1  ;;  %v6310_v46 = vsel %vm6056_vm15, %v4286_v40, %v1694_v33  ;;  %v5401_v57 = vld [vmem:[#allocation2 + $0x2c] sm:$0x1]  ;;  %v5345_v1 = vld [vmem:[%s6733_s3 + $0x1c0] sm:$0xff]  }
  0xb8   : > { %4890 = vmatpush3.bf16.msra.mxu1 %v5337_v27  ;;  %4877 = vmatprep.mubr.bf16.mxu1 %v4269_v48  ;;  %v5334_v48 = vld [vmem:[%s6733_s3 + $0x1a8] sm:$0xff]   ;;  %v1696_v27 = vrot.slane %v1694_v33, 4  ;;  %v1662_v31 = vrot.slane %v5399_v43, 5  ;;  %v4309_v3 = vcombine.low %v6284_v35, %v6306_v13  ;;  %v4303_v25 = vcombine.low %v6264_v44, %v1649_v21  ;;  %v5367_v13 = vld [vmem:[%s6733_s3 + $0xf0] sm:$0xff]  }
  0xb9   : > { %5016 = vmatpush3.bf16.msra.mxu0 %v5328_v16  ;;  %4891 = vmatprep.subr.bf16.mxu1 %v5339_v22  ;;  %v5343_v16 = vld [vmem:[%s6733_s3 + $0xb0] sm:$0xff]   ;;  %v592_v53 = vpack.c.bf16 %v591_v15, %v590_v5  ;;  %v1653_v36 = vsel %vm6056_vm15, %v4280_v19, %v1652_v42  ;;  %v1619_v19 = vld [vmem:[#allocation2 + $0x24] sm:$0xe]  ;;  %v1666_v42 = vrot.slane %v6160_v4, 5  ;;  %v1669_v20 = vrot.slane %v5401_v57, 5  ;;  %v5353_v40 = vld [vmem:[%s6733_s3 + $0xc8] sm:$0xff]  }
  0xba   : > { %5017 = vmatprep.subr.bf16.mxu0 %v5332_v60  ;;  %v6322_v26 = vsel %vm6056_vm15, %v1696_v27, %v1697_v9  ;;  %v1663_v59 = vsel %vm6056_vm15, %v1661_v11, %v1662_v31  ;;  %v5349_v4 = vld [vmem:[%s6733_s3 + $0xc0] sm:$0xff]   ;;  %v4282_v44 = vrot.slane %v1619_v19, 9  ;;  %v4283_v6 = vrot.slane %v1620_v28, 9  ;;  %v5402_v15 = vld [vmem:[#allocation2 + $0x38] sm:$0x1]  ;;  %v5360_v35 = vld [vmem:[%s6733_s3 + $0x1e8] sm:$0xff]  }
  0xbb   : > { %v602_v30 = vsel %vm6300_vm1, 0, %v592_v53  ;;  %v4310_v55 = vcombine.low %v6310_v46, %v6322_v26  ;;  %v1668_v5 = vrot.slane %v1666_v42, 4  ;;  %v1676_v9 = vrot.slane %v5402_v15, 5  ;;  %v6377_v27 = vld [vmem:[#allocation2 + $0x1c] sm:$0xf]  ;;  %v5346_v11 = vld [vmem:[#allocation2 + $0x24] sm:$0xff]  }
  0xbc   : > { %5002 = vmatmul.mubr.bf16.gmra.mrb[8].mxu0 %v4412_v39  ;;  %4892 = vmatpush3.bf16.msra.mxu1 %v5339_v22  ;;  %v5338_v39 = vld [vmem:[%s6733_s3 + $0x1b0] sm:$0xff]   ;;  %v4230_v18 = vcombine.high %v602_v30, %v602_v30  ;;  %v1656_v22 = vsel %vm6056_vm15, %v1654_v49, %v1655_v58  ;;  %v1675_v49 = vrot.slane %v1673_v29, 4  ;;  %v1667_v43 = vsel %vm6056_vm15, %v4282_v44, %v1666_v42  ;;  %v6401_v19 = vld [vmem:[#allocation2 + $0x20] sm:$0x1]  ;;  %v6403_v42 = vld [vmem:[#allocation2 + $0x28] sm:$0xf] }
  0xbd   : > { %5018 = vmatpush3.bf16.msra.mxu0 %v5332_v60  ;;  %5005 = vmatprep.mubr.bf16.mxu0 %v4413_v38  ;;  %v4229_v38 = vcombine.low %v602_v30, %v602_v30  ;;  %v4304_v63 = vcombine.low %v1653_v36, %v1656_v22  ;;  %v4305_v60 = vcombine.low %v1660_v47, %v1663_v59  ;;  %v5348_v30 = vld [vmem:[%s6733_s3 + $0x1c8] sm:$0xff]   ;;  %v3156_v36 = vshrl.u32 %v6377_v27, 16  ;;  %v5351_v22 = vld [vmem:[%s6733_s3 + $0x1d0] sm:$0xff]   ;;  %v5359_v47 = vld [vmem:[%s6733_s3 + $0xd8] sm:$0xff]  }
  0xbe   : > { %5019 = vmatprep.subr.bf16.mxu0 %v5334_v48  ;;  %4893 = vmatprep.subr.bf16.mxu1 %v5343_v16  ;;  %v978_v58 = vshll.u32 %v4230_v18, 16  ;;  %v1670_v31 = vsel %vm6056_vm15, %v1668_v5, %v1669_v20  ;;  %v1674_v56 = vsel %vm6056_vm15, %v4283_v6, %v1673_v29  ;;  %v1677_v53 = vsel %vm6056_vm15, %v1675_v49, %v1676_v9  ;;  %v5354_v57 = vld [vmem:[%s6733_s3 + $0x1d8] sm:$0xff]   ;;  %v5361_v20 = vld [vmem:[%s6733_s3 + $0xe0] sm:$0xff]   ;;  %v6417_v5 = vld [vmem:[#allocation2 + $0x34] sm:$0xf] }
  0xbf   : > { %4878 = vmatmul.mubr.bf16.gmra.mrb[12].mxu1 %v4270_v10  ;;  %v967_v52 = vshrl.u32 %v4229_v38, 16  ;;  %v970_v54 = vshll.u32 %v4229_v38, 16  ;;  %v975_v10 = vshrl.u32 %v4230_v18, 16  ;;  %v3121_v38 = vld [vmem:[#allocation2 + $0x24] sm:$0xf]  ;;  %v4306_v18 = vcombine.low %v1667_v43, %v1670_v31 }
  0xc0   : > { %4894 = vmatpush3.bf16.msra.mxu1 %v5343_v16  ;;  %4897 = vmatprep.mubr.bf16.mxu1 %v4303_v25  ;;  %v4307_v59 = vcombine.low %v1674_v56, %v1677_v53  ;;  %v3176_v37 = vshll.u32 %v6403_v42, 16  ;;  %v3180_v29 = vshrl.u32 %v6403_v42, 16  ;;  %v6424_v49 = vld [vmem:[#allocation2 + $0x2c] sm:$0x1]  ;;  %v5357_v43 = vld [vmem:[%s6733_s3 + $0x1e0] sm:$0xff]  }
  0xc1   : > { %5020 = vmatpush3.bf16.msra.mxu0 %v5334_v48  ;;  %4895 = vmatprep.subr.bf16.mxu1 %v5347_v50  ;;  %v969_v2 = vrot.slane %v967_v52, 7  ;;  %v6364_v7 = vrot.slane %v975_v10, 7  ;;  %v3118_v48 = vld [vmem:[#allocation2 + $0x18] sm:$0xf]  ;;  %v3167_v10 = vshrl.u32 %v3121_v38, 16 }
  0xc2   : > { %5021 = vmatprep.subr.bf16.mxu0 %v5338_v39  ;;  %v3143_v25 = vshrl.u32 %v3118_v48, 16 }
  0xc3   : > { %v972_v0 = vor.u32 %v970_v54, %v969_v2  ;;  %v973_v33 = vrot.slane %v969_v2, 4  ;;  %v980_v21 = vor.u32 %v978_v58, %v6364_v7  ;;  %v3124_v58 = vld [vmem:[#allocation2 + $0x30] sm:$0xf] }
  0xc4   : > { %5006 = vmatmul.mubr.bf16.gmra.mrb[12].mxu0 %v4414_v32  ;;  %4896 = vmatpush3.bf16.msra.mxu1 %v5347_v50  ;;  %v3146_v32 = vshll.u32 %v3118_v48, 16  ;;  %v3152_v50 = vshll.u32 %v6377_v27, 16  ;;  %v3145_v28 = vrot.slane %v3143_v25, 4  ;;  %v3191_v44 = vshrl.u32 %v3124_v58, 16 }
  0xc5   : > { %5022 = vmatpush3.bf16.msra.mxu0 %v5338_v39  ;;  %5025 = vmatprep.mubr.bf16.mxu0 %v5344_v45  ;;  %v981_v16 = vsel %vm5642_vm7, %v973_v33, %v980_v21  ;;  %v988_v24 = vsel %vm5653_vm8, %v972_v0, %v987_v41  ;;  %v5355_v39 = vld [vmem:[%s6733_s3 + $0xd0] sm:$0xff]   ;;  %v3170_v45 = vshll.u32 %v3121_v38, 16  ;;  %v3194_v2 = vshll.u32 %v3124_v58, 16  ;;  %v5365_v21 = vld [vmem:[%s6733_s3 + $0xe8] sm:$0xff]  }
  0xc6   : > { %5023 = vmatprep.subr.bf16.mxu0 %v5340_v12  ;;  %4913 = vmatprep.subr.bf16.mxu1 %v5349_v4  ;;  %989 = vst [vmem:[#allocation2 + $0x6c] sm:$0xf] %v988_v24  ;;  %990 = vst [vmem:[#allocation2 + $0x70] sm:$0xf] %v981_v16  ;;  %v3148_v52 = vrot.slane %v3146_v32, 5  ;;  %v6405_v54 = vrot.slane %v3152_v50, 5 }
  0xc7   : > { %4898 = vmatmul.mubr.bf16.vlgmr.msra.gmra.mrb[0].mxu1 %v4304_v63  ;;  %v5356_v63 = vld [vmem:[#allocation2 + $0x48] sm:$0xff]   ;;  %v6419_v0 = vrot.slane %v3176_v37, 5  ;;  %v3182_v33 = vrot.slane %v3180_v29, 4  ;;  %v3193_v15 = vrot.slane %v3191_v44, 4  ;;  %v3196_v9 = vrot.slane %v3194_v2, 5 }
  0xc8   : > { %4914 = vmatpush3.bf16.msra.mxu1 %v5349_v4  ;;  %4901 = vmatprep.mubr.bf16.mxu1 %v4305_v60  ;;  %v5352_v4 = vld [vmem:[#allocation2 + $0x3c] sm:$0xff]   ;;  %v3162_v60 = vshll.u32 %v6401_v19, 16  ;;  %v3149_v6 = vor.u32 %v3148_v52, %v3145_v28  ;;  %v3200_v48 = vshll.u32 %v6417_v5, 16  ;;  %v3204_v16 = vshrl.u32 %v6417_v5, 16  ;;  %v6438_v50 = vld [vmem:[#allocation2 + $0x38] sm:$0x1] }
  0xc9   : > { %5024 = vmatpush3.bf16.msra.mxu0 %v5340_v12  ;;  %4915 = vmatprep.subr.bf16.mxu1 %v5353_v40  ;;  %v3158_v12 = vrot.slane %v3156_v36, 4  ;;  %v3127_v24 = vld [vmem:[#allocation2 + $0x3c] sm:$0xf]  ;;  %v3183_v25 = vor.u32 %v3182_v33, %v6419_v0  ;;  %v3186_v32 = vshll.u32 %v6424_v49, 16  ;;  %v3130_v52 = vld [vmem:[#allocation2 + $0x48] sm:$0xf] }
  0xca   : > { %5041 = vmatprep.subr.bf16.mxu0 %v5345_v1  ;;  %v3150_v31 = vrot.slane %v3149_v6, 4  ;;  %v3215_v36 = vshrl.u32 %v3127_v24, 16  ;;  %v3218_v38 = vshll.u32 %v3127_v24, 16  ;;  %v6444_v8 = vrot.slane %v3200_v48, 5  ;;  %v3133_v48 = vld [vmem:[#allocation2 + $0x54] sm:$0xf] }
  0xcb   : > { %v3159_v41 = vor.u32 %v3158_v12, %v6405_v54  ;;  %v6462_v58 = vrot.slane %v3186_v32, 5  ;;  %v3210_v12 = vshll.u32 %v6438_v50, 16  ;;  %v3242_v6 = vshll.u32 %v3130_v52, 16  ;;  %v5366_v24 = vld [vmem:[%s6733_s3 + $0x1f8] sm:$0xff]   ;;  %v6509_v32 = vld [vmem:[#allocation2 + $0x64] sm:$0xf] }
  0xcc   : > { %5026 = vmatmul.mubr.bf16.vlgmr.msra.gmra.mrb[0].mxu0 %v5346_v11  ;;  %4916 = vmatpush3.bf16.msra.mxu1 %v5353_v40  ;;  %v3172_v40 = vrot.slane %v3170_v45, 5  ;;  %v6428_v11 = vld [vmem:[#allocation2 + $0x40] sm:$0xf]  ;;  %v6465_v45 = vld [vmem:[#allocation2 + $0x4c] sm:$0xf]  ;;  %v3220_v44 = vrot.slane %v3218_v38, 5 }
  0xcd   : > { %5042 = vmatpush3.bf16.msra.mxu0 %v5345_v1  ;;  %5029 = vmatprep.mubr.bf16.mxu0 %v5350_v62  ;;  %v3169_v1 = vrot.slane %v3167_v10, 4  ;;  %v3160_v56 = vrot.slane %v3159_v41, 4  ;;  %v3164_v62 = vrot.slane %v3162_v60, 5  ;;  %v6460_v10 = vrot.slane %v3183_v25, 4  ;;  %v5363_v41 = vld [vmem:[%s6733_s3 + $0x1f0] sm:$0xff]  }
  0xce   : > { %5043 = vmatprep.subr.bf16.mxu0 %v5348_v30  ;;  %4917 = vmatprep.subr.bf16.mxu1 %v5355_v39  ;;  %v982_v33 = vrot.slane %v6364_v7, 4  ;;  %v3234_v7 = vshll.u32 %v6477_v23, 16  ;;  %v3244_v25 = vrot.slane %v3242_v6, 5  ;;  %v3263_v38 = vshrl.u32 %v3133_v48, 16 }
  0xcf   : > { %4902 = vmatmul.mubr.bf16.gmra.mrb[4].mxu1 %v4306_v18  ;;  %v3173_v53 = vor.u32 %v3172_v40, %v3169_v1  ;;  %v3224_v18 = vshll.u32 %v6428_v11, 16  ;;  %v3248_v1 = vshll.u32 %v6465_v45, 16  ;;  %v3252_v40 = vshrl.u32 %v6465_v45, 16 }
  0xd0   : > { %4918 = vmatpush3.bf16.msra.mxu1 %v5355_v39  ;;  %4905 = vmatprep.mubr.bf16.mxu1 %v4307_v59  ;;  %v3197_v39 = vor.u32 %v3196_v9, %v3193_v15  ;;  %v3165_v59 = vsel %vm5728_vm12, %v3160_v56, %v3164_v62  ;;  %v6492_v9 = vrot.slane %v3210_v12, 5  ;;  %v3189_v46 = vsel %vm5728_vm12, %v6460_v10, %v6462_v58 }
  0xd1   : > { %5044 = vmatpush3.bf16.msra.mxu0 %v5348_v30  ;;  %4919 = vmatprep.subr.bf16.mxu1 %v5359_v47  ;;  %v5358_v30 = vld [vmem:[#allocation2 + $0x54] sm:$0xff]   ;;  %v6458_v28 = vrot.slane %v3173_v53, 4  ;;  %v6471_v2 = vrot.slane %v3224_v18, 5  ;;  %v3266_v18 = vshll.u32 %v3133_v48, 16  ;;  %v3236_v12 = vrot.slane %v3234_v7, 5 }
  0xd2   : > { %5045 = vmatprep.subr.bf16.mxu0 %v5351_v22  ;;  %v6469_v29 = vrot.slane %v3197_v39, 4  ;;  %v6513_v39 = vrot.slane %v3248_v1, 5  ;;  %v6538_v1 = vld [vmem:[#allocation2 + $0x68] sm:$0x1] }
  0xd3   : > { %v3179_v15 = vsel %vm5728_vm12, %v6458_v28, %v6419_v0  ;;  %v6506_v0 = vld [vmem:[#allocation2 + $0x58] sm:$0xf]  ;;  %v3300_v28 = vshrl.u32 %v6509_v32, 16 }
  0xd4   : > { %5030 = vmatmul.mubr.bf16.gmra.mrb[4].mxu0 %v5352_v4  ;;  %4920 = vmatpush3.bf16.msra.mxu1 %v5359_v47  ;;  %v3228_v47 = vshrl.u32 %v6428_v11, 16  ;;  %v3217_v4 = vrot.slane %v3215_v36, 4  ;;  %v3203_v26 = vsel %vm5728_vm12, %v6469_v29, %v6444_v8  ;;  %v3254_v36 = vrot.slane %v3252_v40, 4 }
  0xd5   : > { %5046 = vmatpush3.bf16.msra.mxu0 %v5351_v22  ;;  %5033 = vmatprep.mubr.bf16.mxu0 %v5356_v63  ;;  %v665_v22 = vld [vmem:[#allocation2 + $0x74] sm:$0x1]  ;;  %v5369_v63 = vld [vmem:[%s6733_s3 + $0xf8] sm:$0xff]  }
  0xd6   : > { %5047 = vmatprep.subr.bf16.mxu0 %v5354_v57  ;;  %4921 = vmatprep.subr.bf16.mxu1 %v5361_v20  ;;  %v666_v37 = vsel %vm5598_vm4, 0, %v665_v22  ;;  %v3272_v22 = vshll.u32 %v6506_v0, 16  ;;  %v3255_v29 = vor.u32 %v3254_v36, %v6513_v39 }
  0xd7   : > { %4906 = vmatmul.mubr.bf16.gmra.mrb[8].mxu1 %v4308_v61  ;;  %v3206_v61 = vrot.slane %v3204_v16, 4  ;;  %667 = vst [vmem:[#allocation2 + $0x74] sm:$0x1] %v666_v37  ;;  %v5364_v16 = vld [vmem:[#allocation2 + $0x6c] sm:$0xff]  }
  0xd8   : > { %4922 = vmatpush3.bf16.msra.mxu1 %v5361_v20  ;;  %4909 = vmatprep.mubr.bf16.mxu1 %v4309_v3  ;;  %v3155_v3 = vsel %vm5728_vm12, %v3150_v31, %v6405_v54  ;;  %v5371_v54 = vld [vmem:[#allocation2 + $0xc] sm:$0xff]   ;;  %v3239_v20 = vshrl.u32 %v3130_v52, 16  ;;  %v5372_v31 = vld [vmem:[#allocation2 + $0x18] sm:$0xff]   ;;  %v3256_v7 = vrot.slane %v3255_v29, 4 }
  0xd9   : > { %5048 = vmatpush3.bf16.msra.mxu0 %v5354_v57  ;;  %4923 = vmatprep.subr.bf16.mxu1 %v5365_v21  ;;  %v3207_v60 = vor.u32 %v3206_v61, %v6444_v8  ;;  %v3230_v57 = vrot.slane %v3228_v47, 4 }
  0xda   : > { %5049 = vmatprep.subr.bf16.mxu0 %v5357_v43  ;;  %v3241_v53 = vrot.slane %v3239_v20, 4 }
  0xdb   : > { %v3208_v56 = vrot.slane %v3207_v60, 4  ;;  %v3231_v62 = vor.u32 %v3230_v57, %v6471_v2  ;;  %v6536_v60 = vrot.slane %v3272_v22, 5 }
  0xdc   : > { %5034 = vmatmul.mubr.bf16.gmra.mrb[8].mxu0 %v5358_v30  ;;  %4924 = vmatpush3.bf16.msra.mxu1 %v5365_v21  ;;  %v4471_v21 = vcombine.low %v3155_v3, %v3165_v59  ;;  %v6511_v30 = vld [vmem:[#allocation2 + $0x50] sm:$0x1]  ;;  %v5375_v3 = vld [vmem:[#allocation2 + $0x24] sm:$0xff]   ;;  %v3296_v59 = vshll.u32 %v6509_v32, 16  ;;  %v3245_v17 = vor.u32 %v3244_v25, %v3241_v53  ;;  %v5379_v25 = vld [vmem:[#allocation2 + $0x3c] sm:$0xff]  }
  0xdd   : > { %5050 = vmatpush3.bf16.msra.mxu0 %v5357_v43  ;;  %5037 = vmatprep.mubr.bf16.mxu0 %v5362_v51  ;;  %v3136_v43 = vld [vmem:[#allocation2 + $0x60] sm:$0xf]  ;;  %v3276_v51 = vshrl.u32 %v6506_v0, 16  ;;  %v3213_v10 = vsel %vm5728_vm12, %v3208_v56, %v6492_v9  ;;  %v3232_v58 = vrot.slane %v3231_v62, 4  ;;  %v3258_v37 = vshll.u32 %v6511_v30, 16  ;;  %v5373_v53 = vld [vmem:[%s6733_s3 + $0x210] sm:$0xff]  }
  0xde   : > { %5051 = vmatprep.subr.bf16.mxu0 %v5360_v35  ;;  %4925 = vmatprep.subr.bf16.mxu1 %v5367_v13  ;;  %v3287_v8 = vshrl.u32 %v3136_v43, 16  ;;  %v3290_v61 = vshll.u32 %v3136_v43, 16  ;;  %v991_v47 = vld [vmem:[#allocation2 + $0x74] sm:$0x1]  ;;  %v6540_v40 = vrot.slane %v3296_v59, 5  ;;  %v4473_v9 = vcombine.low %v3203_v26, %v3213_v10 }
  0xdf   : > { %4910 = vmatmul.mubr.bf16.gmra.mrb[12].mxu1 %v4310_v55  ;;  %v3221_v55 = vor.u32 %v3220_v44, %v3217_v4  ;;  %v992_v52 = vsel %vm5585_vm3, %v982_v33, %v991_v47  ;;  %v3265_v4 = vrot.slane %v3263_v38, 4  ;;  %v3268_v44 = vrot.slane %v3266_v18, 5 }
  0xe0   : > { %4926 = vmatpush3.bf16.msra.mxu1 %v5367_v13  ;;  %4929 = vmatprep.mubr.bf16.mxu1 %v5371_v54  ;;  %993 = vst [vmem:[#allocation2 + $0x74] sm:$0x1] %v992_v52  ;;  %v6531_v54 = vld [vmem:[%s6733_s3 + $0x208] sm:$0xff]   ;;  %v3278_v57 = vrot.slane %v3276_v51, 4  ;;  %v3289_v20 = vrot.slane %v3287_v8, 4  ;;  %v3292_v6 = vrot.slane %v3290_v61, 5 }
  0xe1   : > { %5052 = vmatpush3.bf16.msra.mxu0 %v5360_v35  ;;  %4927 = vmatprep.subr.bf16.mxu1 %v5369_v63  ;;  %v5368_v35 = vld [vmem:[%s6733_s3 + $0x200] sm:$0xff]   ;;  %v3222_v13 = vrot.slane %v3221_v55, 4  ;;  %v3302_v33 = vrot.slane %v3300_v28, 4  ;;  %v3246_v55 = vrot.slane %v3245_v17, 4  ;;  %v3269_v43 = vor.u32 %v3268_v44, %v3265_v4  ;;  %v3548_v4 = vld [vmem:[#allocation2 + $0x48] sm:$0xe] }
  0xe2   : > { %5053 = vmatprep.subr.bf16.mxu0 %v5363_v41  ;;  %v3279_v26 = vor.u32 %v3278_v57, %v6536_v60  ;;  %v3293_v56 = vor.u32 %v3292_v6, %v3289_v20  ;;  %v3606_v17 = vrot.slane %v6465_v45, 5  ;;  %v5380_v20 = vld [vmem:[#allocation2 + $0x48] sm:$0xff]   ;;  %v5377_v45 = vld [vmem:[%s6733_s3 + $0x220] sm:$0xff]  }
  0xe3   : > { %v3227_v48 = vsel %vm5728_vm12, %v3222_v13, %v6471_v2  ;;  %v3306_v2 = vshll.u32 %v6538_v1, 16  ;;  %v3303_v36 = vor.u32 %v3302_v33, %v6540_v40  ;;  %v3251_v8 = vsel %vm5728_vm12, %v3246_v55, %v6513_v39  ;;  %v5383_v33 = vld [vmem:[#allocation2 + $0x54] sm:$0xff]   ;;  %v5378_v55 = vld [vmem:[%s6733_s3 + $0x228] sm:$0xff]  }
  0xe4   : > { %5038 = vmatmul.mubr.bf16.gmra.mrb[12].mxu0 %v5364_v16  ;;  %4928 = vmatpush3.bf16.msra.mxu1 %v5369_v63  ;;  %v6534_v63 = vld [vmem:[#allocation2 + $0x5c] sm:$0x1]  ;;  %v3237_v16 = vsel %vm5728_vm12, %v3232_v58, %v3236_v12  ;;  %v3270_v47 = vrot.slane %v3269_v43, 4  ;;  %v3294_v59 = vrot.slane %v3293_v56, 4  ;;  %v3549_v56 = vld [vmem:[#allocation2 + $0x54] sm:$0xe] }
  0xe5   : > { %5054 = vmatpush3.bf16.msra.mxu0 %v5363_v41  ;;  %5057 = vmatprep.mubr.bf16.mxu0 %v4471_v21  ;;  %v4472_v41 = vcombine.low %v3179_v15, %v3189_v46  ;;  %v3139_v21 = vld [vmem:[#allocation2 + $0x6c] sm:$0xf]  ;;  %v3260_v15 = vrot.slane %v3258_v37, 5  ;;  %v6548_v46 = vld [vmem:[#allocation2 + $0x70] sm:$0xf]  ;;  %v4474_v51 = vcombine.low %v3227_v48, %v3237_v16  ;;  %v3308_v28 = vrot.slane %v3306_v2, 5 }
  0xe6   : > { %5055 = vmatprep.subr.bf16.mxu0 %v5366_v24  ;;  %5105 = vmatprep.subr.bf16.mxu1 %v5368_v35  ;;  %v3311_v62 = vshrl.u32 %v3139_v21, 16  ;;  %v3314_v38 = vshll.u32 %v3139_v21, 16  ;;  %v3320_v18 = vshll.u32 %v6548_v46, 16  ;;  %v3324_v22 = vshrl.u32 %v6548_v46, 16 }
  0xe7   : > { %4930 = vmatmul.mubr.bf16.vlgmr.msra.gmra.mrb[0].mxu1 %v5372_v31  ;;  %v3282_v31 = vshll.u32 %v6534_v63, 16  ;;  %v3261_v61 = vsel %vm5728_vm12, %v3256_v7, %v3260_v15  ;;  %v3304_v10 = vrot.slane %v3303_v36, 4  ;;  %v6573_v29 = vld [vmem:[#allocation2 + $0x74] sm:$0x1]  ;;  %v3275_v44 = vsel %vm5728_vm12, %v3270_v47, %v6536_v60  ;;  %v3544_v7 = vld [vmem:[#allocation2 + $0x18] sm:$0xe] }
  0xe8   : > { %5113 = vmatpush3.bf16.msra.mxu1 %v5368_v35  ;;  %4933 = vmatprep.mubr.bf16.mxu1 %v5375_v3  ;;  %v5374_v3 = vld [vmem:[%s6733_s3 + $0x218] sm:$0xff]   ;;  %v3313_v52 = vrot.slane %v3311_v62, 4  ;;  %v3316_v58 = vrot.slane %v3314_v38, 5  ;;  %v6569_v12 = vrot.slane %v3320_v18, 5  ;;  %v3326_v39 = vrot.slane %v3324_v22, 4  ;;  %v5384_v22 = vld [vmem:[#allocation2 + $0x60] sm:$0xff]  }
  0xe9   : > { %5056 = vmatpush3.bf16.msra.mxu0 %v5366_v24  ;;  %5106 = vmatprep.subr.bf16.mxu1 %v6531_v54  ;;  %v5376_v24 = vld [vmem:[#allocation2 + $0x30] sm:$0xff]   ;;  %v3284_v13 = vrot.slane %v3282_v31, 5  ;;  %v4475_v37 = vcombine.low %v3251_v8, %v3261_v61  ;;  %v3309_v6 = vsel %vm5728_vm12, %v3304_v10, %v3308_v28  ;;  %v3330_v21 = vshll.u32 %v6573_v29, 16  ;;  %v3550_v36 = vld [vmem:[#allocation2 + $0x60] sm:$0xe] }
  0xea   : > { %5073 = vmatprep.subr.bf16.mxu0 %v5368_v35  ;;  %v3327_v60 = vor.u32 %v3326_v39, %v6569_v12  ;;  %v3608_v48 = vrot.slane %v3606_v17, 4  ;;  %v3578_v16 = vrot.slane %v6377_v27, 5  ;;  %v3613_v15 = vrot.slane %v6506_v0, 5 }
  0xeb   : > { %v3620_v2 = vrot.slane %v6509_v32, 5  ;;  %v4487_v62 = vrot.slane %v3544_v7, 9  ;;  %v3616_v18 = vrot.slane %v6534_v63, 5  ;;  %v3545_v32 = vld [vmem:[#allocation2 + $0x24] sm:$0xe]  ;;  %v3585_v61 = vrot.slane %v6403_v42, 5 }
  0xec   : > { %5058 = vmatmul.mubr.bf16.vlgmr.msra.gmra.mrb[0].mxu0 %v4472_v41  ;;  %5114 = vmatpush3.bf16.msra.mxu1 %v6531_v54  ;;  %v3317_v41 = vor.u32 %v3316_v58, %v3313_v52  ;;  %v3615_v38 = vrot.slane %v3613_v15, 4  ;;  %v3592_v42 = vrot.slane %v6417_v5, 5  ;;  %v5382_v52 = vld [vmem:[%s6733_s3 + $0x238] sm:$0xff]   ;;  %v4488_v34 = vrot.slane %v3545_v32, 9  ;;  %v3546_v58 = vld [vmem:[#allocation2 + $0x30] sm:$0xe] }
  0xed   : > { %5074 = vmatpush3.bf16.msra.mxu0 %v5368_v35  ;;  %5061 = vmatprep.mubr.bf16.mxu0 %v4473_v9  ;;  %v3280_v35 = vrot.slane %v3279_v26, 4  ;;  %v4491_v9 = vrot.slane %v3548_v4, 9  ;;  %v3328_v26 = vrot.slane %v3327_v60, 4  ;;  %v3588_v10 = vrot.slane %v6424_v49, 5 }
  0xee   : > { %5075 = vmatprep.subr.bf16.mxu0 %v6531_v54  ;;  %5107 = vmatprep.subr.bf16.mxu1 %v5373_v53  ;;  %v3617_v39 = vsel %vm6056_vm15, %v3615_v38, %v3616_v18  ;;  %v3627_v5 = vrot.slane %v6548_v46, 5  ;;  %v3630_v60 = vrot.slane %v6573_v29, 5 }
  0xef   : > { %4934 = vmatmul.mubr.bf16.gmra.mrb[4].mxu1 %v5376_v24  ;;  %v3285_v57 = vsel %vm5728_vm12, %v3280_v35, %v3284_v13  ;;  %v3318_v24 = vrot.slane %v3317_v41, 4  ;;  %v3607_v27 = vsel %vm6056_vm15, %v4491_v9, %v3606_v17  ;;  %v4493_v13 = vrot.slane %v3550_v36, 9 }
  0xf0   : > { %5115 = vmatpush3.bf16.msra.mxu1 %v5373_v53  ;;  %4937 = vmatprep.mubr.bf16.mxu1 %v5379_v25  ;;  %v4476_v43 = vcombine.low %v3275_v44, %v3285_v57  ;;  %v3581_v25 = vrot.slane %v6401_v19, 5  ;;  %v4492_v19 = vrot.slane %v3549_v56, 9  ;;  %v3623_v35 = vrot.slane %v6538_v1, 5  ;;  %v3551_v44 = vld [vmem:[#allocation2 + $0x6c] sm:$0xe] }
  0xf1   : > { %5076 = vmatpush3.bf16.msra.mxu0 %v6531_v54  ;;  %5108 = vmatprep.subr.bf16.mxu1 %v5374_v3  ;;  %v3299_v54 = vsel %vm5728_vm12, %v3294_v59, %v6540_v40  ;;  %v3609_v40 = vrot.slane %v6511_v30, 5  ;;  %v3332_v30 = vrot.slane %v3330_v21, 5  ;;  %v3323_v8 = vsel %vm5728_vm12, %v3318_v24, %v6569_v12 }
  0xf2   : > { %5077 = vmatprep.subr.bf16.mxu0 %v5373_v53  ;;  %v4477_v31 = vcombine.low %v3299_v54, %v3309_v6  ;;  %v3579_v59 = vsel %vm6056_vm15, %v4487_v62, %v3578_v16  ;;  %v3614_v12 = vsel %vm6056_vm15, %v4492_v19, %v3613_v15  ;;  %v3587_v17 = vrot.slane %v3585_v61, 4 }
  0xf3   : > { %v3610_v0 = vsel %vm6056_vm15, %v3608_v48, %v3609_v40  ;;  %v3333_v63 = vsel %vm5728_vm12, %v3328_v26, %v3332_v30  ;;  %v3621_v4 = vsel %vm6056_vm15, %v4493_v13, %v3620_v2  ;;  %v4489_v57 = vrot.slane %v3546_v58, 9  ;;  %v3547_v40 = vld [vmem:[#allocation2 + $0x3c] sm:$0xe] }
  0xf4   : > { %5062 = vmatmul.mubr.bf16.gmra.mrb[4].mxu0 %v4474_v51  ;;  %5116 = vmatpush3.bf16.msra.mxu1 %v5374_v3  ;;  %v5381_v51 = vld [vmem:[%s6733_s3 + $0x230] sm:$0xff]   ;;  %v4515_v47 = vcombine.low %v3607_v27, %v3610_v0  ;;  %v4478_v1 = vcombine.low %v3323_v8, %v3333_v63  ;;  %v3595_v54 = vrot.slane %v6438_v50, 5  ;;  %v4494_v6 = vrot.slane %v3551_v44, 9 }
  0xf5   : > { %5078 = vmatpush3.bf16.msra.mxu0 %v5373_v53  ;;  %5065 = vmatprep.mubr.bf16.mxu0 %v4475_v37  ;;  %v3580_v53 = vrot.slane %v3578_v16, 4  ;;  %v3629_v41 = vrot.slane %v3627_v5, 4  ;;  %v3589_v21 = vsel %vm6056_vm15, %v3587_v17, %v3588_v10  ;;  %v3599_v9 = vrot.slane %v6428_v11, 5 }
  0xf6   : > { %5079 = vmatprep.subr.bf16.mxu0 %v5374_v3  ;;  %5109 = vmatprep.subr.bf16.mxu1 %v5377_v45  ;;  %v3593_v50 = vsel %vm6056_vm15, %v4489_v57, %v3592_v42  ;;  %v3628_v16 = vsel %vm6056_vm15, %v4494_v6, %v3627_v5  ;;  %v4490_v11 = vrot.slane %v3547_v40, 9 }
  0xf7   : > { %4938 = vmatmul.mubr.bf16.gmra.mrb[8].mxu1 %v5380_v20  ;;  %v3582_v28 = vsel %vm6056_vm15, %v3580_v53, %v3581_v25  ;;  %v3594_v20 = vrot.slane %v3592_v42, 4  ;;  %v3631_v15 = vsel %vm6056_vm15, %v3629_v41, %v3630_v60  ;;  %v3601_v7 = vrot.slane %v3599_v9, 4 }
  0xf8   : > { %5117 = vmatpush3.bf16.msra.mxu1 %v5377_v45  ;;  %4941 = vmatprep.mubr.bf16.mxu1 %v5383_v33  ;;  %v4511_v37 = vcombine.low %v3579_v59, %v3582_v28  ;;  %v3586_v33 = vsel %vm6056_vm15, %v4488_v34, %v3585_v61  ;;  %v3600_v24 = vsel %vm6056_vm15, %v4490_v11, %v3599_v9 }
  0xf9   : > { %5080 = vmatpush3.bf16.msra.mxu0 %v5374_v3  ;;  %5110 = vmatprep.subr.bf16.mxu1 %v5378_v55  ;;  %v3622_v3 = vrot.slane %v3620_v2, 4  ;;  %v3596_v48 = vsel %vm6056_vm15, %v3594_v20, %v3595_v54  ;;  %v4512_v29 = vcombine.low %v3586_v33, %v3589_v21 }
  0xfa   : > { %5081 = vmatprep.subr.bf16.mxu0 %v5377_v45 }
  0xfb   : > { %v3624_v49 = vsel %vm6056_vm15, %v3622_v3, %v3623_v35 }
  0xfc   : > { %5066 = vmatmul.mubr.bf16.gmra.mrb[8].mxu0 %v4476_v43  ;;  %5118 = vmatpush3.bf16.msra.mxu1 %v5378_v55  ;;  %v4517_v46 = vcombine.low %v3621_v4, %v3624_v49  ;;  %v3602_v43 = vrot.slane %v6477_v23, 5 }
  0xfd   : > { %5082 = vmatpush3.bf16.msra.mxu0 %v5377_v45  ;;  %5069 = vmatprep.mubr.bf16.mxu0 %v4477_v31  ;;  %v4516_v45 = vcombine.low %v3614_v12, %v3617_v39  ;;  %v4518_v31 = vcombine.low %v3628_v16, %v3631_v15 }
  0xfe   : > { %5083 = vmatprep.subr.bf16.mxu0 %v5378_v55  ;;  %5111 = vmatprep.subr.bf16.mxu1 %v5381_v51  ;;  %v3603_v26 = vsel %vm6056_vm15, %v3601_v7, %v3602_v43 }
  0xff   : > { %4942 = vmatmul.mubr.bf16.gmra.mrb[12].mxu1 %v5384_v22  ;;  %v4514_v30 = vcombine.low %v3600_v24, %v3603_v26 }
 0x100   : > { %5119 = vmatpush3.bf16.msra.mxu1 %v5381_v51  ;;  %5097 = vmatprep.mubr.bf16.mxu1 %v4515_v47 }
 0x101   : > { %5084 = vmatpush3.bf16.msra.mxu0 %v5378_v55  ;;  %5112 = vmatprep.subr.bf16.mxu1 %v5382_v52  ;;  %v4513_v55 = vcombine.low %v3593_v50, %v3596_v48 }
 0x102   : > { %5085 = vmatprep.subr.bf16.mxu0 %v5381_v51 }
 0x104   : > { %5070 = vmatmul.mubr.bf16.gmra.mrb[12].mxu0 %v4478_v1  ;;  %5120 = vmatpush3.bf16.msra.mxu1 %v5382_v52 }
 0x105   : > { %5086 = vmatpush3.bf16.msra.mxu0 %v5381_v51  ;;  %5089 = vmatprep.mubr.bf16.mxu0 %v4511_v37 }
 0x106   : > { %5087 = vmatprep.subr.bf16.mxu0 %v5382_v52 }
 0x107   : > { %5098 = vmatmul.mubr.bf16.vlgmr.msra.gmra.mrb[16].mxu1 %v4516_v45 }
 0x108   : > { %5101 = vmatprep.mubr.bf16.mxu1 %v4517_v46 }
 0x109   : > { %5088 = vmatpush3.bf16.msra.mxu0 %v5382_v52 }
 0x10c   : > { %5090 = vmatmul.mubr.bf16.vlgmr.msra.gmra.mrb[0].mxu0 %v4512_v29 }
 0x10d   : > { %5093 = vmatprep.mubr.bf16.mxu0 %v4513_v55 }
 0x10f   : > { %5102 = vmatmul.mubr.bf16.gmra.mrb[20].mxu1 %v4518_v31 }
 0x114   : > { %5094 = vmatmul.mubr.bf16.gmra.mrb[4].mxu0 %v4514_v30 }
 0x1ba   : > { %v4931_v27 = vpop.f32.mrb[0].mxu1 }
 0x1bb   : > { %v2072_v0 = vpop.f32.mrb[1].mxu1 }
 0x1bc   : > { %v4932_v56 = vpop.f32.mrb[2].mxu1 }
 0x1bd   : > { %v2075_v2 = vpop.f32.mrb[3].mxu1 }
 0x1c2   : > { %v6651_v62 = vpop.f32.mrb[4].mxu1 }
 0x1c3   : > { %v6653_v53 = vpop.f32.mrb[5].mxu1 }
 0x1c4   : > { %v6655_v23 = vpop.f32.mrb[6].mxu1 }
 0x1c5   : > { %v6657_v25 = vpop.f32.mrb[7].mxu1 }
 0x1ca   : > { %v4939_v36 = vpop.f32.mrb[8].mxu1 }
 0x1cb   : > { %v2104_v38 = vpop.f32.mrb[9].mxu1 }
 0x1cc   : > { %v4940_v18 = vpop.f32.mrb[10].mxu1 }
 0x1cd   : > { %v2107_v14 = vpop.f32.mrb[11].mxu1 }
 0x1cf   : > { %v5067_v22 = vpop.f32.mrb[8].mxu0 }
 0x1d0   : > { %v3497_v51 = vpop.f32.mrb[9].mxu0  ;;  %v5129_v8 = vadd.f32 %v5067_v22, %v4939_v36 }
 0x1d1   : > { %v5068_v32 = vpop.f32.mrb[10].mxu0  ;;  %v5131_v61 = vadd.f32 %v3497_v51, %v2104_v38 }
 0x1d2   : > { %v3500_v47 = vpop.f32.mrb[11].mxu0  ;;  %v5133_v19 = vadd.f32 %v5068_v32, %v4940_v18  ;;  %v4943_v63 = vpop.f32.mrb[12].mxu1 }
 0x1d3   : > { %v5135_v13 = vadd.f32 %v3500_v47, %v2107_v14  ;;  %v2120_v3 = vpop.f32.mrb[13].mxu1 }
 0x1d4   : > { %v4944_v35 = vpop.f32.mrb[14].mxu1 }
 0x1d5   : > { %v2123_v59 = vpop.f32.mrb[15].mxu1 }
 0x1d7   : > { %v5071_v28 = vpop.f32.mrb[12].mxu0 }
 0x1d8   : > { %v3513_v42 = vpop.f32.mrb[13].mxu0  ;;  %v5137_v52 = vadd.f32 %v5071_v28, %v4943_v63 }
 0x1d9   : > { %v5072_v34 = vpop.f32.mrb[14].mxu0  ;;  %v5139_v10 = vadd.f32 %v3513_v42, %v2120_v3 }
 0x1da   : > { %v3516_v58 = vpop.f32.mrb[15].mxu0  ;;  %v5141_v1 = vadd.f32 %v5072_v34, %v4944_v35  ;;  %v5099_v12 = vpop.f32.mrb[16].mxu1 }
 0x1db   : > { %v5143_v39 = vadd.f32 %v3516_v58, %v2123_v59  ;;  %v6659_v5 = vadd.f32 %v5129_v8, %v5099_v12  ;;  %v3795_v37 = vpop.f32.mrb[17].mxu1 }
 0x1dc   : > { %v6661_v17 = vadd.f32 %v5131_v61, %v3795_v37  ;;  %v5100_v4 = vpop.f32.mrb[18].mxu1 }
 0x1dd   : > { %v6663_v49 = vadd.f32 %v5133_v19, %v5100_v4  ;;  %v3798_v44 = vpop.f32.mrb[19].mxu1 }
 0x1de   : > { %v6665_v57 = vadd.f32 %v5135_v13, %v3798_v44  ;;  %v3953_v44 = vmul.f32 %v6659_v5, %v6659_v5 }
 0x1df   : > { %v5091_v20 = vpop.f32.mrb[0].mxu0  ;;  %v4647_v54 = vpack.c.bf16 %v6663_v49, %v6659_v5 }
 0x1e0   : > { %v5121_v45 = vadd.f32 %v5091_v20, %v4931_v27  ;;  %v3763_v46 = vpop.f32.mrb[1].mxu0  ;;  %v4642_v6 = vpack.c.bf16 %v6665_v57, %v6661_v17 }
 0x1e1   : > { %v5122_v41 = vadd.f32 %v3763_v46, %v2072_v0  ;;  %v5092_v60 = vpop.f32.mrb[2].mxu0  ;;  %4670 = vst [vmem:[%s6674_s23 + $0x28] sm:$0xff] %v4647_v54  }
 0x1e2   : > { %v5123_v33 = vadd.f32 %v5092_v60, %v4932_v56  ;;  %v3766_v21 = vpop.f32.mrb[3].mxu0  ;;  %4669 = vst [vmem:[%s6674_s23 + $0x20] sm:$0xff] %v4642_v6   ;;  %v5103_v9 = vpop.f32.mrb[20].mxu1  ;;  %v3945_v30 = vmul.f32 %v5121_v45, %v5121_v45 }
 0x1e3   : > { %v5124_v50 = vadd.f32 %v3766_v21, %v2075_v2  ;;  %v6680_v48 = vadd.f32 %v5137_v52, %v5103_v9  ;;  %v3811_v40 = vpop.f32.mrb[21].mxu1  ;;  %v3943_v55 = vmul.f32 %v5122_v41, %v5122_v41 }
 0x1e4   : > { %v4627_v29 = vpack.c.bf16 %v5123_v33, %v5121_v45  ;;  %v5140_v16 = vadd.f32 %v5139_v10, %v3811_v40  ;;  %v5104_v15 = vpop.f32.mrb[22].mxu1  ;;  %v3946_v14 = vmul.f32 %v5123_v33, %v5123_v33 }
 0x1e5   : > { %v4622_v11 = vpack.c.bf16 %v5124_v50, %v5122_v41  ;;  %v3922_v7 = vadd.f32 %v5124_v50, %v5122_v41  ;;  %v3944_v43 = vmul.f32 %v5124_v50, %v5124_v50  ;;  %v3814_v31 = vpop.f32.mrb[23].mxu1  ;;  %v5142_v24 = vadd.f32 %v5141_v1, %v5104_v15 }
 0x1e6   : > { %4666 = vst [vmem:[%s6674_s23 + $0x8] sm:$0xff] %v4627_v29   ;;  %v5144_v26 = vadd.f32 %v5143_v39, %v3814_v31  ;;  %v3951_v1 = vmul.f32 %v6661_v17, %v6661_v17  ;;  %v3955_v41 = vmul.f32 %v5140_v16, %v5140_v16  ;;  %v3957_v9 = vmul.f32 %v6680_v48, %v6680_v48 }
 0x1e7   : > { %4623 = vst [vmem:[%s6674_s23] sm:$0xff] %v4622_v11   ;;  %v3923_v27 = vadd.f32 %v5121_v45, %v3922_v7  ;;  %v3959_v0 = vadd.f32 %v3944_v43, %v3943_v55  ;;  %v5095_v56 = vpop.f32.mrb[4].mxu0  ;;  %v4657_v38 = vpack.c.bf16 %v5142_v24, %v6680_v48  ;;  %v3954_v45 = vmul.f32 %v6663_v49, %v6663_v49 }
 0x1e8   : > { %v5125_v2 = vadd.f32 %v5095_v56, %v6651_v62  ;;  %v3779_v36 = vpop.f32.mrb[5].mxu0  ;;  %v4652_v18 = vpack.c.bf16 %v5144_v26, %v5140_v16  ;;  %v3956_v21 = vmul.f32 %v5144_v26, %v5144_v26  ;;  %v3958_v40 = vmul.f32 %v5142_v24, %v5142_v24 }
 0x1e9   : > { %v3960_v22 = vadd.f32 %v3959_v0, %v3945_v30  ;;  %v5126_v51 = vadd.f32 %v3779_v36, %v6653_v53  ;;  %v3924_v8 = vadd.f32 %v5123_v33, %v3923_v27  ;;  %v5096_v32 = vpop.f32.mrb[6].mxu0  ;;  %4672 = vst [vmem:[%s6674_s23 + $0x38] sm:$0xff] %v4657_v38  }
 0x1ea   : > { %v5127_v61 = vadd.f32 %v5096_v32, %v6655_v23  ;;  %v3782_v47 = vpop.f32.mrb[7].mxu0  ;;  %4671 = vst [vmem:[%s6674_s23 + $0x30] sm:$0xff] %v4652_v18   ;;  %v3949_v53 = vmul.f32 %v5125_v2, %v5125_v2 }
 0x1eb   : > { %v3925_v19 = vadd.f32 %v5126_v51, %v3924_v8  ;;  %v3947_v63 = vmul.f32 %v5126_v51, %v5126_v51  ;;  %v3961_v62 = vadd.f32 %v3960_v22, %v3946_v14  ;;  %v5128_v13 = vadd.f32 %v3782_v47, %v6657_v25 }
 0x1ec   : > { %v4637_v3 = vpack.c.bf16 %v5127_v61, %v5125_v2  ;;  %v3950_v10 = vmul.f32 %v5127_v61, %v5127_v61  ;;  %v3952_v25 = vmul.f32 %v6665_v57, %v6665_v57 }
 0x1ed   : > { %v3962_v35 = vadd.f32 %v3961_v62, %v3947_v63  ;;  %v4632_v59 = vpack.c.bf16 %v5128_v13, %v5126_v51  ;;  %v3926_v28 = vadd.f32 %v5128_v13, %v3925_v19  ;;  %v3948_v42 = vmul.f32 %v5128_v13, %v5128_v13 }
 0x1ee   : > { %4668 = vst [vmem:[%s6674_s23 + $0x18] sm:$0xff] %v4637_v3  }
 0x1ef   : > { %4667 = vst [vmem:[%s6674_s23 + $0x10] sm:$0xff] %v4632_v59   ;;  %v3927_v52 = vadd.f32 %v5125_v2, %v3926_v28  ;;  %v3963_v34 = vadd.f32 %v3962_v35, %v3948_v42 }
 0x1f1   : > { %v3928_v23 = vadd.f32 %v5127_v61, %v3927_v52  ;;  %v3964_v58 = vadd.f32 %v3963_v34, %v3949_v53 }
 0x1f3   : > { %v3929_v12 = vadd.f32 %v6661_v17, %v3928_v23  ;;  %v3965_v39 = vadd.f32 %v3964_v58, %v3950_v10 }
 0x1f5   : > { %v3966_v37 = vadd.f32 %v3965_v39, %v3951_v1  ;;  %v3930_v4 = vadd.f32 %v6665_v57, %v3929_v12 }
 0x1f7   : > { %v3931_v20 = vadd.f32 %v6659_v5, %v3930_v4  ;;  %v3967_v54 = vadd.f32 %v3966_v37, %v3952_v25 }
 0x1f9   : > { %v3932_v46 = vadd.f32 %v6663_v49, %v3931_v20  ;;  %v3968_v17 = vadd.f32 %v3967_v54, %v3953_v44 }
 0x1fb   : > { %v3933_v6 = vadd.f32 %v5140_v16, %v3932_v46  ;;  %v3969_v60 = vadd.f32 %v3968_v17, %v3954_v45 }
 0x1fd   : > { %v3970_v33 = vadd.f32 %v3969_v60, %v3955_v41  ;;  %v3934_v57 = vadd.f32 %v5144_v26, %v3933_v6 }
 0x1ff   : > { %v3935_v5 = vadd.f32 %v6680_v48, %v3934_v57  ;;  %v3971_v50 = vadd.f32 %v3970_v33, %v3956_v21 }
 0x201   : > { %v3936_v29 = vadd.f32 %v5142_v24, %v3935_v5  ;;  %v3972_v15 = vadd.f32 %v3971_v50, %v3957_v9 }
 0x203   : > { %v3937_v49 = vrot.slane %v3936_v29, 4  ;;  %v3973_v55 = vadd.f32 %v3972_v15, %v3958_v40 }
 0x205   : > { %v3938_v11 = vadd.f32 %v3937_v49, %v3936_v29  ;;  %v3974_v16 = vrot.slane %v3973_v55, 4 }
 0x207   : > { %v3939_v7 = vrot.slane %v3938_v11, 2  ;;  %v3975_v43 = vadd.f32 %v3974_v16, %v3973_v55 }
 0x209   : > { %v3940_v31 = vadd.f32 %v3939_v7, %v3938_v11  ;;  %v3976_v26 = vrot.slane %v3975_v43, 2 }
 0x20b   : > { %v3941_v30 = vrot.slane %v3940_v31, 1  ;;  %v3977_v27 = vadd.f32 %v3976_v26, %v3975_v43 }
 0x20d   : > { %v3978_v48 = vrot.slane %v3977_v27, 1  ;;  %v3942_v24 = vadd.f32 %v3941_v30, %v3940_v31 }
 0x20f   : > { %v3979_v0 = vadd.f32 %v3978_v48, %v3977_v27 }
 0x211   : > { %v3981_v56 = vsel %vm603_vm0, %v3942_v24, %v3979_v0 }
 0x212   : > { %3982 = vst [vmem:[%s467_s15] sm:$0x3] %v3981_v56 }
 0x213 PF: > { %s18_s28 = sadd.s32 1, %s5441_s28   ;;  %s6755_s24 = smov %s5433_s26 }
 0x214   : > { %p15_p13 = scmp.ge.s32.totalorder %s18_s28, 6   ;;  %s6756_s25 = smov %s5437_s27 }
 0x215   : > { %s6757_s26 = smov %s6760_s29  ;;  %s6758_s27 = smov %s6764_s30 }
 0x216   :  { %17 = sbr.rel (!%p15_p13) target bundleno = 3 (0x3), region = 103 }

</bundles_post_ra>
